<compile_context>
chip_gen: v7x
topology: tpu7x:2x2x1
jax: 0.10.0
libtpu: 0.0.40
codegen_flags: <defaults>
</compile_context>

<pallas_src>
import functools

import jax
import jax.numpy as jnp
from jax.experimental import pallas as pl
from jax.experimental.pallas import tpu as pltpu

EPS = 1e-5


# ------------------------------ fused kernel --------------------------------
def _fgfs1_kernel(x_ref, w1_ref, s1_ref, t1_ref,
                  w2_ref, s2_ref, t2_ref,
                  w3_ref, s3_ref, t3_ref,
                  o_ref, y1p_ref, y2p_ref,
                  *, H, W, Cin, Cout, dil):
    f32 = jnp.float32
    H1, W1 = H + 2, W + 2                    # con1 output spatial (k=1, pad=1)
    Hp = H1 + 2                              # con2 zero-padded input rows
    Wpad = y1p_ref.shape[1]                  # padded cols rounded up to 8 (extra cols stay 0)
    Ho, Wo = H1 + 2 - 2 * dil, W1 + 2 - 2 * dil   # con2 output spatial (k=3, pad=1, dil)
    H3, W3 = Ho + 2, Wo + 2                  # con3 output spatial (== H, W)

    # ---- con1: 1x1 conv + folded BN + ReLU (per-pixel channel GEMM) --------
    x2d = x_ref[0].reshape(H * W, Cin)                           # layout-trivial (W % 8 == 0)
    y1 = jnp.dot(x2d, w1_ref[...], preferred_element_type=f32)
    y1 = jnp.maximum(y1 * s1_ref[...] + t1_ref[...], 0.0)        # (H*W, Cin)

    # ---- assemble con2's zero-padded input in VMEM -------------------------
    # outer ring  : conv2's own zero padding                    -> 0
    # next ring   : conv1 applied to its zero padding           -> relu(shift1)
    # interior    : conv1 applied to real pixels                -> y1
    y1p_ref[...] = jnp.zeros_like(y1p_ref)
    y1p_ref[1:H1 + 1, 1:W1 + 1, :] = jnp.broadcast_to(
        jnp.maximum(t1_ref[...], 0.0), (H1, W1, Cin))
    y1p_ref[2:H + 2, 2:W + 2, :] = y1.reshape(H, W, Cin)

    # ---- con2: dilated 3x3 conv as ONE GEMM (taps packed along N) ----------
    # g[i, j, t*Cout + o] = sum_c y1p[i, j, c] * W2[o, c, ky, kx],  t = 3*ky + kx
    g = jnp.dot(y1p_ref[...].reshape(Hp * Wpad, Cin), w2_ref[...],
                preferred_element_type=f32)                      # (Hp*Wpad, 9*Cout)
    g = g.reshape(Hp, Wpad, 9 * Cout)
    acc = jnp.zeros((Ho, Wo, Cout), f32)
    for ky in range(3):                                          # 9 shifted slice-adds
        for kx in range(3):
            t = 3 * ky + kx
            acc = acc + g[dil * ky: dil * ky + Ho,
                          dil * kx: dil * kx + Wo,
                          t * Cout:(t + 1) * Cout]
    y2 = jnp.maximum(acc * s2_ref[...] + t2_ref[...], 0.0)       # (Ho, Wo, Cout)

    # ---- con3: zero-pad by 1, then 1x1 conv + folded BN + ReLU -------------
    # (zero rows automatically give relu(shift3) after the folded epilogue)
    y2p_ref[...] = jnp.zeros_like(y2p_ref)
    y2p_ref[1:Ho + 1, 1:Wo + 1, :] = y2
    y3 = jnp.dot(y2p_ref[...].reshape(H3 * W3, Cout), w3_ref[...],
                 preferred_element_type=f32)
    y3 = jnp.maximum(y3 * s3_ref[...] + t3_ref[...], 0.0)        # (H3*W3, Cin)
    o_ref[0] = y3.reshape(H3, W3, Cin).astype(o_ref.dtype)


# --------------------------- parameters (deterministic) ---------------------
def init_params(key, cin, cout):
    ks = jax.random.split(key, 18)

    def uinit(k, shape, fan_in):
        b = 1.0 / float(fan_in) ** 0.5
        return jax.random.uniform(k, shape, jnp.float32, -b, b)

    # PyTorch conv-weight layout (Cout, Cin, kH, kW), rearranged for channels-last GEMMs.
    w1_t = uinit(ks[0], (cin, cin, 1, 1), cin * 1 * 1)
    b1 = uinit(ks[1], (cin,), cin * 1 * 1)
    w2_t = uinit(ks[2], (cout, cin, 3, 3), cin * 3 * 3)
    b2 = uinit(ks[3], (cout,), cin * 3 * 3)
    w3_t = uinit(ks[4], (cin, cout, 1, 1), cout * 1 * 1)
    b3 = uinit(ks[5], (cin,), cout * 1 * 1)

    def bn_fold(kg, kb, km, kv, conv_bias, c):
        gamma = 1.0 + 0.1 * jax.random.normal(kg, (c,), jnp.float32)
        beta = 0.1 * jax.random.normal(kb, (c,), jnp.float32)
        mean = 0.1 * jax.random.normal(km, (c,), jnp.float32)
        var = 1.0 + 0.2 * jax.random.uniform(kv, (c,), jnp.float32)
        scale = gamma * jax.lax.rsqrt(var + EPS)
        shift = beta + (conv_bias - mean) * scale
        return scale, shift

    scale1, shift1 = bn_fold(ks[6], ks[7], ks[8], ks[9], b1, cin)
    scale2, shift2 = bn_fold(ks[10], ks[11], ks[12], ks[13], b2, cout)
    scale3, shift3 = bn_fold(ks[14], ks[15], ks[16], ks[17], b3, cin)

    return dict(
        w1=jnp.transpose(w1_t[:, :, 0, 0]),                            # (Cin, Cin)  [in, out]
        # all 9 taps packed along the GEMM N dim: [c, (3*ky+kx)*Cout + o]
        w2cat=jnp.transpose(w2_t, (1, 2, 3, 0)).reshape(cin, 9 * cout),  # (Cin, 9*Cout)
        w3=jnp.transpose(w3_t[:, :, 0, 0]),                            # (Cout, Cin) [in, out]
        scale1=scale1, shift1=shift1,
        scale2=scale2, shift2=shift2,
        scale3=scale3, shift3=shift3,
    )


# ----------------------------------- forward --------------------------------
def fgfs1_forward(params, x_nchw):
    n, cin, h, w = x_nchw.shape
    cout = params["scale2"].shape[0]
    assert h >= 3 and w >= 8 and w % 8 == 0, (
        "this kernel assumes W is a multiple of 8 (layout-trivial in-kernel reshapes)")

    dil = 3
    hp, wp = h + 4, w + 4                       # con2 padded input spatial
    wpad = ((wp + 7) // 8) * 8                  # scratch cols rounded up to the sublane tile
    ho, wo = (h + 2) + 2 - 2 * dil, (w + 2) + 2 - 2 * dil
    h3, w3 = ho + 2, wo + 2                     # final spatial (== h, w)

    x = jnp.transpose(x_nchw, (0, 2, 3, 1)).astype(jnp.float32)    # NCHW -> NHWC

    kernel = functools.partial(_fgfs1_kernel, H=h, W=w, Cin=cin, Cout=cout, dil=dil)

    y = pl.pallas_call(
        kernel,
        out_shape=jax.ShapeDtypeStruct((n, h3, w3, cin), jnp.float32),
        grid=(n,),
        in_specs=[
            pl.BlockSpec((1, h, w, cin), lambda b: (b, 0, 0, 0)),
            pl.BlockSpec((cin, cin), lambda b: (0, 0)),
            pl.BlockSpec((1, cin), lambda b: (0, 0)),
            pl.BlockSpec((1, cin), lambda b: (0, 0)),
            pl.BlockSpec((cin, 9 * cout), lambda b: (0, 0)),
            pl.BlockSpec((1, cout), lambda b: (0, 0)),
            pl.BlockSpec((1, cout), lambda b: (0, 0)),
            pl.BlockSpec((cout, cin), lambda b: (0, 0)),
            pl.BlockSpec((1, cin), lambda b: (0, 0)),
            pl.BlockSpec((1, cin), lambda b: (0, 0)),
        ],
        out_specs=pl.BlockSpec((1, h3, w3, cin), lambda b: (b, 0, 0, 0)),
        scratch_shapes=[
            pltpu.VMEM((hp, wpad, cin), jnp.float32),   # con2 zero-padded input
            pltpu.VMEM((h3, w3, cout), jnp.float32),    # con3 zero-padded input
        ],
        compiler_params=pltpu.CompilerParams(
            dimension_semantics=("parallel",),          # batch axis -> megacore / v7x 2-TC
            vmem_limit_bytes=32 * 1024 * 1024,          # explicit budget (fits v7x 64 MiB)
        ),
    )(x,
      params["w1"], params["scale1"].reshape(1, cin), params["shift1"].reshape(1, cin),
      params["w2cat"], params["scale2"].reshape(1, cout), params["shift2"].reshape(1, cout),
      params["w3"], params["scale3"].reshape(1, cin), params["shift3"].reshape(1, cin))

    return jnp.transpose(y, (0, 3, 1, 2))                          # NHWC -> NCHW


# ------------------- pure-JAX reference (same folded params) ----------------
def fgfs1_reference(params, x_nchw):
    hi = jax.lax.Precision.HIGHEST
    x = jnp.transpose(x_nchw, (0, 2, 3, 1)).astype(jnp.float32)
    n, h, w, cin = x.shape
    cout = params["scale2"].shape[0]
    # con1
    xp = jnp.pad(x, ((0, 0), (1, 1), (1, 1), (0, 0)))
    y1 = jnp.maximum(jnp.einsum("nhwc,cd->nhwd", xp, params["w1"], precision=hi)
                     * params["scale1"] + params["shift1"], 0.0)
    # con2 (k=3, pad=1, dilation=3)
    y1p = jnp.pad(y1, ((0, 0), (1, 1), (1, 1), (0, 0)))
    w2 = params["w2cat"].reshape(cin, 3, 3, cout)
    ho, wo = h - 2, w - 2
    acc = jnp.zeros((n, ho, wo, cout), jnp.float32)
    for ky in range(3):
        for kx in range(3):
            acc = acc + jnp.einsum(
                "nhwc,co->nhwo",
                y1p[:, 3 * ky:3 * ky + ho, 3 * kx:3 * kx + wo, :],
                w2[:, ky, kx, :], precision=hi)
    y2 = jnp.maximum(acc * params["scale2"] + params["shift2"], 0.0)
    # con3
    y2p = jnp.pad(y2, ((0, 0), (1, 1), (1, 1), (0, 0)))
    y3 = jnp.maximum(jnp.einsum("nhwo,oc->nhwc", y2p, params["w3"], precision=hi)
                     * params["scale3"] + params["shift3"], 0.0)
    return jnp.transpose(y3, (0, 3, 1, 2))


if __name__ == "__main__":
    key = jax.random.PRNGKey(0)
    kp, kx = jax.random.split(key)
    in_channels, out_channels = 4, 8
    params = init_params(kp, in_channels, out_channels)
    x = jax.random.normal(kx, (2, in_channels, 16, 16), jnp.float32)   # NCHW like PyTorch

    out = jax.jit(fgfs1_forward)(params, x)
    jax.block_until_ready(out)

    assert out.shape == (2, in_channels, 16, 16), out.shape
    assert bool(jnp.all(jnp.isfinite(out)))

    ref = jax.jit(fgfs1_reference)(params, x)
    assert bool(jnp.allclose(out, ref, atol=2e-3, rtol=2e-3)), \
        float(jnp.max(jnp.abs(out - ref)))

    print("KERNEL_OK")
</pallas_src>

<mosaic_0001>
module attributes {stable_mosaic.version = 11 : i64} {
  func.func @_fgfs1_kernel(%arg0: i32, %arg1: memref<1x16x16x4xf32, #tpu.memory_space<vmem>>, %arg2: memref<4x4xf32, #tpu.memory_space<vmem>>, %arg3: memref<1x4xf32, #tpu.memory_space<vmem>>, %arg4: memref<1x4xf32, #tpu.memory_space<vmem>>, %arg5: memref<4x72xf32, #tpu.memory_space<vmem>>, %arg6: memref<1x8xf32, #tpu.memory_space<vmem>>, %arg7: memref<1x8xf32, #tpu.memory_space<vmem>>, %arg8: memref<8x4xf32, #tpu.memory_space<vmem>>, %arg9: memref<1x4xf32, #tpu.memory_space<vmem>>, %arg10: memref<1x4xf32, #tpu.memory_space<vmem>>, %arg11: memref<1x16x16x4xf32, #tpu.memory_space<vmem>>, %arg12: memref<20x24x4xf32, #tpu.memory_space<vmem>>, %arg13: memref<16x16x8xf32, #tpu.memory_space<vmem>>) attributes {dimension_semantics = [#tpu.dimension_semantics<parallel>], iteration_bounds = array<i64: 2>, scalar_prefetch = 0 : i64, scratch_operands = 2 : i64, tpu.core_type = #tpu.core_type<tc>, window_params = [{transform_indices = @transform_0, window_bounds = array<i64: 1, 16, 16, 4>}, {pipeline_mode = #tpu.pipeline_mode<synchronous>, transform_indices = @transform_1, window_bounds = array<i64: 4, 4>}, {pipeline_mode = #tpu.pipeline_mode<synchronous>, transform_indices = @transform_2, window_bounds = array<i64: 1, 4>}, {pipeline_mode = #tpu.pipeline_mode<synchronous>, transform_indices = @transform_3, window_bounds = array<i64: 1, 4>}, {pipeline_mode = #tpu.pipeline_mode<synchronous>, transform_indices = @transform_4, window_bounds = array<i64: 4, 72>}, {pipeline_mode = #tpu.pipeline_mode<synchronous>, transform_indices = @transform_5, window_bounds = array<i64: 1, 8>}, {pipeline_mode = #tpu.pipeline_mode<synchronous>, transform_indices = @transform_6, window_bounds = array<i64: 1, 8>}, {pipeline_mode = #tpu.pipeline_mode<synchronous>, transform_indices = @transform_7, window_bounds = array<i64: 8, 4>}, {pipeline_mode = #tpu.pipeline_mode<synchronous>, transform_indices = @transform_8, window_bounds = array<i64: 1, 4>}, {pipeline_mode = #tpu.pipeline_mode<synchronous>, transform_indices = @transform_9, window_bounds = array<i64: 1, 4>}, {transform_indices = @transform_10, window_bounds = array<i64: 1, 16, 16, 4>}]} {
    %c0 = arith.constant 0 : index
    %c0_0 = arith.constant 0 : index
    %c0_1 = arith.constant 0 : index
    %c0_2 = arith.constant 0 : index
    %0 = vector.load %arg1[%c0, %c0_0, %c0_1, %c0_2] : memref<1x16x16x4xf32, #tpu.memory_space<vmem>>, vector<1x16x16x4xf32>
    %1 = vector.shape_cast %0 : vector<1x16x16x4xf32> to vector<16x16x4xf32>
    %2 = vector.shape_cast %1 : vector<16x16x4xf32> to vector<256x4xf32>
    %c0_3 = arith.constant 0 : index
    %c0_4 = arith.constant 0 : index
    %3 = vector.load %arg2[%c0_3, %c0_4] : memref<4x4xf32, #tpu.memory_space<vmem>>, vector<4x4xf32>
    %cst = arith.constant dense<0.000000e+00> : vector<256x4xf32>
    %4 = tpu.matmul %2, %3, %cst {dimension_numbers = #tpu.dot_dimension_numbers<[1], [0], [0], [1], [0, 0, 1, 1], [], []>} : vector<256x4xf32>, vector<4x4xf32>, vector<256x4xf32> -> vector<256x4xf32>
    %c0_5 = arith.constant 0 : index
    %c0_6 = arith.constant 0 : index
    %5 = vector.load %arg3[%c0_5, %c0_6] : memref<1x4xf32, #tpu.memory_space<vmem>>, vector<1x4xf32>
    %6 = vector.broadcast %5 : vector<1x4xf32> to vector<256x4xf32>
    %7 = arith.mulf %4, %6 : vector<256x4xf32>
    %c0_7 = arith.constant 0 : index
    %c0_8 = arith.constant 0 : index
    %8 = vector.load %arg4[%c0_7, %c0_8] : memref<1x4xf32, #tpu.memory_space<vmem>>, vector<1x4xf32>
    %9 = vector.broadcast %8 : vector<1x4xf32> to vector<256x4xf32>
    %10 = arith.addf %7, %9 : vector<256x4xf32>
    %cst_9 = arith.constant 0.000000e+00 : f32
    %11 = vector.broadcast %cst_9 : f32 to vector<256x4xf32>
    %12 = arith.maximumf %10, %11 : vector<256x4xf32>
    %cst_10 = arith.constant 0.000000e+00 : f32
    %13 = vector.broadcast %cst_10 : f32 to vector<20x24x4xf32>
    %c0_11 = arith.constant 0 : index
    %c0_12 = arith.constant 0 : index
    %c0_13 = arith.constant 0 : index
    %14 = vector.load %arg12[%c0_11, %c0_12, %c0_13] : memref<20x24x4xf32, #tpu.memory_space<vmem>>, vector<20x24x4xf32>
    tpu.vector_store %arg12[%c0_11, %c0_12, %c0_13], %13 {strides = array<i32>} : memref<20x24x4xf32, #tpu.memory_space<vmem>>, vector<20x24x4xf32>,
    %c0_14 = arith.constant 0 : index
    %c0_15 = arith.constant 0 : index
    %15 = vector.load %arg4[%c0_14, %c0_15] : memref<1x4xf32, #tpu.memory_space<vmem>>, vector<1x4xf32>
    %cst_16 = arith.constant 0.000000e+00 : f32
    %16 = vector.broadcast %cst_16 : f32 to vector<1x4xf32>
    %17 = arith.maximumf %15, %16 : vector<1x4xf32>
    %18 = vector.shape_cast %17 : vector<1x4xf32> to vector<1x1x4xf32>
    %19 = vector.broadcast %18 : vector<1x1x4xf32> to vector<18x18x4xf32>
    %c1 = arith.constant 1 : index
    %c1_17 = arith.constant 1 : index
    %c0_18 = arith.constant 0 : index
    %20 = vector.load %arg12[%c1, %c1_17, %c0_18] : memref<20x24x4xf32, #tpu.memory_space<vmem>>, vector<18x18x4xf32>
    tpu.vector_store %arg12[%c1, %c1_17, %c0_18], %19 {strides = array<i32>} : memref<20x24x4xf32, #tpu.memory_space<vmem>>, vector<18x18x4xf32>,
    %21 = vector.shape_cast %12 : vector<256x4xf32> to vector<16x16x4xf32>
    %c2 = arith.constant 2 : index
    %c2_19 = arith.constant 2 : index
    %c0_20 = arith.constant 0 : index
    %22 = vector.load %arg12[%c2, %c2_19, %c0_20] : memref<20x24x4xf32, #tpu.memory_space<vmem>>, vector<16x16x4xf32>
    tpu.vector_store %arg12[%c2, %c2_19, %c0_20], %21 {strides = array<i32>} : memref<20x24x4xf32, #tpu.memory_space<vmem>>, vector<16x16x4xf32>,
    %c0_21 = arith.constant 0 : index
    %c0_22 = arith.constant 0 : index
    %c0_23 = arith.constant 0 : index
    %23 = vector.load %arg12[%c0_21, %c0_22, %c0_23] : memref<20x24x4xf32, #tpu.memory_space<vmem>>, vector<20x24x4xf32>
    %24 = vector.shape_cast %23 : vector<20x24x4xf32> to vector<480x4xf32>
    %c0_24 = arith.constant 0 : index
    %c0_25 = arith.constant 0 : index
    %25 = vector.load %arg5[%c0_24, %c0_25] : memref<4x72xf32, #tpu.memory_space<vmem>>, vector<4x72xf32>
    %cst_26 = arith.constant dense<0.000000e+00> : vector<480x72xf32>
    %26 = tpu.matmul %24, %25, %cst_26 {dimension_numbers = #tpu.dot_dimension_numbers<[1], [0], [0], [1], [0, 0, 1, 1], [], []>} : vector<480x4xf32>, vector<4x72xf32>, vector<480x72xf32> -> vector<480x72xf32>
    %27 = vector.shape_cast %26 : vector<480x72xf32> to vector<20x24x72xf32>
    %cst_27 = arith.constant 0.000000e+00 : f32
    %28 = vector.broadcast %cst_27 : f32 to vector<14x14x8xf32>
    %29 = vector.extract_strided_slice %27 {offsets = [0, 0, 0], sizes = [14, 14, 8], strides = [1, 1, 1]} : vector<20x24x72xf32> to vector<14x14x8xf32>
    %30 = arith.addf %28, %29 : vector<14x14x8xf32>
    %31 = vector.extract_strided_slice %27 {offsets = [0, 3, 8], sizes = [14, 14, 8], strides = [1, 1, 1]} : vector<20x24x72xf32> to vector<14x14x8xf32>
    %32 = arith.addf %30, %31 : vector<14x14x8xf32>
    %33 = vector.extract_strided_slice %27 {offsets = [0, 6, 16], sizes = [14, 14, 8], strides = [1, 1, 1]} : vector<20x24x72xf32> to vector<14x14x8xf32>
    %34 = arith.addf %32, %33 : vector<14x14x8xf32>
    %35 = vector.extract_strided_slice %27 {offsets = [3, 0, 24], sizes = [14, 14, 8], strides = [1, 1, 1]} : vector<20x24x72xf32> to vector<14x14x8xf32>
    %36 = arith.addf %34, %35 : vector<14x14x8xf32>
    %37 = vector.extract_strided_slice %27 {offsets = [3, 3, 32], sizes = [14, 14, 8], strides = [1, 1, 1]} : vector<20x24x72xf32> to vector<14x14x8xf32>
    %38 = arith.addf %36, %37 : vector<14x14x8xf32>
    %39 = vector.extract_strided_slice %27 {offsets = [3, 6, 40], sizes = [14, 14, 8], strides = [1, 1, 1]} : vector<20x24x72xf32> to vector<14x14x8xf32>
    %40 = arith.addf %38, %39 : vector<14x14x8xf32>
    %41 = vector.extract_strided_slice %27 {offsets = [6, 0, 48], sizes = [14, 14, 8], strides = [1, 1, 1]} : vector<20x24x72xf32> to vector<14x14x8xf32>
    %42 = arith.addf %40, %41 : vector<14x14x8xf32>
    %43 = vector.extract_strided_slice %27 {offsets = [6, 3, 56], sizes = [14, 14, 8], strides = [1, 1, 1]} : vector<20x24x72xf32> to vector<14x14x8xf32>
    %44 = arith.addf %42, %43 : vector<14x14x8xf32>
    %45 = vector.extract_strided_slice %27 {offsets = [6, 6, 64], sizes = [14, 14, 8], strides = [1, 1, 1]} : vector<20x24x72xf32> to vector<14x14x8xf32>
    %46 = arith.addf %44, %45 : vector<14x14x8xf32>
    %c0_28 = arith.constant 0 : index
    %c0_29 = arith.constant 0 : index
    %47 = vector.load %arg6[%c0_28, %c0_29] : memref<1x8xf32, #tpu.memory_space<vmem>>, vector<1x8xf32>
    %48 = vector.shape_cast %47 : vector<1x8xf32> to vector<1x1x8xf32>
    %49 = vector.broadcast %48 : vector<1x1x8xf32> to vector<14x14x8xf32>
    %50 = arith.mulf %46, %49 : vector<14x14x8xf32>
    %c0_30 = arith.constant 0 : index
    %c0_31 = arith.constant 0 : index
    %51 = vector.load %arg7[%c0_30, %c0_31] : memref<1x8xf32, #tpu.memory_space<vmem>>, vector<1x8xf32>
    %52 = vector.shape_cast %51 : vector<1x8xf32> to vector<1x1x8xf32>
    %53 = vector.broadcast %52 : vector<1x1x8xf32> to vector<14x14x8xf32>
    %54 = arith.addf %50, %53 : vector<14x14x8xf32>
    %cst_32 = arith.constant 0.000000e+00 : f32
    %55 = vector.broadcast %cst_32 : f32 to vector<14x14x8xf32>
    %56 = arith.maximumf %54, %55 : vector<14x14x8xf32>
    %cst_33 = arith.constant 0.000000e+00 : f32
    %57 = vector.broadcast %cst_33 : f32 to vector<16x16x8xf32>
    %c0_34 = arith.constant 0 : index
    %c0_35 = arith.constant 0 : index
    %c0_36 = arith.constant 0 : index
    %58 = vector.load %arg13[%c0_34, %c0_35, %c0_36] : memref<16x16x8xf32, #tpu.memory_space<vmem>>, vector<16x16x8xf32>
    tpu.vector_store %arg13[%c0_34, %c0_35, %c0_36], %57 {strides = array<i32>} : memref<16x16x8xf32, #tpu.memory_space<vmem>>, vector<16x16x8xf32>,
    %c1_37 = arith.constant 1 : index
    %c1_38 = arith.constant 1 : index
    %c0_39 = arith.constant 0 : index
    %59 = vector.load %arg13[%c1_37, %c1_38, %c0_39] : memref<16x16x8xf32, #tpu.memory_space<vmem>>, vector<14x14x8xf32>
    tpu.vector_store %arg13[%c1_37, %c1_38, %c0_39], %56 {strides = array<i32>} : memref<16x16x8xf32, #tpu.memory_space<vmem>>, vector<14x14x8xf32>,
    %c0_40 = arith.constant 0 : index
    %c0_41 = arith.constant 0 : index
    %c0_42 = arith.constant 0 : index
    %60 = vector.load %arg13[%c0_40, %c0_41, %c0_42] : memref<16x16x8xf32, #tpu.memory_space<vmem>>, vector<16x16x8xf32>
    %61 = vector.shape_cast %60 : vector<16x16x8xf32> to vector<256x8xf32>
    %c0_43 = arith.constant 0 : index
    %c0_44 = arith.constant 0 : index
    %62 = vector.load %arg8[%c0_43, %c0_44] : memref<8x4xf32, #tpu.memory_space<vmem>>, vector<8x4xf32>
    %cst_45 = arith.constant dense<0.000000e+00> : vector<256x4xf32>
    %63 = tpu.matmul %61, %62, %cst_45 {dimension_numbers = #tpu.dot_dimension_numbers<[1], [0], [0], [1], [0, 0, 1, 1], [], []>} : vector<256x8xf32>, vector<8x4xf32>, vector<256x4xf32> -> vector<256x4xf32>
    %c0_46 = arith.constant 0 : index
    %c0_47 = arith.constant 0 : index
    %64 = vector.load %arg9[%c0_46, %c0_47] : memref<1x4xf32, #tpu.memory_space<vmem>>, vector<1x4xf32>
    %65 = vector.broadcast %64 : vector<1x4xf32> to vector<256x4xf32>
    %66 = arith.mulf %63, %65 : vector<256x4xf32>
    %c0_48 = arith.constant 0 : index
    %c0_49 = arith.constant 0 : index
    %67 = vector.load %arg10[%c0_48, %c0_49] : memref<1x4xf32, #tpu.memory_space<vmem>>, vector<1x4xf32>
    %68 = vector.broadcast %67 : vector<1x4xf32> to vector<256x4xf32>
    %69 = arith.addf %66, %68 : vector<256x4xf32>
    %cst_50 = arith.constant 0.000000e+00 : f32
    %70 = vector.broadcast %cst_50 : f32 to vector<256x4xf32>
    %71 = arith.maximumf %69, %70 : vector<256x4xf32>
    %72 = vector.shape_cast %71 : vector<256x4xf32> to vector<16x16x4xf32>
    %c0_51 = arith.constant 0 : index
    %c0_52 = arith.constant 0 : index
    %c0_53 = arith.constant 0 : index
    %c0_54 = arith.constant 0 : index
    %73 = vector.load %arg11[%c0_51, %c0_52, %c0_53, %c0_54] : memref<1x16x16x4xf32, #tpu.memory_space<vmem>>, vector<1x16x16x4xf32>
    %74 = vector.shape_cast %73 : vector<1x16x16x4xf32> to vector<16x16x4xf32>
    %75 = vector.shape_cast %72 : vector<16x16x4xf32> to vector<1x16x16x4xf32>
    tpu.vector_store %arg11[%c0_51, %c0_52, %c0_53, %c0_54], %75 {strides = array<i32>} : memref<1x16x16x4xf32, #tpu.memory_space<vmem>>, vector<1x16x16x4xf32>,
    return
  }
  func.func @transform_0(%arg0: i32) -> (i32, i32, i32, i32) {
    %c0_i32 = arith.constant 0 : i32
    %c0_i32_0 = arith.constant 0 : i32
    %c0_i32_1 = arith.constant 0 : i32
    %c0_i32_2 = arith.constant 0 : i32
    return %arg0, %c0_i32, %c0_i32_0, %c0_i32_1 : i32, i32, i32, i32
  }
  func.func @transform_1(%arg0: i32) -> (i32, i32) {
    %c0_i32 = arith.constant 0 : i32
    %c0_i32_0 = arith.constant 0 : i32
    %c0_i32_1 = arith.constant 0 : i32
    return %c0_i32, %c0_i32_0 : i32, i32
  }
  func.func @transform_2(%arg0: i32) -> (i32, i32) {
    %c0_i32 = arith.constant 0 : i32
    %c0_i32_0 = arith.constant 0 : i32
    %c0_i32_1 = arith.constant 0 : i32
    return %c0_i32, %c0_i32_0 : i32, i32
  }
  func.func @transform_3(%arg0: i32) -> (i32, i32) {
    %c0_i32 = arith.constant 0 : i32
    %c0_i32_0 = arith.constant 0 : i32
    %c0_i32_1 = arith.constant 0 : i32
    return %c0_i32, %c0_i32_0 : i32, i32
  }
  func.func @transform_4(%arg0: i32) -> (i32, i32) {
    %c0_i32 = arith.constant 0 : i32
    %c0_i32_0 = arith.constant 0 : i32
    %c0_i32_1 = arith.constant 0 : i32
    return %c0_i32, %c0_i32_0 : i32, i32
  }
  func.func @transform_5(%arg0: i32) -> (i32, i32) {
    %c0_i32 = arith.constant 0 : i32
    %c0_i32_0 = arith.constant 0 : i32
    %c0_i32_1 = arith.constant 0 : i32
    return %c0_i32, %c0_i32_0 : i32, i32
  }
  func.func @transform_6(%arg0: i32) -> (i32, i32) {
    %c0_i32 = arith.constant 0 : i32
    %c0_i32_0 = arith.constant 0 : i32
    %c0_i32_1 = arith.constant 0 : i32
    return %c0_i32, %c0_i32_0 : i32, i32
  }
  func.func @transform_7(%arg0: i32) -> (i32, i32) {
    %c0_i32 = arith.constant 0 : i32
    %c0_i32_0 = arith.constant 0 : i32
    %c0_i32_1 = arith.constant 0 : i32
    return %c0_i32, %c0_i32_0 : i32, i32
  }
  func.func @transform_8(%arg0: i32) -> (i32, i32) {
    %c0_i32 = arith.constant 0 : i32
    %c0_i32_0 = arith.constant 0 : i32
    %c0_i32_1 = arith.constant 0 : i32
    return %c0_i32, %c0_i32_0 : i32, i32
  }
  func.func @transform_9(%arg0: i32) -> (i32, i32) {
    %c0_i32 = arith.constant 0 : i32
    %c0_i32_0 = arith.constant 0 : i32
    %c0_i32_1 = arith.constant 0 : i32
    return %c0_i32, %c0_i32_0 : i32, i32
  }
  func.func @transform_10(%arg0: i32) -> (i32, i32, i32, i32) {
    %c0_i32 = arith.constant 0 : i32
    %c0_i32_0 = arith.constant 0 : i32
    %c0_i32_1 = arith.constant 0 : i32
    %c0_i32_2 = arith.constant 0 : i32
    return %arg0, %c0_i32, %c0_i32_0, %c0_i32_1 : i32, i32, i32, i32
  }
}

</mosaic_0001>

<bundles_post_ra>
// kernel: fgfs1_forward.1
= control target key start
LH: loop header
LB: loop body
LE: loop exit
PB: predicated region body
PF: predicated region fallthrough
CT: control target
= control target key end

     0   :  { %s4052_s13 = smov 0   ;;  %s6110_s0 = inlined_call_operand.vmem [shape: f32[2,16,16,4], index: 0, kind: input, shape index: {}]   ;;  %s6111_s1 = inlined_call_operand.vmem [shape: f32[4,4], index: 1, kind: input, shape index: {}]   ;;  %s6112_s2 = inlined_call_operand.vmem [shape: f32[1,4], index: 2, kind: input, shape index: {}]   ;;  %s6113_s3 = inlined_call_operand.vmem [shape: f32[1,4], index: 3, kind: input, shape index: {}]   ;;  %s6114_s4 = inlined_call_operand.vmem [shape: f32[4,72], index: 4, kind: input, shape index: {}]   ;;  %s6115_s5 = inlined_call_operand.vmem [shape: f32[1,8], index: 5, kind: input, shape index: {}]   ;;  %s6116_s6 = inlined_call_operand.vmem [shape: f32[1,8], index: 6, kind: input, shape index: {}]   ;;  %s6117_s7 = inlined_call_operand.vmem [shape: f32[8,4], index: 7, kind: input, shape index: {}]   ;;  %s6118_s8 = inlined_call_operand.vmem [shape: f32[1,4], index: 8, kind: input, shape index: {}]   ;;  %s6119_s9 = inlined_call_operand.vmem [shape: f32[1,4], index: 9, kind: input, shape index: {}]   ;;  %s6120_s10 = inlined_call_operand.vmem [shape: f32[2,16,16,4], index: 10, kind: output, shape index: {}]  }
   0x1 LB: > { %s3493_s14 = sadd.s32 4294967295, %s3986_s13   ;;  %p3497_p0 = scmp.ge.s32.totalorder %s3986_s13, 1  ;;  %s3986_s13 = sphi %s4052_s13, %s20_s13  }
   0x2   : > { %p312_p1 = scmp.lt.s32.totalorder %s3986_s13, 3 }
   0x4   : > { %p313_p2 = pnand %p3497_p0, %p312_p1 }
   0x6   : > { %316 = sbr.rel (%p313_p2) target bundleno = 1256 (0x4e8), region = 60 }
   0xd   : > { %v4063_v0 = vld [vmem:[%s6111_s1] sm:$0xf]  ;;  %vm490_vm0 = vcmask 1043456   ;;  %p4067_p3 = scmp.lt.s32.totalorder %s3493_s14, 1  ;;  %vm393_vm1 = vcmask 31744   ;;  %v892_v1 = vlaneseq  ;;  %v6121_v3 = vmov 0.0  }
   0xe   : > { %3765 = vmatprep.subr.msk.mxu0 %vm490_vm0, %v4063_v0  ;;  %3957 = vmatprep.subr.msk.mxu1 %vm490_vm0, %v4063_v0  ;;  %v4078_v2 = vld [vmem:[%s6114_s4] sm:$0xf]  ;;  %829 = vst.msk [vmem:[#allocation2] sm:$0xff] %vm393_vm1, %v6121_v3  ;;  %830 = vst.msk [vmem:[#allocation2 + $0x8] sm:$0xff] %vm393_vm1, %v6121_v3  ;;  %vm900_vm2 = vcmask 25600   ;;  %vm1665_vm3 = vcmask 1044480  }
   0xf   : > { %831 = vst.msk [vmem:[#allocation2 + $0x10] sm:$0xff] %vm393_vm1, %v6121_v3  ;;  %832 = vst.msk [vmem:[#allocation2 + $0x18] sm:$0xff] %vm393_vm1, %v6121_v3  ;;  %v889_v4 = vld [vmem:[%s6113_s3] sm:$0x1]  ;;  %3766 = vmatpush3.msk.msra.mxu0 %vm490_vm0, %v4063_v0  ;;  %s6349_s14 = smov (!%p4067_p3, %s3493_s14), 1  ;;  %3958 = vmatpush3.msk.msra.mxu1 %vm490_vm0, %v4063_v0  ;;  %v893_v6 = vshrl.u32 %v892_v1, 7 }
  0x10   : > { %833 = vst.msk [vmem:[#allocation2 + $0x20] sm:$0xff] %vm393_vm1, %v6121_v3  ;;  %834 = vst.msk [vmem:[#allocation2 + $0x28] sm:$0xff] %vm393_vm1, %v6121_v3  ;;  %v890_v5 = vmax.f32 %v889_v4, 0.0  ;;  %3815 = vmatprep.subr.msk.mxu1 %vm490_vm0, %v4078_v2  ;;  %s3636_s22 = sshll.u32 %s6349_s14, 8  ;;  %v4353_v47 = vld [vmem:[%s6112_s2] ss:$0 sm:$0xff] }
  0x11   : > { %835 = vst.msk [vmem:[#allocation2 + $0x30] sm:$0xff] %vm393_vm1, %v6121_v3  ;;  %836 = vst.msk [vmem:[#allocation2 + $0x38] sm:$0xff] %vm393_vm1, %v6121_v3  ;;  %v894_v7 = vsub.s32 0, %v893_v6  ;;  %s4222_s25 = scalar_lea.vmem %s6110_s0, %s3636_s22  ;;  %v4358_v49 = vld [vmem:[%s6113_s3] ss:$0 sm:$0xff]  ;;  %vm1848_vm4 = vcmask 1041408   ;;  %s5576_s23 = scalar_lea.vmem %s6120_s10, %s3636_s22 }
  0x12   : > { %837 = vst.msk [vmem:[#allocation2 + $0x40] sm:$0xff] %vm393_vm1, %v6121_v3  ;;  %838 = vst.msk [vmem:[#allocation2 + $0x48] sm:$0xff] %vm393_vm1, %v6121_v3  ;;  %v360_v8 = vld [vmem:[%s4222_s25] sm:$0xff]  ;;  %v361_v9 = vld [vmem:[%s4222_s25 + $0x8] sm:$0xff]  ;;  %s3989_s30 = smov 120   ;;  %s3990_s11 = smov 112  }
  0x13   : > { %839 = vst.msk [vmem:[#allocation2 + $0x50] sm:$0xff] %vm393_vm1, %v6121_v3  ;;  %840 = vst.msk [vmem:[#allocation2 + $0x58] sm:$0xff] %vm393_vm1, %v6121_v3  ;;  %v362_v10 = vld [vmem:[%s4222_s25 + $0x10] sm:$0xff]  ;;  %v895_v11 = vrot.slane %v890_v5, %v894_v7  ;;  %3767 = vmatprep.mubr.msk.f32.mxu0 %vm393_vm1, %v360_v8  ;;  %v363_v12 = vld [vmem:[%s4222_s25 + $0x18] sm:$0xff]  ;;  %s3991_s12 = smov 104   ;;  %s3992_s15 = smov 96  }
  0x14   : > { %841 = vst.msk [vmem:[#allocation2 + $0x60] sm:$0xff] %vm393_vm1, %v6121_v3  ;;  %842 = vst.msk [vmem:[#allocation2 + $0x68] sm:$0xff] %vm393_vm1, %v6121_v3  ;;  %3768 = vmatmul.mubr.msk.f32.vlgmr.msra.gmra.mrb[0].mxu0 %vm393_vm1, %v361_v9  ;;  %v364_v13 = vld [vmem:[%s4222_s25 + $0x20] sm:$0xff]  ;;  %v390_v14 = vld [vmem:[%s4222_s25 + $0xf0] sm:$0xff]  ;;  %s3993_s16 = smov 88   ;;  %s3994_s17 = smov 80  }
  0x15   : > { %843 = vst.msk [vmem:[#allocation2 + $0x70] sm:$0xff] %vm393_vm1, %v6121_v3  ;;  %844 = vst.msk [vmem:[#allocation2 + $0x78] sm:$0xff] %vm393_vm1, %v6121_v3  ;;  %3770 = vmatprep.mubr.msk.f32.mxu0 %vm393_vm1, %v362_v10  ;;  %v391_v15 = vld [vmem:[%s4222_s25 + $0xf8] sm:$0xff]  ;;  %3812 = vmatprep.mubr.msk.f32.mxu1 %vm393_vm1, %v390_v14  ;;  %v986_v16 = vld [vmem:[#allocation2] sm:$0xff]  ;;  %vm2879_vm5 = vcmask 64512   ;;  %s3995_s18 = smov 72  }
  0x16   : > { %845 = vst.msk [vmem:[#allocation2 + $0x80] sm:$0xff] %vm393_vm1, %v6121_v3  ;;  %846 = vst.msk [vmem:[#allocation2 + $0x88] sm:$0xff] %vm393_vm1, %v6121_v3  ;;  %3813 = vmatmul.mubr.msk.f32.vlgmr.msra.gmra.mrb[0].mxu1 %vm393_vm1, %v391_v15  ;;  %v365_v17 = vld [vmem:[%s4222_s25 + $0x28] sm:$0xff]  ;;  %v366_v19 = vld [vmem:[%s4222_s25 + $0x30] sm:$0xff]  ;;  %s3996_s21 = smov 64   ;;  %vm2914_vm6 = vcmask 62464  }
  0x17   : > { %847 = vst.msk [vmem:[#allocation2 + $0x90] sm:$0xff] %vm393_vm1, %v6121_v3  ;;  %848 = vst.msk [vmem:[#allocation2 + $0x98] sm:$0xff] %vm393_vm1, %v6121_v3  ;;  %3816 = vmatpush3.msk.msra.mxu1 %vm490_vm0, %v4078_v2  ;;  %v987_v18 = vld [vmem:[#allocation2 + $0x8] sm:$0xff]  ;;  %3817 = vmatprep.mubr.msk.f32.mxu1 %vm393_vm1, %v986_v16  ;;  %v988_v20 = vld [vmem:[#allocation2 + $0x10] sm:$0xff] }
  0x18   : > { %849 = vst.msk [vmem:[#allocation2 + $0xa0] sm:$0xff] %vm393_vm1, %v6121_v3  ;;  %850 = vst.msk [vmem:[#allocation2 + $0xa8] sm:$0xff] %vm393_vm1, %v6121_v3  ;;  %3771 = vmatmul.mubr.msk.f32.gmra.mrb[2].mxu0 %vm393_vm1, %v363_v12  ;;  %v367_v21 = vld [vmem:[%s4222_s25 + $0x38] sm:$0xff]  ;;  %v368_v23 = vld [vmem:[%s4222_s25 + $0x40] sm:$0xff] }
  0x19   : > { %851 = vst.msk [vmem:[#allocation2 + $0xb0] sm:$0xff] %vm393_vm1, %v6121_v3  ;;  %852 = vst.msk [vmem:[#allocation2 + $0xb8] sm:$0xff] %vm393_vm1, %v6121_v3  ;;  %3773 = vmatprep.mubr.msk.f32.mxu0 %vm393_vm1, %v364_v13  ;;  %v369_v25 = vld [vmem:[%s4222_s25 + $0x48] sm:$0xff]  ;;  %v370_v27 = vld [vmem:[%s4222_s25 + $0x50] sm:$0xff] }
  0x1a   : > { %853 = vst.msk [vmem:[#allocation2 + $0xc0] sm:$0xff] %vm393_vm1, %v6121_v3  ;;  %854 = vst.msk [vmem:[#allocation2 + $0xc8] sm:$0xff] %vm393_vm1, %v6121_v3  ;;  %3818 = vmatmul.mubr.msk.f32.vlgmr.msra.gmra.mrb[2].mxu1 %vm393_vm1, %v987_v18  ;;  %v371_v28 = vld [vmem:[%s4222_s25 + $0x58] sm:$0xff]  ;;  %v372_v29 = vld [vmem:[%s4222_s25 + $0x60] sm:$0xff] }
  0x1b   : > { %855 = vst.msk [vmem:[#allocation2 + $0xd0] sm:$0xff] %vm393_vm1, %v6121_v3  ;;  %856 = vst.msk [vmem:[#allocation2 + $0xd8] sm:$0xff] %vm393_vm1, %v6121_v3  ;;  %3820 = vmatprep.mubr.msk.f32.mxu1 %vm393_vm1, %v988_v20  ;;  %v373_v30 = vld [vmem:[%s4222_s25 + $0x68] sm:$0xff]  ;;  %v374_v31 = vld [vmem:[%s4222_s25 + $0x70] sm:$0xff] }
  0x1c   : > { %857 = vst.msk [vmem:[#allocation2 + $0xe0] sm:$0xff] %vm393_vm1, %v6121_v3  ;;  %858 = vst.msk [vmem:[#allocation2 + $0xe8] sm:$0xff] %vm393_vm1, %v6121_v3  ;;  %3774 = vmatmul.mubr.msk.f32.gmra.mrb[4].mxu0 %vm393_vm1, %v365_v17  ;;  %v375_v32 = vld [vmem:[%s4222_s25 + $0x78] sm:$0xff]  ;;  %v376_v33 = vld [vmem:[%s4222_s25 + $0x80] sm:$0xff] }
  0x1d   : > { %859 = vst.msk [vmem:[#allocation2 + $0xf0] sm:$0xff] %vm393_vm1, %v6121_v3  ;;  %860 = vst.msk [vmem:[#allocation2 + $0xf8] sm:$0xff] %vm393_vm1, %v6121_v3  ;;  %3776 = vmatprep.mubr.msk.f32.mxu0 %vm393_vm1, %v366_v19  ;;  %v377_v34 = vld [vmem:[%s4222_s25 + $0x88] sm:$0xff]  ;;  %v378_v35 = vld [vmem:[%s4222_s25 + $0x90] sm:$0xff] }
  0x1e   : > { %861 = vst.msk [vmem:[#allocation2 + $0x100] sm:$0xff] %vm393_vm1, %v6121_v3  ;;  %862 = vst.msk [vmem:[#allocation2 + $0x108] sm:$0xff] %vm393_vm1, %v6121_v3  ;;  %v379_v36 = vld [vmem:[%s4222_s25 + $0x98] sm:$0xff]  ;;  %v380_v37 = vld [vmem:[%s4222_s25 + $0xa0] sm:$0xff] }
  0x1f   : > { %863 = vst.msk [vmem:[#allocation2 + $0x110] sm:$0xff] %vm393_vm1, %v6121_v3  ;;  %864 = vst.msk [vmem:[#allocation2 + $0x118] sm:$0xff] %vm393_vm1, %v6121_v3  ;;  %v381_v38 = vld [vmem:[%s4222_s25 + $0xa8] sm:$0xff]  ;;  %v382_v39 = vld [vmem:[%s4222_s25 + $0xb0] sm:$0xff] }
  0x20   : > { %865 = vst.msk [vmem:[#allocation2 + $0x120] sm:$0xff] %vm393_vm1, %v6121_v3  ;;  %866 = vst.msk [vmem:[#allocation2 + $0x128] sm:$0xff] %vm393_vm1, %v6121_v3  ;;  %3777 = vmatmul.mubr.msk.f32.gmra.mrb[6].mxu0 %vm393_vm1, %v367_v21  ;;  %v383_v40 = vld [vmem:[%s4222_s25 + $0xb8] sm:$0xff]  ;;  %v384_v41 = vld [vmem:[%s4222_s25 + $0xc0] sm:$0xff] }
  0x21   : > { %867 = vst.msk [vmem:[#allocation2 + $0x130] sm:$0xff] %vm393_vm1, %v6121_v3  ;;  %868 = vst.msk [vmem:[#allocation2 + $0x138] sm:$0xff] %vm393_vm1, %v6121_v3  ;;  %3779 = vmatprep.mubr.msk.f32.mxu0 %vm393_vm1, %v368_v23  ;;  %v385_v42 = vld [vmem:[%s4222_s25 + $0xc8] sm:$0xff]  ;;  %v386_v43 = vld [vmem:[%s4222_s25 + $0xd0] sm:$0xff] }
  0x22   : > { %869 = vst.msk [vmem:[#allocation2 + $0x140] sm:$0xff] %vm393_vm1, %v6121_v3  ;;  %870 = vst.msk [vmem:[#allocation2 + $0x148] sm:$0xff] %vm393_vm1, %v6121_v3  ;;  %v387_v44 = vld [vmem:[%s4222_s25 + $0xd8] sm:$0xff]  ;;  %v388_v45 = vld [vmem:[%s4222_s25 + $0xe0] sm:$0xff] }
  0x23   : > { %871 = vst.msk [vmem:[#allocation2 + $0x150] sm:$0xff] %vm393_vm1, %v6121_v3  ;;  %872 = vst.msk [vmem:[#allocation2 + $0x158] sm:$0xff] %vm393_vm1, %v6121_v3  ;;  %v389_v46 = vld [vmem:[%s4222_s25 + $0xe8] sm:$0xff] }
  0x24   : > { %873 = vst.msk [vmem:[#allocation2 + $0x160] sm:$0xff] %vm393_vm1, %v6121_v3  ;;  %874 = vst.msk [vmem:[#allocation2 + $0x168] sm:$0xff] %vm393_vm1, %v6121_v3  ;;  %3780 = vmatmul.mubr.msk.f32.gmra.mrb[8].mxu0 %vm393_vm1, %v369_v25 }
  0x25   : > { %875 = vst.msk [vmem:[#allocation2 + $0x170] sm:$0xff] %vm393_vm1, %v6121_v3  ;;  %876 = vst.msk [vmem:[#allocation2 + $0x178] sm:$0xff] %vm393_vm1, %v6121_v3  ;;  %3782 = vmatprep.mubr.msk.f32.mxu0 %vm393_vm1, %v370_v27 }
  0x26   : > { %877 = vst.msk [vmem:[#allocation2 + $0x180] sm:$0xff] %vm393_vm1, %v6121_v3  ;;  %878 = vst.msk [vmem:[#allocation2 + $0x188] sm:$0xff] %vm393_vm1, %v6121_v3 }
  0x27   : > { %879 = vst.msk [vmem:[#allocation2 + $0x190] sm:$0xff] %vm393_vm1, %v6121_v3  ;;  %880 = vst.msk [vmem:[#allocation2 + $0x198] sm:$0xff] %vm393_vm1, %v6121_v3 }
  0x28   : > { %881 = vst.msk [vmem:[#allocation2 + $0x1a0] sm:$0xff] %vm393_vm1, %v6121_v3  ;;  %882 = vst.msk [vmem:[#allocation2 + $0x1a8] sm:$0xff] %vm393_vm1, %v6121_v3  ;;  %3783 = vmatmul.mubr.msk.f32.gmra.mrb[10].mxu0 %vm393_vm1, %v371_v28 }
  0x29   : > { %883 = vst.msk [vmem:[#allocation2 + $0x1b0] sm:$0xff] %vm393_vm1, %v6121_v3  ;;  %884 = vst.msk [vmem:[#allocation2 + $0x1b8] sm:$0xff] %vm393_vm1, %v6121_v3  ;;  %3785 = vmatprep.mubr.msk.f32.mxu0 %vm393_vm1, %v372_v29 }
  0x2a   : > { %885 = vst.msk [vmem:[#allocation2 + $0x1c0] sm:$0xff] %vm393_vm1, %v6121_v3  ;;  %886 = vst.msk [vmem:[#allocation2 + $0x1c8] sm:$0xff] %vm393_vm1, %v6121_v3 }
  0x2b   : > { %887 = vst.msk [vmem:[#allocation2 + $0x1d0] sm:$0xff] %vm393_vm1, %v6121_v3  ;;  %888 = vst.msk [vmem:[#allocation2 + $0x1d8] sm:$0xff] %vm393_vm1, %v6121_v3 }
  0x2c   : > { %898 = vst.msk [vmem:[#allocation2 + $0x19] sm:$0xff] %vm393_vm1, %v895_v11  ;;  %899 = vst.msk [vmem:[#allocation2 + $0x21] sm:$0xff] %vm393_vm1, %v895_v11  ;;  %3786 = vmatmul.mubr.msk.f32.gmra.mrb[12].mxu0 %vm393_vm1, %v373_v30 }
  0x2d   : > { %902 = vst.msk [vmem:[#allocation2 + $0x31] sm:$0xff] %vm393_vm1, %v895_v11  ;;  %903 = vst.msk [vmem:[#allocation2 + $0x39] sm:$0xff] %vm393_vm1, %v895_v11  ;;  %3788 = vmatprep.mubr.msk.f32.mxu0 %vm393_vm1, %v374_v31 }
  0x2e   : > { %905 = vst.msk [vmem:[#allocation2 + $0x49] sm:$0xff] %vm393_vm1, %v895_v11  ;;  %906 = vst.msk [vmem:[#allocation2 + $0x51] sm:$0xff] %vm393_vm1, %v895_v11 }
  0x2f   : > { %908 = vst.msk [vmem:[#allocation2 + $0x61] sm:$0xff] %vm393_vm1, %v895_v11  ;;  %909 = vst.msk [vmem:[#allocation2 + $0x69] sm:$0xff] %vm393_vm1, %v895_v11 }
  0x30   : > { %911 = vst.msk [vmem:[#allocation2 + $0x79] sm:$0xff] %vm393_vm1, %v895_v11  ;;  %912 = vst.msk [vmem:[#allocation2 + $0x81] sm:$0xff] %vm393_vm1, %v895_v11  ;;  %3789 = vmatmul.mubr.msk.f32.gmra.mrb[14].mxu0 %vm393_vm1, %v375_v32 }
  0x31   : > { %914 = vst.msk [vmem:[#allocation2 + $0x91] sm:$0xff] %vm393_vm1, %v895_v11  ;;  %915 = vst.msk [vmem:[#allocation2 + $0x99] sm:$0xff] %vm393_vm1, %v895_v11  ;;  %3791 = vmatprep.mubr.msk.f32.mxu0 %vm393_vm1, %v376_v33 }
  0x32   : > { %917 = vst.msk [vmem:[#allocation2 + $0xa9] sm:$0xff] %vm393_vm1, %v895_v11  ;;  %918 = vst.msk [vmem:[#allocation2 + $0xb1] sm:$0xff] %vm393_vm1, %v895_v11  ;;  %v1045_v3 = vld [vmem:[#allocation2 + $0x1d8] sm:$0xff] }
  0x33   : > { %920 = vst.msk [vmem:[#allocation2 + $0xc1] sm:$0xff] %vm393_vm1, %v895_v11  ;;  %921 = vst.msk [vmem:[#allocation2 + $0xc9] sm:$0xff] %vm393_vm1, %v895_v11  ;;  %v989_v22 = vld [vmem:[#allocation2 + $0x18] sm:$0xff]  ;;  %v990_v24 = vld [vmem:[#allocation2 + $0x20] sm:$0xff] }
  0x34   : > { %923 = vst.msk [vmem:[#allocation2 + $0xd9] sm:$0xff] %vm393_vm1, %v895_v11  ;;  %924 = vst.msk [vmem:[#allocation2 + $0xe1] sm:$0xff] %vm393_vm1, %v895_v11  ;;  %3821 = vmatmul.mubr.msk.f32.gmra.mrb[4].mxu1 %vm393_vm1, %v989_v22  ;;  %3792 = vmatmul.mubr.msk.f32.gmra.mrb[16].mxu0 %vm393_vm1, %v377_v34 }
  0x35   : > { %926 = vst.msk [vmem:[#allocation2 + $0xf1] sm:$0xff] %vm393_vm1, %v895_v11  ;;  %927 = vst.msk [vmem:[#allocation2 + $0xf9] sm:$0xff] %vm393_vm1, %v895_v11  ;;  %3823 = vmatprep.mubr.msk.f32.mxu1 %vm393_vm1, %v990_v24  ;;  %3794 = vmatprep.mubr.msk.f32.mxu0 %vm393_vm1, %v378_v35 }
  0x36   : > { %929 = vst.msk [vmem:[#allocation2 + $0x109] sm:$0xff] %vm393_vm1, %v895_v11  ;;  %930 = vst.msk [vmem:[#allocation2 + $0x111] sm:$0xff] %vm393_vm1, %v895_v11 }
  0x37   : > { %932 = vst.msk [vmem:[#allocation2 + $0x121] sm:$0xff] %vm393_vm1, %v895_v11  ;;  %933 = vst.msk [vmem:[#allocation2 + $0x129] sm:$0xff] %vm393_vm1, %v895_v11 }
  0x38   : > { %935 = vst.msk [vmem:[#allocation2 + $0x139] sm:$0xff] %vm393_vm1, %v895_v11  ;;  %936 = vst.msk [vmem:[#allocation2 + $0x141] sm:$0xff] %vm393_vm1, %v895_v11  ;;  %3795 = vmatmul.mubr.msk.f32.gmra.mrb[18].mxu0 %vm393_vm1, %v379_v36 }
  0x39   : > { %938 = vst.msk [vmem:[#allocation2 + $0x151] sm:$0xff] %vm393_vm1, %v895_v11  ;;  %939 = vst.msk [vmem:[#allocation2 + $0x159] sm:$0xff] %vm393_vm1, %v895_v11  ;;  %3797 = vmatprep.mubr.msk.f32.mxu0 %vm393_vm1, %v380_v37 }
  0x3a   : > { %941 = vst.msk [vmem:[#allocation2 + $0x169] sm:$0xff] %vm393_vm1, %v895_v11  ;;  %942 = vst.msk [vmem:[#allocation2 + $0x171] sm:$0xff] %vm393_vm1, %v895_v11 }
  0x3b   : > { %944 = vst.msk [vmem:[#allocation2 + $0x181] sm:$0xff] %vm393_vm1, %v895_v11  ;;  %945 = vst.msk [vmem:[#allocation2 + $0x189] sm:$0xff] %vm393_vm1, %v895_v11 }
  0x3c   : > { %947 = vst.msk [vmem:[#allocation2 + $0x199] sm:$0xff] %vm393_vm1, %v895_v11  ;;  %948 = vst.msk [vmem:[#allocation2 + $0x1a1] sm:$0xff] %vm393_vm1, %v895_v11  ;;  %3798 = vmatmul.mubr.msk.f32.gmra.mrb[20].mxu0 %vm393_vm1, %v381_v38 }
  0x3d   : > { %950 = vst.msk [vmem:[#allocation2 + $0x1b1] sm:$0xff] %vm393_vm1, %v895_v11  ;;  %951 = vst.msk [vmem:[#allocation2 + $0x1b9] sm:$0xff] %vm393_vm1, %v895_v11  ;;  %3800 = vmatprep.mubr.msk.f32.mxu0 %vm393_vm1, %v382_v39 }
  0x3e   : > { %901 = vst.msk [vmem:[#allocation2 + $0x29] sm:$0x3] %vm900_vm2, %v895_v11  ;;  %904 = vst.msk [vmem:[#allocation2 + $0x41] sm:$0x3] %vm900_vm2, %v895_v11 }
  0x3f   : > { %907 = vst.msk [vmem:[#allocation2 + $0x59] sm:$0x3] %vm900_vm2, %v895_v11  ;;  %910 = vst.msk [vmem:[#allocation2 + $0x71] sm:$0x3] %vm900_vm2, %v895_v11 }
  0x40   : > { %913 = vst.msk [vmem:[#allocation2 + $0x89] sm:$0x3] %vm900_vm2, %v895_v11  ;;  %916 = vst.msk [vmem:[#allocation2 + $0xa1] sm:$0x3] %vm900_vm2, %v895_v11  ;;  %3801 = vmatmul.mubr.msk.f32.gmra.mrb[22].mxu0 %vm393_vm1, %v383_v40 }
  0x41   : > { %919 = vst.msk [vmem:[#allocation2 + $0xb9] sm:$0x3] %vm900_vm2, %v895_v11  ;;  %922 = vst.msk [vmem:[#allocation2 + $0xd1] sm:$0x3] %vm900_vm2, %v895_v11  ;;  %3803 = vmatprep.mubr.msk.f32.mxu0 %vm393_vm1, %v384_v41 }
  0x42   : > { %925 = vst.msk [vmem:[#allocation2 + $0xe9] sm:$0x3] %vm900_vm2, %v895_v11  ;;  %928 = vst.msk [vmem:[#allocation2 + $0x101] sm:$0x3] %vm900_vm2, %v895_v11 }
  0x43   : > { %931 = vst.msk [vmem:[#allocation2 + $0x119] sm:$0x3] %vm900_vm2, %v895_v11  ;;  %934 = vst.msk [vmem:[#allocation2 + $0x131] sm:$0x3] %vm900_vm2, %v895_v11 }
  0x44   : > { %937 = vst.msk [vmem:[#allocation2 + $0x149] sm:$0x3] %vm900_vm2, %v895_v11  ;;  %940 = vst.msk [vmem:[#allocation2 + $0x161] sm:$0x3] %vm900_vm2, %v895_v11  ;;  %3804 = vmatmul.mubr.msk.f32.gmra.mrb[24].mxu0 %vm393_vm1, %v385_v42 }
  0x45   : > { %943 = vst.msk [vmem:[#allocation2 + $0x179] sm:$0x3] %vm900_vm2, %v895_v11  ;;  %946 = vst.msk [vmem:[#allocation2 + $0x191] sm:$0x3] %vm900_vm2, %v895_v11  ;;  %v991_v26 = vld [vmem:[#allocation2 + $0x28] sm:$0xff]  ;;  %3806 = vmatprep.mubr.msk.f32.mxu0 %vm393_vm1, %v386_v43 }
  0x46   : > { %949 = vst.msk [vmem:[#allocation2 + $0x1a9] sm:$0x3] %vm900_vm2, %v895_v11  ;;  %952 = vst.msk [vmem:[#allocation2 + $0x1c1] sm:$0x3] %vm900_vm2, %v895_v11  ;;  %3824 = vmatmul.mubr.msk.f32.gmra.mrb[6].mxu1 %vm393_vm1, %v991_v26 }
  0x48   : > { %3807 = vmatmul.mubr.msk.f32.gmra.mrb[26].mxu0 %vm393_vm1, %v387_v44 }
  0x49   : > { %3809 = vmatprep.mubr.msk.f32.mxu0 %vm393_vm1, %v388_v45 }
  0x4c   : > { %3810 = vmatmul.mubr.msk.f32.gmra.mrb[28].mxu0 %vm393_vm1, %v389_v46 }
  0xe7   : > { %v3769_v48 = vpop.f32.mrb[0].mxu0 }
  0xe8   : > { %v727_v50 = vmul.f32 %v3769_v48, %v4353_v47  ;;  %v560_v51 = vpop.f32.mrb[1].mxu0 }
  0xe9   : > { %v726_v52 = vmul.f32 %v4353_v47, %v560_v51  ;;  %v3814_v56 = vpop.f32.mrb[0].mxu1 }
  0xea   : > { %v766_v53 = vadd.f32 %v4358_v49, %v727_v50  ;;  %v757_v60 = vmul.f32 %v3814_v56, %v4353_v47  ;;  %v710_v61 = vpop.f32.mrb[1].mxu1 }
  0xeb   : > { %v765_v54 = vadd.f32 %v4358_v49, %v726_v52  ;;  %v3772_v55 = vpop.f32.mrb[2].mxu0  ;;  %v756_v0 = vmul.f32 %v4353_v47, %v710_v61 }
  0xec   : > { %v798_v57 = vmax.f32 %v766_v53, 0.0  ;;  %v729_v58 = vmul.f32 %v3772_v55, %v4353_v47  ;;  %v570_v59 = vpop.f32.mrb[3].mxu0  ;;  %v796_v2 = vadd.f32 %v4358_v49, %v757_v60 }
  0xed   : > { %v797_v62 = vmax.f32 %v765_v54, 0.0  ;;  %v728_v63 = vmul.f32 %v4353_v47, %v570_v59  ;;  %v795_v6 = vadd.f32 %v4358_v49, %v756_v0  ;;  %v4374_v7 = vpop.f32.mrb[2].mxu1 }
  0xee   : > { %955 = vst.msk [vmem:[#allocation2 + $0x3a] sm:$0xff] %vm393_vm1, %v798_v57  ;;  %v768_v1 = vadd.f32 %v4358_v49, %v729_v58  ;;  %v828_v11 = vmax.f32 %v796_v2, 0.0  ;;  %v1667_v12 = vrot.slane %v4374_v7, 3  ;;  %v4378_v13 = vpop.f32.mrb[3].mxu1  ;;  %v1850_v18 = vrot.slane %v4374_v7, 6 }
  0xef   : > { %954 = vst.msk [vmem:[#allocation2 + $0x32] sm:$0xff] %vm393_vm1, %v797_v62  ;;  %v767_v4 = vadd.f32 %v4358_v49, %v728_v63  ;;  %v3775_v5 = vpop.f32.mrb[4].mxu0  ;;  %v827_v16 = vmax.f32 %v795_v6, 0.0  ;;  %v1666_v19 = vrot.slane %v4378_v13, 3  ;;  %v1849_v20 = vrot.slane %v4378_v13, 6 }
  0xf0   : > { %v800_v8 = vmax.f32 %v768_v1, 0.0  ;;  %v731_v9 = vmul.f32 %v3775_v5, %v4353_v47  ;;  %v580_v10 = vpop.f32.mrb[5].mxu0  ;;  %985 = vst.msk [vmem:[#allocation2 + $0x1a2] sm:$0xff] %vm393_vm1, %v828_v11 }
  0xf1   : > { %v799_v14 = vmax.f32 %v767_v4, 0.0  ;;  %v730_v15 = vmul.f32 %v4353_v47, %v580_v10  ;;  %984 = vst.msk [vmem:[#allocation2 + $0x19a] sm:$0xff] %vm393_vm1, %v827_v16  ;;  %v1668_v27 = vsel %vm1665_vm3, %v1666_v19, %v1667_v12  ;;  %v1851_v36 = vsel %vm1848_vm4, %v1849_v20, %v1850_v18 }
  0xf2   : > { %957 = vst.msk [vmem:[#allocation2 + $0x52] sm:$0xff] %vm393_vm1, %v800_v8  ;;  %v770_v17 = vadd.f32 %v4358_v49, %v731_v9  ;;  %1736 = vrot.lane.b32.xlu0 %v1668_v27, %s3989_s30 }
  0xf3   : > { %956 = vst.msk [vmem:[#allocation2 + $0x4a] sm:$0xff] %vm393_vm1, %v799_v14  ;;  %v769_v21 = vadd.f32 %v4358_v49, %v730_v15  ;;  %v3778_v22 = vpop.f32.mrb[6].mxu0 }
  0xf4   : > { %v802_v24 = vmax.f32 %v770_v17, 0.0  ;;  %v733_v25 = vmul.f32 %v3778_v22, %v4353_v47  ;;  %v590_v26 = vpop.f32.mrb[7].mxu0 }
  0xf5   : > { %v801_v29 = vmax.f32 %v769_v21, 0.0  ;;  %v732_v30 = vmul.f32 %v4353_v47, %v590_v26  ;;  %v994_v43 = vld [vmem:[#allocation2 + $0x40] sm:$0xff] }
  0xf6   : > { %v992_v32 = vld [vmem:[#allocation2 + $0x30] sm:$0xff]  ;;  %v993_v33 = vld [vmem:[#allocation2 + $0x38] sm:$0xff]  ;;  %959 = vst.msk [vmem:[#allocation2 + $0x6a] sm:$0xff] %vm393_vm1, %v802_v24  ;;  %v772_v34 = vadd.f32 %v4358_v49, %v733_v25  ;;  %1919 = vrot.lane.b32.xlu0 %v1851_v36, %s3990_s11 }
  0xf7   : > { %3826 = vmatprep.mubr.msk.f32.mxu1 %vm393_vm1, %v992_v32  ;;  %958 = vst.msk [vmem:[#allocation2 + $0x62] sm:$0xff] %vm393_vm1, %v801_v29  ;;  %v771_v37 = vadd.f32 %v4358_v49, %v732_v30  ;;  %v3781_v38 = vpop.f32.mrb[8].mxu0 }
  0xf8   : > { %3827 = vmatmul.mubr.msk.f32.gmra.mrb[8].mxu1 %vm393_vm1, %v993_v33  ;;  %v804_v44 = vmax.f32 %v772_v34, 0.0  ;;  %v735_v45 = vmul.f32 %v3781_v38, %v4353_v47  ;;  %v600_v46 = vpop.f32.mrb[9].mxu0 }
  0xf9   : > { %3829 = vmatprep.mubr.msk.f32.mxu1 %vm393_vm1, %v994_v43  ;;  %v803_v52 = vmax.f32 %v771_v37, 0.0  ;;  %v734_v53 = vmul.f32 %v4353_v47, %v600_v46  ;;  %v997_v11 = vld [vmem:[#allocation2 + $0x58] sm:$0xff] }
  0xfa   : > { %v995_v56 = vld [vmem:[#allocation2 + $0x48] sm:$0xff]  ;;  %961 = vst.msk [vmem:[#allocation2 + $0x82] sm:$0xff] %vm393_vm1, %v804_v44  ;;  %v774_v57 = vadd.f32 %v4358_v49, %v735_v45  ;;  %v996_v63 = vld [vmem:[#allocation2 + $0x50] sm:$0xff] }
  0xfb   : > { %960 = vst.msk [vmem:[#allocation2 + $0x7a] sm:$0xff] %vm393_vm1, %v803_v52  ;;  %v773_v59 = vadd.f32 %v4358_v49, %v734_v53  ;;  %v3784_v60 = vpop.f32.mrb[10].mxu0 }
  0xfc   : > { %3830 = vmatmul.mubr.msk.f32.gmra.mrb[10].mxu1 %vm393_vm1, %v995_v56  ;;  %v806_v0 = vmax.f32 %v774_v57, 0.0  ;;  %v737_v1 = vmul.f32 %v3784_v60, %v4353_v47  ;;  %v610_v2 = vpop.f32.mrb[11].mxu0 }
  0xfd   : > { %3832 = vmatprep.mubr.msk.f32.mxu1 %vm393_vm1, %v996_v63  ;;  %v805_v6 = vmax.f32 %v773_v59, 0.0  ;;  %v736_v8 = vmul.f32 %v4353_v47, %v610_v2  ;;  %v1000_v21 = vld [vmem:[#allocation2 + $0x70] sm:$0xff] }
  0xfe   : > { %v998_v9 = vld [vmem:[#allocation2 + $0x60] sm:$0xff]  ;;  %963 = vst.msk [vmem:[#allocation2 + $0x9a] sm:$0xff] %vm393_vm1, %v806_v0  ;;  %v776_v10 = vadd.f32 %v4358_v49, %v737_v1 }
  0xff   : > { %962 = vst.msk [vmem:[#allocation2 + $0x92] sm:$0xff] %vm393_vm1, %v805_v6  ;;  %v3787_v14 = vpop.f32.mrb[12].mxu0 }
 0x100   : > { %3833 = vmatmul.mubr.msk.f32.gmra.mrb[12].mxu1 %vm393_vm1, %v997_v11  ;;  %v808_v15 = vmax.f32 %v776_v10, 0.0  ;;  %v739_v16 = vmul.f32 %v3787_v14, %v4353_v47  ;;  %v620_v17 = vpop.f32.mrb[13].mxu0 }
 0x101   : > { %3835 = vmatprep.mubr.msk.f32.mxu1 %vm393_vm1, %v998_v9  ;;  %v738_v20 = vmul.f32 %v4353_v47, %v620_v17 }
 0x102   : > { %965 = vst.msk [vmem:[#allocation2 + $0xb2] sm:$0xff] %vm393_vm1, %v808_v15  ;;  %v778_v22 = vadd.f32 %v4358_v49, %v739_v16  ;;  %v1001_v29 = vld [vmem:[#allocation2 + $0x78] sm:$0xff]  ;;  %v1002_v32 = vld [vmem:[#allocation2 + $0x80] sm:$0xff] }
 0x103   : > { %v777_v24 = vadd.f32 %v4358_v49, %v738_v20  ;;  %v3790_v25 = vpop.f32.mrb[14].mxu0 }
 0x104   : > { %v810_v26 = vmax.f32 %v778_v22, 0.0  ;;  %v741_v27 = vmul.f32 %v3790_v25, %v4353_v47 }
 0x105   : > { %v809_v30 = vmax.f32 %v777_v24, 0.0 }
 0x106   : > { %967 = vst.msk [vmem:[#allocation2 + $0xca] sm:$0xff] %vm393_vm1, %v810_v26  ;;  %v780_v33 = vadd.f32 %v4358_v49, %v741_v27  ;;  %v1005_v52 = vld [vmem:[#allocation2 + $0x98] sm:$0xff] }
 0x107   : > { %v4390_v23 = vpop.f32.mrb[4].mxu1  ;;  %966 = vst.msk [vmem:[#allocation2 + $0xc2] sm:$0xff] %vm393_vm1, %v809_v30 }
 0x108   : > { %v1306_v28 = vpop.f32.mrb[5].mxu1  ;;  %v1671_v39 = vrot.slane %v4390_v23, 3  ;;  %v1854_v40 = vrot.slane %v4390_v23, 6  ;;  %v812_v36 = vmax.f32 %v780_v33, 0.0 }
 0x109   : > { %v1669_v31 = vrot.slane %v1306_v28, 3  ;;  %v1852_v35 = vrot.slane %v1306_v28, 6  ;;  %v630_v28 = vpop.f32.mrb[15].mxu0  ;;  %v1009_v10 = vld [vmem:[#allocation2 + $0xb8] sm:$0xff] }
 0x10a   : > { %969 = vst.msk [vmem:[#allocation2 + $0xe2] sm:$0xff] %vm393_vm1, %v812_v36 }
 0x10b   : > { %v1670_v42 = vsel %vm1665_vm3, %v1667_v12, %v1669_v31  ;;  %v1853_v54 = vsel %vm1848_vm4, %v1850_v18, %v1852_v35  ;;  %v775_v12 = vadd.f32 %v4358_v49, %v736_v8  ;;  %v999_v18 = vld [vmem:[#allocation2 + $0x68] sm:$0xff]  ;;  %v740_v31 = vmul.f32 %v4353_v47, %v630_v28  ;;  %v3793_v35 = vpop.f32.mrb[16].mxu0 }
 0x10c   : > { %1921 = vrot.lane.b32.xlu1 %v1853_v54, %s3990_s11  ;;  %1738 = vrot.lane.b32.xlu0 %v1670_v42, %s3989_s30  ;;  %v743_v37 = vmul.f32 %v3793_v35, %v4353_v47  ;;  %v640_v38 = vpop.f32.mrb[17].mxu0  ;;  %v1004_v42 = vld [vmem:[#allocation2 + $0x90] sm:$0xff] }
 0x10d   : > { %v807_v19 = vmax.f32 %v775_v12, 0.0  ;;  %3836 = vmatmul.mubr.msk.f32.gmra.mrb[14].mxu1 %vm393_vm1, %v999_v18  ;;  %v779_v34 = vadd.f32 %v4358_v49, %v740_v31  ;;  %v3796_v45 = vpop.f32.mrb[18].mxu0  ;;  %v1012_v25 = vld [vmem:[#allocation2 + $0xd0] sm:$0xff] }
 0x10e   : > { %3838 = vmatprep.mubr.msk.f32.mxu1 %vm393_vm1, %v1000_v21  ;;  %v782_v43 = vadd.f32 %v4358_v49, %v743_v37  ;;  %v1010_v14 = vld [vmem:[#allocation2 + $0xc0] sm:$0xff]  ;;  %v1011_v21 = vld [vmem:[#allocation2 + $0xc8] sm:$0xff] }
 0x10f   : > { %964 = vst.msk [vmem:[#allocation2 + $0xaa] sm:$0xff] %vm393_vm1, %v807_v19 }
 0x110   : > { %v814_v46 = vmax.f32 %v782_v43, 0.0 }
 0x111   : > { %3839 = vmatmul.mubr.msk.f32.gmra.mrb[16].mxu1 %vm393_vm1, %v1001_v29 }
 0x112   : > { %3841 = vmatprep.mubr.msk.f32.mxu1 %vm393_vm1, %v1002_v32  ;;  %971 = vst.msk [vmem:[#allocation2 + $0xfa] sm:$0xff] %vm393_vm1, %v814_v46 }
 0x116   : > { %v1008_v1 = vld [vmem:[#allocation2 + $0xb0] sm:$0xff] }
 0x119   : > { %v3825_v41 = vpop.f32.mrb[6].mxu1 }
 0x11a   : > { %v1674_v48 = vrot.slane %v3825_v41, 3  ;;  %v1857_v50 = vrot.slane %v3825_v41, 6  ;;  %v4407_v51 = vpop.f32.mrb[7].mxu1  ;;  %v742_v41 = vmul.f32 %v4353_v47, %v640_v38 }
 0x11b   : > { %v1672_v55 = vrot.slane %v4407_v51, 3  ;;  %v1855_v58 = vrot.slane %v4407_v51, 6 }
 0x11c   : > { %v781_v44 = vadd.f32 %v4358_v49, %v742_v41 }
 0x11d   : > { %v1673_v61 = vsel %vm1665_vm3, %v1671_v39, %v1672_v55  ;;  %v1675_v62 = vsel %vm1665_vm3, %v1672_v55, %v1674_v48  ;;  %v1856_v4 = vsel %vm1848_vm4, %v1854_v40, %v1855_v58  ;;  %v1858_v5 = vsel %vm1848_vm4, %v1855_v58, %v1857_v50  ;;  %v1003_v39 = vld [vmem:[#allocation2 + $0x88] sm:$0xff]  ;;  %v650_v50 = vpop.f32.mrb[19].mxu0  ;;  %v1006_v55 = vld [vmem:[#allocation2 + $0xa0] sm:$0xff] }
 0x11e   : > { %1740 = vrot.lane.b32.xlu1 %v1673_v61, %s3989_s30  ;;  %1923 = vrot.lane.b32.xlu0 %v1856_v4, %s3990_s11  ;;  %v811_v40 = vmax.f32 %v779_v34, 0.0  ;;  %v745_v48 = vmul.f32 %v3796_v45, %v4353_v47  ;;  %v813_v53 = vmax.f32 %v781_v44, 0.0  ;;  %v744_v54 = vmul.f32 %v4353_v47, %v650_v50  ;;  %v3799_v58 = vpop.f32.mrb[20].mxu0 }
 0x11f   : > { %3842 = vmatmul.mubr.msk.f32.gmra.mrb[18].mxu1 %vm393_vm1, %v1003_v39  ;;  %v747_v60 = vmul.f32 %v3799_v58, %v4353_v47  ;;  %v660_v61 = vpop.f32.mrb[21].mxu0 }
 0x120   : > { %968 = vst.msk [vmem:[#allocation2 + $0xda] sm:$0xff] %vm393_vm1, %v811_v40  ;;  %3844 = vmatprep.mubr.msk.f32.mxu1 %vm393_vm1, %v1004_v42  ;;  %v784_v56 = vadd.f32 %v4358_v49, %v745_v48  ;;  %970 = vst.msk [vmem:[#allocation2 + $0xf2] sm:$0xff] %vm393_vm1, %v813_v53  ;;  %v783_v57 = vadd.f32 %v4358_v49, %v744_v54  ;;  %v746_v0 = vmul.f32 %v4353_v47, %v660_v61  ;;  %v1015_v42 = vld [vmem:[#allocation2 + $0xe8] sm:$0xff]  ;;  %v1018_v54 = vld [vmem:[#allocation2 + $0x100] sm:$0xff] }
 0x121   : > { %v786_v2 = vadd.f32 %v4358_v49, %v747_v60 }
 0x122   : > { %1742 = vrot.lane.b32.xlu1 %v1675_v62, %s3989_s30  ;;  %v816_v59 = vmax.f32 %v784_v56, 0.0  ;;  %v1007_v62 = vld [vmem:[#allocation2 + $0xa8] sm:$0xff]  ;;  %v815_v63 = vmax.f32 %v783_v57, 0.0  ;;  %v785_v4 = vadd.f32 %v4358_v49, %v746_v0 }
 0x123   : > { %3845 = vmatmul.mubr.msk.f32.gmra.mrb[20].mxu1 %vm393_vm1, %v1005_v52  ;;  %v818_v6 = vmax.f32 %v786_v2, 0.0 }
 0x124   : > { %3847 = vmatprep.mubr.msk.f32.mxu1 %vm393_vm1, %v1006_v55  ;;  %973 = vst.msk [vmem:[#allocation2 + $0x112] sm:$0xff] %vm393_vm1, %v816_v59  ;;  %972 = vst.msk [vmem:[#allocation2 + $0x10a] sm:$0xff] %vm393_vm1, %v815_v63  ;;  %v817_v11 = vmax.f32 %v785_v4, 0.0 }
 0x125   : > { %975 = vst.msk [vmem:[#allocation2 + $0x12a] sm:$0xff] %vm393_vm1, %v818_v6 }
 0x126   : > { %1925 = vrot.lane.b32.xlu1 %v1858_v5, %s3990_s11  ;;  %v3802_v5 = vpop.f32.mrb[22].mxu0  ;;  %974 = vst.msk [vmem:[#allocation2 + $0x122] sm:$0xff] %vm393_vm1, %v817_v11  ;;  %v1039_v11 = vld [vmem:[#allocation2 + $0x1a8] sm:$0xff] }
 0x127   : > { %3848 = vmatmul.mubr.msk.f32.gmra.mrb[22].mxu1 %vm393_vm1, %v1007_v62  ;;  %v749_v8 = vmul.f32 %v3802_v5, %v4353_v47  ;;  %v670_v9 = vpop.f32.mrb[23].mxu0  ;;  %v1013_v32 = vld [vmem:[#allocation2 + $0xd8] sm:$0xff]  ;;  %v1014_v35 = vld [vmem:[#allocation2 + $0xe0] sm:$0xff]  ;;  %v1016_v45 = vld [vmem:[#allocation2 + $0xf0] sm:$0xff] }
 0x128   : > { %3850 = vmatprep.mubr.msk.f32.mxu1 %vm393_vm1, %v1008_v1  ;;  %v748_v12 = vmul.f32 %v4353_v47, %v670_v9  ;;  %v3805_v17 = vpop.f32.mrb[24].mxu0  ;;  %v1017_v52 = vld [vmem:[#allocation2 + $0xf8] sm:$0xff] }
 0x129   : > { %v788_v15 = vadd.f32 %v4358_v49, %v749_v8  ;;  %v751_v19 = vmul.f32 %v3805_v17, %v4353_v47  ;;  %v680_v20 = vpop.f32.mrb[25].mxu0  ;;  %v1037_v9 = vld [vmem:[#allocation2 + $0x198] sm:$0xff] }
 0x12a   : > { %v787_v16 = vadd.f32 %v4358_v49, %v748_v12  ;;  %v750_v24 = vmul.f32 %v4353_v47, %v680_v20  ;;  %v3808_v28 = vpop.f32.mrb[26].mxu0 }
 0x12b   : > { %3851 = vmatmul.mubr.msk.f32.gmra.mrb[24].mxu1 %vm393_vm1, %v1009_v10  ;;  %v820_v18 = vmax.f32 %v788_v15, 0.0  ;;  %v790_v26 = vadd.f32 %v4358_v49, %v751_v19  ;;  %v753_v30 = vmul.f32 %v3808_v28, %v4353_v47  ;;  %v690_v31 = vpop.f32.mrb[27].mxu0  ;;  %v1020_v55 = vld [vmem:[#allocation2 + $0x110] sm:$0xff]  ;;  %v1038_v10 = vld [vmem:[#allocation2 + $0x1a0] sm:$0xff] }
 0x12c   : > { %3853 = vmatprep.mubr.msk.f32.mxu1 %vm393_vm1, %v1010_v14  ;;  %v819_v22 = vmax.f32 %v787_v16, 0.0  ;;  %v789_v27 = vadd.f32 %v4358_v49, %v750_v24  ;;  %v752_v34 = vmul.f32 %v4353_v47, %v690_v31  ;;  %v3811_v38 = vpop.f32.mrb[28].mxu0  ;;  %v1024_v58 = vld [vmem:[#allocation2 + $0x130] sm:$0xff] }
 0x12d   : > { %977 = vst.msk [vmem:[#allocation2 + $0x142] sm:$0xff] %vm393_vm1, %v820_v18  ;;  %v822_v29 = vmax.f32 %v790_v26, 0.0  ;;  %v792_v36 = vadd.f32 %v4358_v49, %v753_v30  ;;  %v755_v40 = vmul.f32 %v3811_v38, %v4353_v47  ;;  %v700_v41 = vpop.f32.mrb[29].mxu0  ;;  %v1022_v56 = vld [vmem:[#allocation2 + $0x120] sm:$0xff]  ;;  %v1023_v57 = vld [vmem:[#allocation2 + $0x128] sm:$0xff] }
 0x12e   : > { %976 = vst.msk [vmem:[#allocation2 + $0x13a] sm:$0xff] %vm393_vm1, %v819_v22  ;;  %v821_v33 = vmax.f32 %v789_v27, 0.0  ;;  %v791_v37 = vadd.f32 %v4358_v49, %v752_v34  ;;  %v754_v44 = vmul.f32 %v4353_v47, %v700_v41  ;;  %v1019_v47 = vld [vmem:[#allocation2 + $0x108] sm:$0xff] }
 0x12f   : > { %3854 = vmatmul.mubr.msk.f32.gmra.mrb[26].mxu1 %vm393_vm1, %v1011_v21  ;;  %979 = vst.msk [vmem:[#allocation2 + $0x15a] sm:$0xff] %vm393_vm1, %v822_v29  ;;  %v824_v39 = vmax.f32 %v792_v36, 0.0  ;;  %v794_v46 = vadd.f32 %v4358_v49, %v755_v40 }
 0x130   : > { %3856 = vmatprep.mubr.msk.f32.mxu1 %vm393_vm1, %v1012_v25  ;;  %978 = vst.msk [vmem:[#allocation2 + $0x152] sm:$0xff] %vm393_vm1, %v821_v33  ;;  %v823_v43 = vmax.f32 %v791_v37, 0.0  ;;  %v793_v48 = vadd.f32 %v4358_v49, %v754_v44  ;;  %v1021_v49 = vld [vmem:[#allocation2 + $0x118] sm:$0xff] }
 0x131   : > { %981 = vst.msk [vmem:[#allocation2 + $0x172] sm:$0xff] %vm393_vm1, %v824_v39  ;;  %v826_v50 = vmax.f32 %v794_v46, 0.0 }
 0x132   : > { %980 = vst.msk [vmem:[#allocation2 + $0x16a] sm:$0xff] %vm393_vm1, %v823_v43  ;;  %v825_v53 = vmax.f32 %v793_v48, 0.0 }
 0x133   : > { %3857 = vmatmul.mubr.msk.f32.gmra.mrb[28].mxu1 %vm393_vm1, %v1013_v32  ;;  %983 = vst.msk [vmem:[#allocation2 + $0x18a] sm:$0xff] %vm393_vm1, %v826_v50 }
 0x134   : > { %3859 = vmatprep.mubr.msk.f32.mxu1 %vm393_vm1, %v1014_v35  ;;  %982 = vst.msk [vmem:[#allocation2 + $0x182] sm:$0xff] %vm393_vm1, %v825_v53  ;;  %v1027_v61 = vld [vmem:[#allocation2 + $0x148] sm:$0xff] }
 0x135   : > { %v1025_v59 = vld [vmem:[#allocation2 + $0x138] sm:$0xff]  ;;  %v1026_v60 = vld [vmem:[#allocation2 + $0x140] sm:$0xff] }
 0x136   : > { %v1030_v0 = vld [vmem:[#allocation2 + $0x160] sm:$0xff] }
 0x137   : > { %3860 = vmatmul.mubr.msk.f32.gmra.mrb[30].mxu1 %vm393_vm1, %v1015_v42  ;;  %v1028_v62 = vld [vmem:[#allocation2 + $0x150] sm:$0xff]  ;;  %v1029_v63 = vld [vmem:[#allocation2 + $0x158] sm:$0xff] }
 0x138   : > { %3862 = vmatprep.mubr.msk.f32.mxu1 %vm393_vm1, %v1016_v45  ;;  %v1033_v4 = vld [vmem:[#allocation2 + $0x178] sm:$0xff] }
 0x139   : > { %v1031_v1 = vld [vmem:[#allocation2 + $0x168] sm:$0xff]  ;;  %v1032_v2 = vld [vmem:[#allocation2 + $0x170] sm:$0xff] }
 0x13a   : > { %v1036_v8 = vld [vmem:[#allocation2 + $0x190] sm:$0xff] }
 0x13b   : > { %3863 = vmatmul.mubr.msk.f32.gmra.mrb[32].mxu1 %vm393_vm1, %v1017_v52  ;;  %v1034_v5 = vld [vmem:[#allocation2 + $0x180] sm:$0xff]  ;;  %v1035_v6 = vld [vmem:[#allocation2 + $0x188] sm:$0xff] }
 0x13c   : > { %3865 = vmatprep.mubr.msk.f32.mxu1 %vm393_vm1, %v1018_v54 }
 0x13f   : > { %3866 = vmatmul.mubr.msk.f32.gmra.mrb[34].mxu1 %vm393_vm1, %v1019_v47 }
 0x140   : > { %3868 = vmatprep.mubr.msk.f32.mxu1 %vm393_vm1, %v1020_v55 }
 0x143   : > { %3869 = vmatmul.mubr.msk.f32.gmra.mrb[36].mxu1 %vm393_vm1, %v1021_v49 }
 0x144   : > { %3871 = vmatprep.mubr.msk.f32.mxu1 %vm393_vm1, %v1022_v56 }
 0x147   : > { %3872 = vmatmul.mubr.msk.f32.gmra.mrb[38].mxu1 %vm393_vm1, %v1023_v57 }
 0x148   : > { %3874 = vmatprep.mubr.msk.f32.mxu1 %vm393_vm1, %v1024_v58 }
 0x14b   : > { %3875 = vmatmul.mubr.msk.f32.gmra.mrb[40].mxu1 %vm393_vm1, %v1025_v59 }
 0x14c   : > { %3877 = vmatprep.mubr.msk.f32.mxu1 %vm393_vm1, %v1026_v60 }
 0x14f   : > { %3878 = vmatmul.mubr.msk.f32.gmra.mrb[42].mxu1 %vm393_vm1, %v1027_v61 }
 0x150   : > { %3880 = vmatprep.mubr.msk.f32.mxu1 %vm393_vm1, %v1028_v62 }
 0x153   : > { %3881 = vmatmul.mubr.msk.f32.gmra.mrb[44].mxu1 %vm393_vm1, %v1029_v63 }
 0x154   : > { %3883 = vmatprep.mubr.msk.f32.mxu1 %vm393_vm1, %v1030_v0 }
 0x157   : > { %3884 = vmatmul.mubr.msk.f32.gmra.mrb[46].mxu1 %vm393_vm1, %v1031_v1 }
 0x158   : > { %3886 = vmatprep.mubr.msk.f32.mxu1 %vm393_vm1, %v1032_v2 }
 0x15b   : > { %3887 = vmatmul.mubr.msk.f32.gmra.mrb[48].mxu1 %vm393_vm1, %v1033_v4 }
 0x15c   : > { %3889 = vmatprep.mubr.msk.f32.mxu1 %vm393_vm1, %v1034_v5 }
 0x15f   : > { %3890 = vmatmul.mubr.msk.f32.gmra.mrb[50].mxu1 %vm393_vm1, %v1035_v6 }
 0x160   : > { %3892 = vmatprep.mubr.msk.f32.mxu1 %vm393_vm1, %v1036_v8 }
 0x163   : > { %3893 = vmatmul.mubr.msk.f32.gmra.mrb[52].mxu1 %vm393_vm1, %v1037_v9 }
 0x164   : > { %3895 = vmatprep.mubr.msk.f32.mxu1 %vm393_vm1, %v1038_v10 }
 0x167   : > { %3896 = vmatmul.mubr.msk.f32.gmra.mrb[54].mxu1 %vm393_vm1, %v1039_v11 }
 0x1cb   : > { %v4536_v12 = vpop.f32.mrb[8].mxu1 }
 0x1cc   : > { %6178 = vst [vmem:[#allocation4_spill] sm:$0xff] %v4536_v12  ;;  %v1677_v14 = vrot.slane %v4536_v12, 3  ;;  %v1860_v15 = vrot.slane %v4536_v12, 6  ;;  %v4540_v16 = vpop.f32.mrb[9].mxu1 }
 0x1cd   : > { %6179 = vst [vmem:[#allocation5_spill] sm:$0xff] %v4540_v16  ;;  %v1676_v17 = vrot.slane %v4540_v16, 3  ;;  %v1859_v18 = vrot.slane %v4540_v16, 6 }
 0x1cf   : > { %v4544_v19 = vpop.f32.mrb[10].mxu1  ;;  %v1678_v20 = vsel %vm1665_vm3, %v1676_v17, %v1677_v14  ;;  %v1861_v21 = vsel %vm1848_vm4, %v1859_v18, %v1860_v15 }
 0x1d0   : > { %6180 = vst [vmem:[#allocation6_spill] sm:$0xff] %v4544_v19  ;;  %1744 = vrot.lane.b32.xlu0 %v1678_v20, %s3989_s30  ;;  %v1336_v22 = vpop.f32.mrb[11].mxu1  ;;  %v1681_v32 = vrot.slane %v4544_v19, 3  ;;  %v1864_v33 = vrot.slane %v4544_v19, 6 }
 0x1d1   : > { %v1679_v24 = vrot.slane %v1336_v22, 3  ;;  %v1862_v25 = vrot.slane %v1336_v22, 6 }
 0x1d3   : > { %v3834_v26 = vpop.f32.mrb[12].mxu1  ;;  %v1680_v27 = vsel %vm1665_vm3, %v1677_v14, %v1679_v24  ;;  %v1863_v28 = vsel %vm1848_vm4, %v1860_v15, %v1862_v25 }
 0x1d4   : > { %v1684_v29 = vrot.slane %v3834_v26, 3  ;;  %v1867_v30 = vrot.slane %v3834_v26, 6  ;;  %1927 = vrot.lane.b32.xlu0 %v1861_v21, %s3990_s11  ;;  %1746 = vrot.lane.b32.xlu1 %v1680_v27, %s3989_s30  ;;  %v4553_v31 = vpop.f32.mrb[13].mxu1 }
 0x1d5   : > { %6181 = vst [vmem:[#allocation7_spill] sm:$0xff] %v4553_v31  ;;  %v1682_v34 = vrot.slane %v4553_v31, 3  ;;  %v1865_v35 = vrot.slane %v4553_v31, 6 }
 0x1d7   : > { %v1683_v36 = vsel %vm1665_vm3, %v1681_v32, %v1682_v34  ;;  %v1685_v37 = vsel %vm1665_vm3, %v1682_v34, %v1684_v29  ;;  %v1866_v38 = vsel %vm1848_vm4, %v1864_v33, %v1865_v35  ;;  %v4563_v39 = vsel %vm1848_vm4, %v1865_v35, %v1867_v30 }
 0x1d8   : > { %2037 = vrot.lane.b32.xlu0 %v4544_v19, %s3991_s12  ;;  %1929 = vrot.lane.b32.xlu1 %v1863_v28, %s3990_s11 }
 0x1dc   : > { %2039 = vrot.lane.b32.xlu1 %v4553_v31, %s3991_s12  ;;  %1748 = vrot.lane.b32.xlu0 %v1683_v36, %s3989_s30 }
 0x1e0   : > { %v4565_v40 = vpop.f32.mrb[14].mxu1  ;;  %1750 = vrot.lane.b32.xlu1 %v1685_v37, %s3989_s30  ;;  %1931 = vrot.lane.b32.xlu0 %v1866_v38, %s3990_s11 }
 0x1e1   : > { %6182 = vst [vmem:[#allocation8_spill] sm:$0xff] %v4565_v40  ;;  %v1687_v41 = vrot.slane %v4565_v40, 3  ;;  %v1870_v42 = vrot.slane %v4565_v40, 6  ;;  %v4572_v43 = vpop.f32.mrb[15].mxu1 }
 0x1e2   : > { %6183 = vst [vmem:[#allocation9_spill] sm:$0xff] %v4572_v43  ;;  %v1686_v44 = vrot.slane %v4572_v43, 3  ;;  %v1869_v45 = vrot.slane %v4572_v43, 6 }
 0x1e4   : > { %v4576_v46 = vpop.f32.mrb[16].mxu1  ;;  %v4579_v48 = vsel %vm1665_vm3, %v1686_v44, %v1687_v41  ;;  %v4582_v50 = vsel %vm1848_vm4, %v1869_v45, %v1870_v42  ;;  %1933 = vrot.lane.b32.xlu1 %v4563_v39, %s3990_s11  ;;  %2167 = vrot.lane.b32.xlu0 %v1683_v36, %s3992_s15 }
 0x1e5   : > { %6184 = vst [vmem:[#allocation10_spill] sm:$0xff] %v4576_v46  ;;  %v1366_v52 = vpop.f32.mrb[17].mxu1  ;;  %v1691_v47 = vrot.slane %v4576_v46, 3  ;;  %v1874_v55 = vrot.slane %v4576_v46, 6 }
 0x1e6   : > { %v1689_v53 = vrot.slane %v1366_v52, 3  ;;  %v1872_v54 = vrot.slane %v1366_v52, 6 }
 0x1e8   : > { %v4590_v56 = vsel %vm1665_vm3, %v1687_v41, %v1689_v53  ;;  %v4593_v57 = vsel %vm1848_vm4, %v1870_v42, %v1872_v54  ;;  %2169 = vrot.lane.b32.xlu1 %v1685_v37, %s3992_s15  ;;  %2043 = vrot.lane.b32.xlu0 %v4565_v40, %s3991_s12 }
 0x1ec   : > { %2294 = vrot.lane.b32.xlu1 %v1866_v38, %s3993_s16  ;;  %2041 = vrot.lane.b32.xlu0 %v4572_v43, %s3991_s12 }
 0x1f0   : > { %2296 = vrot.lane.b32.xlu1 %v4563_v39, %s3993_s16  ;;  %1752 = vrot.lane.b32.xlu0 %v4579_v48, %s3989_s30 }
 0x1f2   : > { %v3843_v49 = vpop.f32.mrb[18].mxu1 }
 0x1f3   : > { %v1694_v58 = vrot.slane %v3843_v49, 3  ;;  %v1877_v59 = vrot.slane %v3843_v49, 6  ;;  %v4597_v60 = vpop.f32.mrb[19].mxu1 }
 0x1f4   : > { %6185 = vst [vmem:[#allocation11_spill] sm:$0xff] %v4597_v60  ;;  %v1692_v61 = vrot.slane %v4597_v60, 3  ;;  %v1875_v62 = vrot.slane %v4597_v60, 6  ;;  %2298 = vrot.lane.b32.xlu1 %v4582_v50, %s3993_s16  ;;  %1935 = vrot.lane.b32.xlu0 %v4582_v50, %s3990_s11 }
 0x1f6   : > { %v4602_v63 = vsel %vm1665_vm3, %v1692_v61, %v1694_v58  ;;  %v4604_v0 = vpop.f32.mrb[20].mxu1  ;;  %v4607_v1 = vsel %vm1848_vm4, %v1875_v62, %v1877_v59  ;;  %v4610_v2 = vsel %vm1665_vm3, %v1691_v47, %v1692_v61  ;;  %v4613_v4 = vsel %vm1848_vm4, %v1874_v55, %v1875_v62 }
 0x1f7   : > { %6186 = vst [vmem:[#allocation12_spill] sm:$0xff] %v4604_v0  ;;  %v4618_v5 = vpop.f32.mrb[21].mxu1  ;;  %v1697_v6 = vrot.slane %v4604_v0, 3  ;;  %v1880_v8 = vrot.slane %v4604_v0, 6 }
 0x1f8   : > { %6187 = vst [vmem:[#allocation13_spill] sm:$0xff] %v4618_v5  ;;  %v1696_v9 = vrot.slane %v4618_v5, 3  ;;  %v1879_v10 = vrot.slane %v4618_v5, 6  ;;  %2171 = vrot.lane.b32.xlu0 %v4579_v48, %s3992_s15  ;;  %1754 = vrot.lane.b32.xlu1 %v4590_v56, %s3989_s30 }
 0x1fa   : > { %v4624_v11 = vpop.f32.mrb[22].mxu1  ;;  %v4627_v14 = vsel %vm1665_vm3, %v1696_v9, %v1697_v6  ;;  %v4630_v15 = vsel %vm1848_vm4, %v1879_v10, %v1880_v8 }
 0x1fb   : > { %6188 = vst [vmem:[#allocation14_spill] sm:$0xff] %v4624_v11  ;;  %v1396_v17 = vpop.f32.mrb[23].mxu1  ;;  %v1701_v25 = vrot.slane %v4624_v11, 3  ;;  %v1884_v26 = vrot.slane %v4624_v11, 6 }
 0x1fc   : > { %v1699_v18 = vrot.slane %v1396_v17, 3  ;;  %v1882_v20 = vrot.slane %v1396_v17, 6  ;;  %2045 = vrot.lane.b32.xlu0 %v4576_v46, %s3991_s12  ;;  %1937 = vrot.lane.b32.xlu1 %v4593_v57, %s3990_s11 }
 0x1fe   : > { %v3852_v21 = vpop.f32.mrb[24].mxu1  ;;  %v4636_v22 = vsel %vm1665_vm3, %v1697_v6, %v1699_v18  ;;  %v4639_v24 = vsel %vm1848_vm4, %v1880_v8, %v1882_v20 }
 0x1ff   : > { %v1704_v27 = vrot.slane %v3852_v21, 3  ;;  %v1887_v28 = vrot.slane %v3852_v21, 6  ;;  %v4646_v29 = vpop.f32.mrb[25].mxu1 }
 0x200   : > { %6189 = vst [vmem:[#allocation15_spill] sm:$0xff] %v4646_v29  ;;  %v1702_v30 = vrot.slane %v4646_v29, 3  ;;  %v1885_v32 = vrot.slane %v4646_v29, 6  ;;  %2173 = vrot.lane.b32.xlu0 %v4590_v56, %s3992_s15  ;;  %2047 = vrot.lane.b32.xlu1 %v4597_v60, %s3991_s12 }
 0x202   : > { %v4651_v33 = vsel %vm1665_vm3, %v1701_v25, %v1702_v30  ;;  %v4654_v34 = vsel %vm1665_vm3, %v1702_v30, %v1704_v27  ;;  %v4657_v35 = vsel %vm1848_vm4, %v1884_v26, %v1885_v32  ;;  %v4660_v36 = vsel %vm1848_vm4, %v1885_v32, %v1887_v28  ;;  %v4662_v37 = vpop.f32.mrb[26].mxu1 }
 0x203   : > { %6190 = vst [vmem:[#allocation16_spill] sm:$0xff] %v4662_v37  ;;  %v4668_v38 = vpop.f32.mrb[27].mxu1  ;;  %v1707_v41 = vrot.slane %v4662_v37, 3  ;;  %v1890_v42 = vrot.slane %v4662_v37, 6 }
 0x204   : > { %6191 = vst [vmem:[#allocation17_spill] sm:$0xff] %v4668_v38  ;;  %v1706_v44 = vrot.slane %v4668_v38, 3  ;;  %v1889_v45 = vrot.slane %v4668_v38, 6  ;;  %2300 = vrot.lane.b32.xlu0 %v4593_v57, %s3993_s16  ;;  %1758 = vrot.lane.b32.xlu1 %v4602_v63, %s3989_s30 }
 0x206   : > { %v4674_v52 = vpop.f32.mrb[28].mxu1  ;;  %v4677_v53 = vsel %vm1665_vm3, %v1706_v44, %v1707_v41  ;;  %v4680_v39 = vsel %vm1848_vm4, %v1889_v45, %v1890_v42  ;;  %v1040_v45 = vld [vmem:[#allocation2 + $0x1b0] sm:$0xff] }
 0x207   : > { %6192 = vst [vmem:[#allocation18_spill] sm:$0xff] %v4674_v52  ;;  %v1426_v54 = vpop.f32.mrb[29].mxu1  ;;  %v1711_v61 = vrot.slane %v4674_v52, 3  ;;  %v1894_v62 = vrot.slane %v4674_v52, 6  ;;  %3898 = vmatprep.mubr.msk.f32.mxu1 %vm393_vm1, %v1040_v45 }
 0x208   : > { %v1709_v47 = vrot.slane %v1426_v54, 3  ;;  %v1892_v55 = vrot.slane %v1426_v54, 6  ;;  %1941 = vrot.lane.b32.xlu1 %v4607_v1, %s3990_s11  ;;  %1756 = vrot.lane.b32.xlu0 %v4610_v2, %s3989_s30  ;;  %v1041_v54 = vld [vmem:[#allocation2 + $0x1b8] sm:$0xff] }
 0x209   : > { %3899 = vmatmul.mubr.msk.f32.gmra.mrb[56].mxu1 %vm393_vm1, %v1041_v54  ;;  %v1043_v54 = vld [vmem:[#allocation2 + $0x1c8] sm:$0xff] }
 0x20a   : > { %v3861_v49 = vpop.f32.mrb[30].mxu1  ;;  %v4687_v58 = vsel %vm1665_vm3, %v1707_v41, %v1709_v47  ;;  %v4690_v59 = vsel %vm1848_vm4, %v1890_v42, %v1892_v55 }
 0x20b   : > { %v1714_v50 = vrot.slane %v3861_v49, 3  ;;  %v1897_v6 = vrot.slane %v3861_v49, 6  ;;  %v4698_v8 = vpop.f32.mrb[31].mxu1 }
 0x20c   : > { %6193 = vst [vmem:[#allocation19_spill] sm:$0xff] %v4698_v8  ;;  %v1712_v9 = vrot.slane %v4698_v8, 3  ;;  %v1895_v10 = vrot.slane %v4698_v8, 6  ;;  %1939 = vrot.lane.b32.xlu0 %v4613_v4, %s3990_s11  ;;  %2414 = vrot.lane.b32.xlu1 %v4604_v0, %s3994_s17 }
 0x20e   : > { %v4703_v17 = vsel %vm1665_vm3, %v1712_v9, %v1714_v50  ;;  %v4706_v18 = vsel %vm1665_vm3, %v1711_v61, %v1712_v9  ;;  %v4709_v20 = vsel %vm1848_vm4, %v1895_v10, %v1897_v6  ;;  %v4712_v48 = vsel %vm1848_vm4, %v1894_v62, %v1895_v10  ;;  %v4722_v21 = vpop.f32.mrb[32].mxu1  ;;  %v1042_v10 = vld [vmem:[#allocation2 + $0x1c0] sm:$0xff] }
 0x20f   : > { %v4724_v25 = vpop.f32.mrb[33].mxu1  ;;  %v1717_v55 = vrot.slane %v4722_v21, 3  ;;  %v1900_v61 = vrot.slane %v4722_v21, 6  ;;  %3901 = vmatprep.mubr.msk.f32.mxu1 %vm393_vm1, %v1042_v10 }
 0x210   : > { %6194 = vst [vmem:[#allocation20_spill] sm:$0xff] %v4724_v25  ;;  %v1716_v47 = vrot.slane %v4724_v25, 3  ;;  %v1899_v49 = vrot.slane %v4724_v25, 6  ;;  %2175 = vrot.lane.b32.xlu0 %v4610_v2, %s3992_s15  ;;  %2177 = vrot.lane.b32.xlu1 %v4602_v63, %s3992_s15 }
 0x211   : > { %3902 = vmatmul.mubr.msk.f32.gmra.mrb[58].mxu1 %vm393_vm1, %v1043_v54 }
 0x212   : > { %v4730_v26 = vpop.f32.mrb[34].mxu1  ;;  %v4759_v50 = vsel %vm1665_vm3, %v1716_v47, %v1717_v55 }
 0x213   : > { %v1456_v27 = vpop.f32.mrb[35].mxu1  ;;  %v1721_v10 = vrot.slane %v4730_v26, 3 }
 0x214   : > { %v1719_v57 = vrot.slane %v1456_v27, 3  ;;  %v1902_v42 = vrot.slane %v1456_v27, 6  ;;  %v4771_v27 = vsel %vm1848_vm4, %v1899_v49, %v1900_v61  ;;  %2304 = vrot.lane.b32.xlu0 %v4607_v1, %s3993_s16  ;;  %2302 = vrot.lane.b32.xlu1 %v4613_v4, %s3993_s16  ;;  %v1904_v49 = vrot.slane %v4730_v26, 6  ;;  %v1044_v4 = vld [vmem:[#allocation2 + $0x1d0] sm:$0xff] }
 0x215   : > { %3904 = vmatprep.mubr.msk.f32.mxu1 %vm393_vm1, %v1044_v4 }
 0x216   : > { %v3870_v28 = vpop.f32.mrb[36].mxu1  ;;  %v4762_v6 = vsel %vm1665_vm3, %v1717_v55, %v1719_v57  ;;  %v4774_v45 = vsel %vm1848_vm4, %v1900_v61, %v1902_v42  ;;  %3905 = vmatmul.mubr.msk.f32.gmra.mrb[60].mxu1 %vm393_vm1, %v1045_v3  ;;  %v6203_v3 = vmov 0.0  }
 0x217   : > { %v4732_v30 = vpop.f32.mrb[37].mxu1  ;;  %v1724_v2 = vrot.slane %v3870_v28, 3  ;;  %v1907_v47 = vrot.slane %v3870_v28, 6  ;;  %2882 = vst.msk [vmem:[#allocation3 + $0x10] sm:$0xff] %vm2879_vm5, %v6203_v3  ;;  %2883 = vst.msk [vmem:[#allocation3 + $0x18] sm:$0xff] %vm2879_vm5, %v6203_v3 }
 0x218   : > { %v1722_v42 = vrot.slane %v4732_v30, 3  ;;  %v1905_v61 = vrot.slane %v4732_v30, 6  ;;  %2051 = vrot.lane.b32.xlu1 %v4604_v0, %s3991_s12  ;;  %2049 = vrot.lane.b32.xlu0 %v4618_v5, %s3991_s12  ;;  %2880 = vst.msk [vmem:[#allocation3] sm:$0xff] %vm2879_vm5, %v6203_v3  ;;  %2881 = vst.msk [vmem:[#allocation3 + $0x8] sm:$0xff] %vm2879_vm5, %v6203_v3 }
 0x219   : > { %2884 = vst.msk [vmem:[#allocation3 + $0x20] sm:$0xff] %vm2879_vm5, %v6203_v3  ;;  %2885 = vst.msk [vmem:[#allocation3 + $0x28] sm:$0xff] %vm2879_vm5, %v6203_v3 }
 0x21a   : > { %v4738_v56 = vpop.f32.mrb[38].mxu1  ;;  %v4799_v28 = vsel %vm1665_vm3, %v1722_v42, %v1724_v2  ;;  %v4802_v54 = vsel %vm1848_vm4, %v1904_v49, %v1905_v61  ;;  %v4806_v46 = vsel %vm1848_vm4, %v1905_v61, %v1907_v47  ;;  %v4809_v0 = vsel %vm1665_vm3, %v1721_v10, %v1722_v42  ;;  %2886 = vst.msk [vmem:[#allocation3 + $0x30] sm:$0xff] %vm2879_vm5, %v6203_v3  ;;  %v2974_v61 = vld [vmem:[%s6117_s7] sm:$0xff] }
 0x21b   : > { %6195 = vst [vmem:[#allocation21_spill] sm:$0xff] %v4738_v56  ;;  %v4740_v32 = vpop.f32.mrb[39].mxu1  ;;  %6201 = vst [vmem:[#allocation27_spill] sm:$0xff] %v4806_v46  ;;  %3907 = vmatprep.subr.mxu0 %v2974_v61 }
 0x21c   : > { %6196 = vst [vmem:[#allocation22_spill] sm:$0xff] %v4740_v32  ;;  %6202 = vst [vmem:[#allocation28_spill] sm:$0xff] %v4809_v0  ;;  %2412 = vrot.lane.b32.xlu1 %v4618_v5, %s3994_s17  ;;  %1760 = vrot.lane.b32.xlu0 %v4627_v14, %s3989_s30 }
 0x21d   : > { %2887 = vst.msk [vmem:[#allocation3 + $0x38] sm:$0xff] %vm2879_vm5, %v6203_v3  ;;  %2888 = vst.msk [vmem:[#allocation3 + $0x40] sm:$0xff] %vm2879_vm5, %v6203_v3  ;;  %3908 = vmatpush3.msra.mxu0 %v2974_v61  ;;  %v4943_v61 = vpop.permute.xlu1 %1921 }
 0x21e   : > { %v4742_v41 = vpop.f32.mrb[40].mxu1  ;;  %2889 = vst.msk [vmem:[#allocation3 + $0x48] sm:$0xff] %vm2879_vm5, %v6203_v3  ;;  %2890 = vst.msk [vmem:[#allocation3 + $0x50] sm:$0xff] %vm2879_vm5, %v6203_v3 }
 0x21f   : > { %6197 = vst [vmem:[#allocation23_spill] sm:$0xff] %v4742_v41  ;;  %v4748_v44 = vpop.f32.mrb[41].mxu1  ;;  %2891 = vst.msk [vmem:[#allocation3 + $0x58] sm:$0xff] %vm2879_vm5, %v6203_v3  ;;  %v2942_v46 = vld [vmem:[#allocation3] sm:$0xff] }
 0x220   : > { %1943 = vrot.lane.b32.xlu0 %v4630_v15, %s3990_s11  ;;  %2416 = vrot.lane.b32.xlu1 %v4624_v11, %s3994_s17  ;;  %2892 = vst.msk [vmem:[#allocation3 + $0x60] sm:$0xff] %vm2879_vm5, %v6203_v3  ;;  %2893 = vst.msk [vmem:[#allocation3 + $0x68] sm:$0xff] %vm2879_vm5, %v6203_v3 }
 0x221   : > { %2894 = vst.msk [vmem:[#allocation3 + $0x70] sm:$0xff] %vm2879_vm5, %v6203_v3  ;;  %2895 = vst.msk [vmem:[#allocation3 + $0x78] sm:$0xff] %vm2879_vm5, %v6203_v3  ;;  %3909 = vmatprep.mubr.msk.f32.mxu0 %vm2879_vm5, %v2942_v46  ;;  %v4941_v46 = vpop.permute.xlu0 %1736 }
 0x222   : > { %v4756_v62 = vpop.f32.mrb[42].mxu1  ;;  %2896 = vst.msk [vmem:[#allocation3 + $0x80] sm:$0xff] %vm2879_vm5, %v6203_v3  ;;  %2897 = vst.msk [vmem:[#allocation3 + $0x88] sm:$0xff] %vm2879_vm5, %v6203_v3 }
 0x223   : > { %v4768_v9 = vpop.f32.mrb[43].mxu1  ;;  %2898 = vst.msk [vmem:[#allocation3 + $0x90] sm:$0xff] %vm2879_vm5, %v6203_v3  ;;  %2899 = vst.msk [vmem:[#allocation3 + $0x98] sm:$0xff] %vm2879_vm5, %v6203_v3 }
 0x224   : > { %6198 = vst [vmem:[#allocation24_spill] sm:$0xff] %v4768_v9  ;;  %2900 = vst.msk [vmem:[#allocation3 + $0xa0] sm:$0xff] %vm2879_vm5, %v6203_v3  ;;  %2542 = vrot.lane.b32.xlu0 %v4627_v14, %s3995_s18  ;;  %2306 = vrot.lane.b32.xlu1 %v4630_v15, %s3993_s16 }
 0x225   : > { %2901 = vst.msk [vmem:[#allocation3 + $0xa8] sm:$0xff] %vm2879_vm5, %v6203_v3  ;;  %2902 = vst.msk [vmem:[#allocation3 + $0xb0] sm:$0xff] %vm2879_vm5, %v6203_v3 }
 0x226   : > { %v4778_v57 = vpop.f32.mrb[44].mxu1  ;;  %2903 = vst.msk [vmem:[#allocation3 + $0xb8] sm:$0xff] %vm2879_vm5, %v6203_v3  ;;  %2904 = vst.msk [vmem:[#allocation3 + $0xc0] sm:$0xff] %vm2879_vm5, %v6203_v3 }
 0x227   : > { %6199 = vst [vmem:[#allocation25_spill] sm:$0xff] %v4778_v57  ;;  %v4784_v63 = vpop.f32.mrb[45].mxu1  ;;  %2905 = vst.msk [vmem:[#allocation3 + $0xc8] sm:$0xff] %vm2879_vm5, %v6203_v3 }
 0x228   : > { %6200 = vst [vmem:[#allocation26_spill] sm:$0xff] %v4784_v63  ;;  %2906 = vst.msk [vmem:[#allocation3 + $0xd0] sm:$0xff] %vm2879_vm5, %v6203_v3  ;;  %2669 = vrot.lane.b32.xlu0 %v4630_v15, %s3996_s21  ;;  %1762 = vrot.lane.b32.xlu1 %v4636_v22, %s3989_s30 }
 0x229   : > { %2907 = vst.msk [vmem:[#allocation3 + $0xd8] sm:$0xff] %vm2879_vm5, %v6203_v3  ;;  %2908 = vst.msk [vmem:[#allocation3 + $0xe0] sm:$0xff] %vm2879_vm5, %v6203_v3 }
 0x22a   : > { %v4786_v55 = vpop.f32.mrb[46].mxu1  ;;  %2909 = vst.msk [vmem:[#allocation3 + $0xe8] sm:$0xff] %vm2879_vm5, %v6203_v3  ;;  %2910 = vst.msk [vmem:[#allocation3 + $0xf0] sm:$0xff] %vm2879_vm5, %v6203_v3 }
 0x22b   : > { %v4796_v1 = vpop.f32.mrb[47].mxu1  ;;  %2911 = vst.msk [vmem:[#allocation3 + $0xf8] sm:$0xff] %vm2879_vm5, %v6203_v3 }
 0x22c   : > { %2179 = vrot.lane.b32.xlu0 %v4627_v14, %s3992_s15  ;;  %1945 = vrot.lane.b32.xlu1 %v4639_v24, %s3990_s11  ;;  %v4955_v14 = vpop.permute.xlu1 %1740 }
 0x22e   : > { %v4811_v60 = vpop.f32.mrb[48].mxu1 }
 0x22f   : > { %v4818_v2 = vpop.f32.mrb[49].mxu1 }
 0x230   : > { %2053 = vrot.lane.b32.xlu0 %v4624_v11, %s3991_s12  ;;  %2544 = vrot.lane.b32.xlu1 %v4636_v22, %s3995_s18 }
 0x232   : > { %v4820_v49 = vpop.f32.mrb[50].mxu1 }
 0x233   : > { %v4826_v47 = vpop.f32.mrb[51].mxu1  ;;  %v6136_v42 = vrot.slane %v4820_v49, 3  ;;  %v6206_v12 = vrot.slane %v4820_v49, 6 }
 0x234   : > { %2308 = vrot.lane.b32.xlu0 %v4639_v24, %s3993_s16  ;;  %2671 = vrot.lane.b32.xlu1 %v4639_v24, %s3996_s21 }
 0x236   : > { %v4894_v10 = vpop.f32.mrb[52].mxu1 }
 0x237   : > { %6204 = vst [vmem:[#allocation29_spill] sm:$0xff] %v4894_v10  ;;  %v1546_v4 = vpop.f32.mrb[53].mxu1  ;;  %v2527_v43 = vrot.slane %v4894_v10, 3  ;;  %v2654_v3 = vrot.slane %v4894_v10, 6 }
 0x238   : > { %v2165_v5 = vrot.slane %v1546_v4, 3  ;;  %v2292_v40 = vrot.slane %v1546_v4, 6  ;;  %2181 = vrot.lane.b32.xlu1 %v4636_v22, %s3992_s15  ;;  %2418 = vrot.lane.b32.xlu0 %v4646_v29, %s3994_s17 }
 0x23a   : > { %v3897_v19 = vpop.f32.mrb[54].mxu1  ;;  %v4908_v31 = vsel %vm1665_vm3, %v6136_v42, %v2165_v5  ;;  %v4913_v16 = vsel %vm1848_vm4, %v6206_v12, %v2292_v40  ;;  %v2943_v12 = vld [vmem:[#allocation3 + $0x8] sm:$0xff] }
 0x23b   : > { %6205 = vst [vmem:[#allocation30_spill] sm:$0xff] %v4908_v31  ;;  %6207 = vst [vmem:[#allocation31_spill] sm:$0xff] %v4913_v16  ;;  %v2530_v4 = vrot.slane %v3897_v19, 3  ;;  %v2657_v10 = vrot.slane %v3897_v19, 6  ;;  %v4919_v0 = vpop.f32.mrb[55].mxu1  ;;  %3910 = vmatmul.mubr.msk.f32.vlgmr.msra.gmra.mrb[30].mxu0 %vm2879_vm5, %v2943_v12 }
 0x23c   : > { %6208 = vst [vmem:[#allocation32_spill] sm:$0xff] %v4919_v0  ;;  %v2528_v5 = vrot.slane %v4919_v0, 3  ;;  %v2655_v42 = vrot.slane %v4919_v0, 6  ;;  %2055 = vrot.lane.b32.xlu1 %v4646_v29, %s3991_s12  ;;  %1764 = vrot.lane.b32.xlu0 %v4651_v33, %s3989_s30  ;;  %v1912_v29 = vrot.slane %v4748_v44, 6  ;;  %v1726_v0 = vrot.slane %v4740_v32, 3 }
 0x23e   : > { %v4926_v40 = vsel %vm1665_vm3, %v2528_v5, %v2530_v4  ;;  %v4929_v15 = vsel %vm1848_vm4, %v2655_v42, %v2657_v10  ;;  %v4932_v19 = vsel %vm1665_vm3, %v2527_v43, %v2528_v5  ;;  %v4935_v16 = vsel %vm1848_vm4, %v2654_v3, %v2655_v42  ;;  %v4949_v43 = vpop.permute.xlu0 %1919  ;;  %v4963_v10 = vpop.permute.xlu1 %1742 }
 0x23f   : > { %6209 = vst [vmem:[#allocation33_spill] sm:$0xff] %v4926_v40  ;;  %6210 = vst [vmem:[#allocation34_spill] sm:$0xff] %v4929_v15  ;;  %v1910_v15 = vrot.slane %v4738_v56, 6  ;;  %v1727_v40 = vrot.slane %v4738_v56, 3 }
 0x240   : > { %6211 = vst [vmem:[#allocation35_spill] sm:$0xff] %v4932_v19  ;;  %6212 = vst [vmem:[#allocation36_spill] sm:$0xff] %v4935_v16  ;;  %1766 = vrot.lane.b32.xlu1 %v4654_v34, %s3989_s30  ;;  %1947 = vrot.lane.b32.xlu0 %v4657_v35, %s3990_s11  ;;  %v1729_v16 = vrot.slane %v4748_v44, 3  ;;  %v1909_v19 = vrot.slane %v4740_v32, 6 }
 0x241   : > { %v5023_v32 = vsel %vm1848_vm4, %v1910_v15, %v1912_v29 }
 0x242   : > { %v4961_v42 = vpop.permute.xlu0 %1738  ;;  %v4975_v22 = vpop.permute.xlu1 %1925  ;;  %v5020_v44 = vsel %vm1665_vm3, %v1727_v40, %v1729_v16  ;;  %6218 = vst [vmem:[#allocation42_spill] sm:$0xff] %v5023_v32 }
 0x243   : > { %6217 = vst [vmem:[#allocation41_spill] sm:$0xff] %v5020_v44 }
 0x244   : > { %1949 = vrot.lane.b32.xlu1 %v4660_v36, %s3990_s11  ;;  %2546 = vrot.lane.b32.xlu0 %v4651_v33, %s3995_s18 }
 0x246   : > { %v4969_v3 = vpop.permute.xlu0 %1923  ;;  %v4985_v5 = vpop.permute.xlu1 %1746 }
 0x247   : > { %6214 = vst [vmem:[#allocation38_spill] sm:$0xff] %v4985_v5  ;;  %v5010_v5 = vsel %vm1848_vm4, %v1909_v19, %v1910_v15  ;;  %v1732_v15 = vrot.slane %v4768_v9, 3  ;;  %v1914_v19 = vrot.slane %v4742_v41, 6 }
 0x248   : > { %2548 = vrot.lane.b32.xlu1 %v4654_v34, %s3995_s18  ;;  %2673 = vrot.lane.b32.xlu0 %v4657_v35, %s3996_s21 }
 0x24a   : > { %v4977_v24 = vpop.permute.xlu0 %1744  ;;  %v4993_v11 = vpop.permute.xlu1 %1929 }
 0x24b   : > { %6215 = vst [vmem:[#allocation39_spill] sm:$0xff] %v4993_v11 }
 0x24c   : > { %2675 = vrot.lane.b32.xlu1 %v4660_v36, %s3996_s21  ;;  %2422 = vrot.lane.b32.xlu0 %v4662_v37, %s3994_s17 }
 0x24e   : > { %v4983_v4 = vpop.permute.xlu0 %1927  ;;  %v5005_v31 = vpop.permute.xlu1 %2039 }
 0x24f   : > { %6213 = vst [vmem:[#allocation37_spill] sm:$0xff] %v4983_v4  ;;  %v5013_v4 = vsel %vm1665_vm3, %v1726_v0, %v1727_v40  ;;  %v1917_v40 = vrot.slane %v4756_v62, 6 }
 0x250   : > { %2185 = vrot.lane.b32.xlu1 %v4654_v34, %s3992_s15  ;;  %2183 = vrot.lane.b32.xlu0 %v4651_v33, %s3992_s15  ;;  %v1734_v33 = vrot.slane %v4756_v62, 3 }
 0x252   : > { %v4991_v12 = vpop.permute.xlu0 %2037  ;;  %v5025_v56 = vpop.permute.xlu1 %1750 }
 0x253   : > { %6219 = vst [vmem:[#allocation43_spill] sm:$0xff] %v5025_v56 }
 0x254   : > { %2310 = vrot.lane.b32.xlu1 %v4657_v35, %s3993_s16  ;;  %2312 = vrot.lane.b32.xlu0 %v4660_v36, %s3993_s16 }
 0x256   : > { %v5007_v11 = vpop.permute.xlu0 %1748  ;;  %v5033_v0 = vpop.permute.xlu1 %1933 }
 0x257   : > { %6216 = vst [vmem:[#allocation40_spill] sm:$0xff] %v5007_v11  ;;  %6221 = vst [vmem:[#allocation45_spill] sm:$0xff] %v5033_v0 }
 0x258   : > { %2059 = vrot.lane.b32.xlu1 %v4662_v37, %s3991_s12  ;;  %2057 = vrot.lane.b32.xlu0 %v4668_v38, %s3991_s12  ;;  %v1915_v37 = vrot.slane %v4768_v9, 6  ;;  %v2155_v9 = vrot.slane %v4796_v1, 3 }
 0x25a   : > { %v5027_v11 = vpop.permute.xlu0 %1931  ;;  %v5041_v16 = vpop.permute.xlu1 %2169  ;;  %v5071_v0 = vsel %vm1848_vm4, %v1914_v19, %v1915_v37  ;;  %v5074_v56 = vsel %vm1848_vm4, %v1915_v37, %v1917_v40 }
 0x25b   : > { %6220 = vst [vmem:[#allocation44_spill] sm:$0xff] %v5027_v11  ;;  %v5064_v11 = vsel %vm1665_vm3, %v1732_v15, %v1734_v33  ;;  %6224 = vst [vmem:[#allocation48_spill] sm:$0xff] %v5071_v0  ;;  %v2279_v0 = vrot.slane %v4784_v63, 6 }
 0x25c   : > { %2420 = vrot.lane.b32.xlu1 %v4668_v38, %s3994_s17  ;;  %1768 = vrot.lane.b32.xlu0 %v4677_v53, %s3989_s30  ;;  %v1731_v38 = vrot.slane %v4742_v41, 3  ;;  %6222 = vst [vmem:[#allocation46_spill] sm:$0xff] %v5064_v11  ;;  %6225 = vst [vmem:[#allocation49_spill] sm:$0xff] %v5074_v56  ;;  %v2152_v56 = vrot.slane %v4784_v63, 3 }
 0x25e   : > { %v5035_v34 = vpop.permute.xlu0 %2167  ;;  %v5050_v35 = vpop.permute.xlu1 %2294  ;;  %v5077_v44 = vsel %vm1665_vm3, %v1731_v38, %v1732_v15 }
 0x25f   : > { %6226 = vst [vmem:[#allocation50_spill] sm:$0xff] %v5077_v44  ;;  %v2153_v44 = vrot.slane %v4778_v57, 3 }
 0x260   : > { %2550 = vrot.lane.b32.xlu0 %v4677_v53, %s3995_s18  ;;  %2424 = vrot.lane.b32.xlu1 %v4674_v52, %s3994_s17 }
 0x261   : > { %v5182_v63 = vsel %vm1665_vm3, %v2152_v56, %v2153_v44 }
 0x262   : > { %v5043_v29 = vpop.permute.xlu0 %2043  ;;  %v5066_v32 = vpop.permute.xlu1 %2296 }
 0x264   : > { %2677 = vrot.lane.b32.xlu0 %v4680_v39, %s3996_s21  ;;  %2314 = vrot.lane.b32.xlu1 %v4680_v39, %s3993_s16 }
 0x266   : > { %v5052_v36 = vpop.permute.xlu0 %2041  ;;  %v5083_v33 = vpop.permute.xlu1 %2298 }
 0x268   : > { %2187 = vrot.lane.b32.xlu0 %v4677_v53, %s3992_s15  ;;  %1770 = vrot.lane.b32.xlu1 %v4687_v58, %s3989_s30 }
 0x26a   : > { %v5068_v62 = vpop.permute.xlu0 %1752  ;;  %v5093_v38 = vpop.permute.xlu1 %1754 }
 0x26b   : > { %6223 = vst [vmem:[#allocation47_spill] sm:$0xff] %v5068_v62  ;;  %6228 = vst [vmem:[#allocation52_spill] sm:$0xff] %v5093_v38  ;;  %v1820_v62 = vadd.f32 %v4941_v46, %v4378_v13 }
 0x26c   : > { %2061 = vrot.lane.b32.xlu0 %v4674_v52, %s3991_s12  ;;  %2552 = vrot.lane.b32.xlu1 %v4687_v58, %s3995_s18 }
 0x26d   : > { %v2003_v46 = vadd.f32 %v4949_v43, %v1820_v62 }
 0x26e   : > { %v5085_v11 = vpop.permute.xlu0 %1935  ;;  %v5101_v15 = vpop.permute.xlu1 %1937 }
 0x26f   : > { %6227 = vst [vmem:[#allocation51_spill] sm:$0xff] %v5085_v11  ;;  %6229 = vst [vmem:[#allocation53_spill] sm:$0xff] %v5101_v15 }
 0x270   : > { %1951 = vrot.lane.b32.xlu0 %v4680_v39, %s3990_s11  ;;  %2679 = vrot.lane.b32.xlu1 %v4690_v59, %s3996_s21 }
 0x272   : > { %v5091_v37 = vpop.permute.xlu0 %2171  ;;  %v5109_v19 = vpop.permute.xlu1 %2047 }
 0x274   : > { %2316 = vrot.lane.b32.xlu0 %v4690_v59, %s3993_s16  ;;  %2189 = vrot.lane.b32.xlu1 %v4687_v58, %s3992_s15 }
 0x276   : > { %v5099_v40 = vpop.permute.xlu0 %2045  ;;  %v5117_v11 = vpop.permute.xlu1 %1758 }
 0x277   : > { %6230 = vst [vmem:[#allocation54_spill] sm:$0xff] %v5117_v11 }
 0x278   : > { %1953 = vrot.lane.b32.xlu0 %v4690_v59, %s3990_s11  ;;  %2063 = vrot.lane.b32.xlu1 %v4698_v8, %s3991_s12 }
 0x27a   : > { %v5107_v53 = vpop.permute.xlu0 %2173  ;;  %v5123_v39 = vpop.permute.xlu1 %1941 }
 0x27b   : > { %6231 = vst [vmem:[#allocation55_spill] sm:$0xff] %v5123_v39 }
 0x27c   : > { %2426 = vrot.lane.b32.xlu0 %v4698_v8, %s3994_s17  ;;  %1774 = vrot.lane.b32.xlu1 %v4703_v17, %s3989_s30 }
 0x27e   : > { %v5115_v52 = vpop.permute.xlu0 %2300  ;;  %v5133_v38 = vpop.permute.xlu1 %2414 }
 0x280   : > { %2556 = vrot.lane.b32.xlu1 %v4703_v17, %s3995_s18  ;;  %1772 = vrot.lane.b32.xlu0 %v4706_v18, %s3989_s30 }
 0x282   : > { %v5125_v15 = vpop.permute.xlu0 %1756  ;;  %v5141_v39 = vpop.permute.xlu1 %2177 }
 0x283   : > { %6232 = vst [vmem:[#allocation56_spill] sm:$0xff] %v5125_v15 }
 0x284   : > { %2683 = vrot.lane.b32.xlu1 %v4709_v20, %s3996_s21  ;;  %2554 = vrot.lane.b32.xlu0 %v4706_v18, %s3995_s18 }
 0x286   : > { %v5131_v58 = vpop.permute.xlu0 %1939 }
 0x287   : > { %6233 = vst [vmem:[#allocation57_spill] sm:$0xff] %v5131_v58  ;;  %v5149_v58 = vpop.permute.xlu1 %2302 }
 0x288   : > { %2193 = vrot.lane.b32.xlu1 %v4703_v17, %s3992_s15  ;;  %2681 = vrot.lane.b32.xlu0 %v4712_v48, %s3996_s21  ;;  %v2280_v17 = vrot.slane %v4778_v57, 6 }
 0x28a   : > { %v5139_v59 = vpop.permute.xlu0 %2175  ;;  %v5179_v57 = vsel %vm1848_vm4, %v2279_v0, %v2280_v17 }
 0x28b   : > { %v5155_v15 = vpop.permute.xlu1 %2051 }
 0x28c   : > { %6234 = vst [vmem:[#allocation58_spill] sm:$0xff] %v5155_v15  ;;  %2318 = vrot.lane.b32.xlu1 %v4712_v48, %s3993_s16  ;;  %2430 = vrot.lane.b32.xlu0 %v4722_v21, %s3994_s17  ;;  %v5185_v15 = vsel %vm1665_vm3, %v2153_v44, %v2155_v9 }
 0x28e   : > { %v5147_v8 = vpop.permute.xlu0 %2304 }
 0x28f   : > { %v2413_v41 = vpop.permute.xlu1 %2412 }
 0x290   : > { %2067 = vrot.lane.b32.xlu1 %v4722_v21, %s3991_s12  ;;  %2191 = vrot.lane.b32.xlu0 %v4706_v18, %s3992_s15 }
 0x292   : > { %v5157_v11 = vpop.permute.xlu0 %2049 }
 0x293   : > { %6235 = vst [vmem:[#allocation59_spill] sm:$0xff] %v5157_v11  ;;  %v2282_v11 = vrot.slane %v4796_v1, 6  ;;  %v2121_v1 = vadd.f32 %v4991_v12, %v2003_v46  ;;  %v5193_v62 = vpop.permute.xlu1 %2416 }
 0x294   : > { %2320 = vrot.lane.b32.xlu0 %v4709_v20, %s3993_s16  ;;  %2428 = vrot.lane.b32.xlu1 %v4724_v25, %s3994_s17 }
 0x295   : > { %v2251_v18 = vadd.f32 %v5035_v34, %v2121_v1  ;;  %v5212_v34 = vld [vmem:[%s6115_s5] ss:$0 sm:$0xff] }
 0x296   : > { %v5171_v13 = vpop.permute.xlu0 %1760 }
 0x297   : > { %6236 = vst [vmem:[#allocation60_spill] sm:$0xff] %v5171_v13  ;;  %v5189_v13 = vsel %vm1848_vm4, %v2280_v17, %v2282_v11  ;;  %v2378_v56 = vadd.f32 %v5050_v35, %v2251_v18  ;;  %v5201_v44 = vpop.permute.xlu1 %2306  ;;  %v1821_v11 = vadd.f32 %v4374_v7, %v4961_v42  ;;  %v5220_v7 = vld [vmem:[%s6116_s6] ss:$0 sm:$0xff]  ;;  %v2284_v42 = vrot.slane %v4786_v55, 6 }
 0x298   : > { %1955 = vrot.lane.b32.xlu0 %v4712_v48, %s3990_s11  ;;  %2432 = vrot.lane.b32.xlu1 %v4730_v26, %s3994_s17  ;;  %v2160_v18 = vrot.slane %v4811_v60, 3 }
 0x299   : > { %v2496_v12 = vadd.f32 %v2413_v41, %v2378_v56  ;;  %v2004_v46 = vadd.f32 %v4943_v61, %v1821_v11  ;;  %v2157_v41 = vrot.slane %v4786_v55, 3  ;;  %v2287_v56 = vrot.slane %v4811_v60, 6 }
 0x29a   : > { %v5191_v43 = vpop.permute.xlu0 %1943  ;;  %v2285_v11 = vrot.slane %v4818_v2, 6 }
 0x29b   : > { %v5214_v17 = vpop.permute.xlu1 %1762  ;;  %v2122_v48 = vadd.f32 %v5005_v31, %v2004_v46 }
 0x29c   : > { %6237 = vst [vmem:[#allocation61_spill] sm:$0xff] %v5214_v17  ;;  %1957 = vrot.lane.b32.xlu0 %v4709_v20, %s3990_s11  ;;  %2195 = vrot.lane.b32.xlu1 %v4759_v50, %s3992_s15 }
 0x29d   : > { %v2252_v31 = vadd.f32 %v5041_v16, %v2122_v48  ;;  %v5257_v48 = vsel %vm1848_vm4, %v2285_v11, %v2287_v56 }
 0x29e   : > { %v2543_v9 = vpop.permute.xlu0 %2542 }
 0x29f   : > { %v2626_v0 = vadd.f32 %v2543_v9, %v2496_v12  ;;  %v2158_v9 = vrot.slane %v4818_v2, 3  ;;  %v5236_v12 = vpop.permute.xlu1 %1945  ;;  %v2379_v60 = vadd.f32 %v5066_v32, %v2252_v31 }
 0x2a0   : > { %6238 = vst [vmem:[#allocation62_spill] sm:$0xff] %v5236_v12  ;;  %2065 = vrot.lane.b32.xlu0 %v4724_v25, %s3991_s12  ;;  %2322 = vrot.lane.b32.xlu1 %v4771_v27, %s3993_s16  ;;  %v5251_v12 = vsel %vm1848_vm4, %v2284_v42, %v2285_v11  ;;  %v6264_v25 = vld [vmem:[#allocation40_spill] sm:$0xff] }
 0x2a1   : > { %v5248_v17 = vsel %vm1665_vm3, %v2158_v9, %v2160_v18  ;;  %v5254_v16 = vsel %vm1665_vm3, %v2157_v41, %v2158_v9 }
 0x2a2   : > { %v2670_v35 = vpop.permute.xlu0 %2669 }
 0x2a3   : > { %v2753_v1 = vadd.f32 %v2670_v35, %v2626_v0 }
 0x2a4   : > { %1776 = vrot.lane.b32.xlu0 %v4759_v50, %s3989_s30  ;;  %1778 = vrot.lane.b32.xlu1 %v4762_v6, %s3989_s30 }
 0x2a5   : > { %v2788_v61 = vmul.f32 %v5212_v34, %v2753_v1  ;;  %v2545_v1 = vpop.permute.xlu1 %2544 }
 0x2a6   : > { %v5234_v20 = vpop.permute.xlu0 %2179 }
 0x2a7   : > { %v2823_v0 = vadd.f32 %v5220_v7, %v2788_v61  ;;  %v2497_v61 = vadd.f32 %v5133_v38, %v2379_v60  ;;  %v1822_v38 = vadd.f32 %v4390_v23, %v4955_v14 }
 0x2a8   : > { %2558 = vrot.lane.b32.xlu0 %v4759_v50, %s3995_s18  ;;  %2560 = vrot.lane.b32.xlu1 %v4762_v6, %s3995_s18 }
 0x2a9   : > { %v2851_v35 = vmax.f32 %v2823_v0, 0.0  ;;  %v2627_v32 = vadd.f32 %v2545_v1, %v2497_v61  ;;  %v2672_v42 = vpop.permute.xlu1 %2671  ;;  %v2005_v50 = vadd.f32 %v4969_v3, %v1822_v38 }
 0x2aa   : > { %v5245_v46 = vpop.permute.xlu0 %2053 }
 0x2ab   : > { %2913 = vst.msk [vmem:[#allocation3 + $0x11] sm:$0xff] %vm2879_vm5, %v2851_v35  ;;  %v2754_v31 = vadd.f32 %v2672_v42, %v2627_v32  ;;  %v1823_v35 = vadd.f32 %v4963_v10, %v4407_v51  ;;  %v2123_v1 = vadd.f32 %v5052_v36, %v2005_v50 }
 0x2ac   : > { %2685 = vrot.lane.b32.xlu0 %v4771_v27, %s3996_s21  ;;  %2687 = vrot.lane.b32.xlu1 %v4774_v45, %s3996_s21 }
 0x2ad   : > { %v2789_v41 = vmul.f32 %v5212_v34, %v2754_v31  ;;  %v5274_v56 = vpop.permute.xlu1 %2181  ;;  %v2253_v3 = vadd.f32 %v5091_v37, %v2123_v1  ;;  %v2006_v42 = vadd.f32 %v4975_v22, %v1823_v35 }
 0x2ae   : > { %v5265_v18 = vpop.permute.xlu0 %2308 }
 0x2af   : > { %v2824_v0 = vadd.f32 %v5220_v7, %v2789_v41  ;;  %v2124_v51 = vadd.f32 %v5043_v29, %v2006_v42  ;;  %v2380_v10 = vadd.f32 %v5083_v33, %v2253_v3  ;;  %v6244_v3 = vrot.slane %v4820_v49, 6 }
 0x2b0   : > { %2069 = vrot.lane.b32.xlu0 %v4730_v26, %s3991_s12  ;;  %2197 = vrot.lane.b32.xlu1 %v4762_v6, %s3992_s15 }
 0x2b1   : > { %v2852_v23 = vmax.f32 %v2824_v0, 0.0  ;;  %v5283_v14 = vpop.permute.xlu1 %2055  ;;  %v2254_v31 = vadd.f32 %v5107_v53, %v2124_v51  ;;  %v2498_v38 = vadd.f32 %v5193_v62, %v2380_v10  ;;  %v2162_v0 = vrot.slane %v4826_v47, 3 }
 0x2b2   : > { %v2419_v9 = vpop.permute.xlu0 %2418  ;;  %v2944_v11 = vld [vmem:[#allocation3 + $0x10] sm:$0xff]  ;;  %v2289_v53 = vrot.slane %v4826_v47, 6 }
 0x2b3   : > { %3912 = vmatprep.mubr.msk.f32.mxu0 %vm2879_vm5, %v2944_v11  ;;  %2915 = vst.msk [vmem:[#allocation3 + $0x19] sm:$0x3f] %vm2914_vm6, %v2852_v23 }
 0x2b4   : > { %1959 = vrot.lane.b32.xlu0 %v4771_v27, %s3990_s11  ;;  %2071 = vrot.lane.b32.xlu1 %v4732_v30, %s3991_s12  ;;  %v2381_v27 = vadd.f32 %v5115_v52, %v2254_v31  ;;  %v5339_v42 = vsel %vm1848_vm4, %v2289_v53, %v6244_v3 }
 0x2b5   : > { %v5296_v61 = vpop.permute.xlu1 %1766 }
 0x2b6   : > { %v5285_v60 = vpop.permute.xlu0 %1764  ;;  %6240 = vst [vmem:[#allocation64_spill] sm:$0xff] %v5296_v61  ;;  %v2499_v41 = vadd.f32 %v2419_v9, %v2381_v27  ;;  %v6246_v27 = vld [vmem:[#allocation28_spill] sm:$0xff] }
 0x2b7   : > { %6239 = vst [vmem:[#allocation63_spill] sm:$0xff] %v5285_v60 }
 0x2b8   : > { %2324 = vrot.lane.b32.xlu0 %v4774_v45, %s3993_s16  ;;  %1782 = vrot.lane.b32.xlu1 %v4799_v28, %s3989_s30 }
 0x2b9   : > { %v5307_v36 = vpop.permute.xlu1 %1949 }
 0x2ba   : > { %v5298_v32 = vpop.permute.xlu0 %1947  ;;  %6242 = vst [vmem:[#allocation66_spill] sm:$0xff] %v5307_v36  ;;  %v2945_v37 = vld [vmem:[#allocation3 + $0x18] sm:$0xff] }
 0x2bb   : > { %6241 = vst [vmem:[#allocation65_spill] sm:$0xff] %v5298_v32  ;;  %3913 = vmatmul.mubr.msk.f32.gmra.mrb[32].mxu0 %vm2879_vm5, %v2945_v37 }
 0x2bc   : > { %1961 = vrot.lane.b32.xlu0 %v4774_v45, %s3990_s11  ;;  %2564 = vrot.lane.b32.xlu1 %v4799_v28, %s3995_s18  ;;  %v6243_v45 = vrot.slane %v4820_v49, 3 }
 0x2bd   : > { %v2549_v29 = vpop.permute.xlu1 %2548 }
 0x2be   : > { %v2547_v6 = vpop.permute.xlu0 %2546  ;;  %v2629_v62 = vadd.f32 %v2549_v29, %v2499_v41  ;;  %v5334_v1 = vsel %vm1665_vm3, %v2162_v0, %v6243_v45  ;;  %v6247_v41 = vld [vmem:[#allocation5_spill] sm:$0xff] }
 0x2bf   : > { %v2628_v22 = vadd.f32 %v2547_v6, %v2498_v38  ;;  %v6245_v38 = vld [vmem:[#allocation27_spill] sm:$0xff] }
 0x2c0   : > { %2434 = vrot.lane.b32.xlu0 %v4732_v30, %s3994_s17  ;;  %2689 = vrot.lane.b32.xlu1 %v4802_v54, %s3996_s21 }
 0x2c1   : > { %v2676_v23 = vpop.permute.xlu1 %2675 }
 0x2c2   : > { %v2674_v33 = vpop.permute.xlu0 %2673  ;;  %v2756_v9 = vadd.f32 %v2676_v23, %v2629_v62 }
 0x2c3   : > { %v2755_v11 = vadd.f32 %v2674_v33, %v2628_v22 }
 0x2c4   : > { %v2791_v10 = vmul.f32 %v5212_v34, %v2756_v9  ;;  %2691 = vrot.lane.b32.xlu1 %v6245_v38, %s3996_s21  ;;  %1780 = vrot.lane.b32.xlu0 %v6246_v27, %s3989_s30 }
 0x2c5   : > { %v2790_v50 = vmul.f32 %v5212_v34, %v2755_v11  ;;  %v5342_v6 = vpop.permute.xlu1 %2185  ;;  %v1824_v11 = vadd.f32 %v4977_v24, %v6247_v41 }
 0x2c6   : > { %v5324_v52 = vpop.permute.xlu0 %2422  ;;  %v2826_v31 = vadd.f32 %v5220_v7, %v2791_v10 }
 0x2c7   : > { %v2825_v35 = vadd.f32 %v5220_v7, %v2790_v50  ;;  %v6248_v50 = vld [vmem:[#allocation37_spill] sm:$0xff] }
 0x2c8   : > { %v2854_v22 = vmax.f32 %v2826_v31, 0.0  ;;  %2199 = vrot.lane.b32.xlu1 %v6246_v27, %s3992_s15  ;;  %2562 = vrot.lane.b32.xlu0 %v6246_v27, %s3995_s18  ;;  %v2007_v23 = vadd.f32 %v6248_v50, %v1824_v11  ;;  %v6251_v27 = vld [vmem:[#allocation4_spill] sm:$0xff]  ;;  %v6252_v50 = vld [vmem:[#allocation39_spill] sm:$0xff] }
 0x2c9   : > { %v2853_v51 = vmax.f32 %v2825_v35, 0.0  ;;  %v5352_v29 = vpop.permute.xlu1 %2310  ;;  %v6249_v35 = vld [vmem:[#allocation21_spill] sm:$0xff] }
 0x2ca   : > { %v5344_v37 = vpop.permute.xlu0 %2183  ;;  %2917 = vst.msk [vmem:[#allocation3 + $0x29] sm:$0x3f] %vm2914_vm6, %v2854_v22  ;;  %v2125_v9 = vadd.f32 %v5099_v40, %v2007_v23 }
 0x2cb   : > { %2916 = vst.msk [vmem:[#allocation3 + $0x21] sm:$0xff] %vm2879_vm5, %v2853_v51 }
 0x2cc   : > { %2201 = vrot.lane.b32.xlu1 %v4799_v28, %s3992_s15  ;;  %2438 = vrot.lane.b32.xlu0 %v6249_v35, %s3994_s17  ;;  %v2255_v51 = vadd.f32 %v5139_v59, %v2125_v9  ;;  %v6250_v59 = vld [vmem:[#allocation38_spill] sm:$0xff] }
 0x2cd   : > { %v5363_v0 = vpop.permute.xlu1 %2059  ;;  %v1825_v22 = vadd.f32 %v6251_v27, %v6250_v59 }
 0x2ce   : > { %v5354_v33 = vpop.permute.xlu0 %2312  ;;  %v2382_v28 = vadd.f32 %v5149_v58, %v2255_v51 }
 0x2cf   : > { %v2008_v23 = vadd.f32 %v6252_v50, %v1825_v22 }
 0x2d0   : > { %2326 = vrot.lane.b32.xlu1 %v4802_v54, %s3993_s16  ;;  %2328 = vrot.lane.b32.xlu0 %v6245_v38, %s3993_s16 }
 0x2d1   : > { %v2421_v45 = vpop.permute.xlu1 %2420  ;;  %v2126_v9 = vadd.f32 %v5109_v19, %v2008_v23 }
 0x2d2   : > { %v5365_v53 = vpop.permute.xlu0 %2057  ;;  %v2946_v62 = vld [vmem:[#allocation3 + $0x20] sm:$0xff]  ;;  %v2947_v24 = vld [vmem:[#allocation3 + $0x28] sm:$0xff]  ;;  %v2500_v40 = vadd.f32 %v2421_v45, %v2382_v28 }
 0x2d3   : > { %3915 = vmatprep.mubr.msk.f32.mxu0 %vm2879_vm5, %v2946_v62  ;;  %v2256_v51 = vadd.f32 %v5141_v39, %v2126_v9 }
 0x2d4   : > { %3916 = vmatmul.mubr.msk.f32.gmra.mrb[34].mxu0 %vm2879_vm5, %v2947_v24  ;;  %2075 = vrot.lane.b32.xlu1 %v6249_v35, %s3991_s12  ;;  %v6265_v35 = vld [vmem:[#allocation6_spill] sm:$0xff] }
 0x2d5   : > { %v5383_v31 = vpop.permute.xlu1 %2424  ;;  %1963 = vrot.lane.b32.xlu0 %v4802_v54, %s3990_s11 }
 0x2d6   : > { %v5374_v3 = vpop.permute.xlu0 %1768 }
 0x2d8   : > { %2693 = vrot.lane.b32.xlu1 %v5010_v5, %s3996_s21 }
 0x2d9   : > { %v5391_v62 = vpop.permute.xlu1 %2314  ;;  %1965 = vrot.lane.b32.xlu0 %v6245_v38, %s3990_s11  ;;  %v2383_v38 = vadd.f32 %v5147_v8, %v2256_v51  ;;  %v6255_v8 = vld [vmem:[#allocation41_spill] sm:$0xff]  ;;  %v6258_v51 = vld [vmem:[#allocation7_spill] sm:$0xff] }
 0x2da   : > { %v2551_v10 = vpop.permute.xlu0 %2550 }
 0x2db   : > { %v2630_v41 = vadd.f32 %v2551_v10, %v2500_v40  ;;  %v6253_v10 = vld [vmem:[#allocation22_spill] sm:$0xff]  ;;  %v2501_v27 = vadd.f32 %v5324_v52, %v2383_v38 }
 0x2dc   : > { %2203 = vrot.lane.b32.xlu1 %v5013_v4, %s3992_s15  ;;  %v5425_v52 = vpop.f32.mrb[56].mxu1 }
 0x2dd   : > { %v5402_v24 = vpop.permute.xlu1 %1770  ;;  %2436 = vrot.lane.b32.xlu0 %v6253_v10, %s3994_s17  ;;  %6256 = vst [vmem:[#allocation28_spill] sm:$0xff] %v5425_v52  ;;  %v5428_v23 = vpop.f32.mrb[57].mxu1 }
 0x2de   : > { %v2678_v11 = vpop.permute.xlu0 %2677  ;;  %6257 = vst [vmem:[#allocation5_spill] sm:$0xff] %v5428_v23 }
 0x2df   : > { %v2757_v58 = vadd.f32 %v2678_v11, %v2630_v41 }
 0x2e0   : > { %2330 = vrot.lane.b32.xlu1 %v5010_v5, %s3993_s16 }
 0x2e1   : > { %v2792_v54 = vmul.f32 %v5212_v34, %v2757_v58  ;;  %v2553_v59 = vpop.permute.xlu1 %2552  ;;  %2073 = vrot.lane.b32.xlu0 %v6253_v10, %s3991_s12  ;;  %v1826_v10 = vadd.f32 %v6265_v35, %v6264_v25 }
 0x2e2   : > { %v5400_v45 = vpop.permute.xlu0 %2187  ;;  %v2631_v39 = vadd.f32 %v2553_v59, %v2501_v27  ;;  %v2533_v59 = vrot.slane %v5425_v52, 3  ;;  %v2660_v27 = vrot.slane %v5425_v52, 6 }
 0x2e3   : > { %v2827_v28 = vadd.f32 %v5220_v7, %v2792_v54 }
 0x2e4   : > { %1786 = vrot.lane.b32.xlu1 %v6255_v8, %s3989_s30 }
 0x2e5   : > { %v2855_v40 = vmax.f32 %v2827_v28, 0.0  ;;  %v2680_v41 = vpop.permute.xlu1 %2679  ;;  %1784 = vrot.lane.b32.xlu0 %v5013_v4, %s3989_s30  ;;  %v6259_v28 = vld [vmem:[#allocation43_spill] sm:$0xff] }
 0x2e6   : > { %v5411_v19 = vpop.permute.xlu0 %2061  ;;  %v2758_v11 = vadd.f32 %v2680_v41, %v2631_v39  ;;  %v1827_v38 = vadd.f32 %v6259_v28, %v6258_v51  ;;  %v5440_v39 = vpop.f32.mrb[58].mxu1  ;;  %v2532_v41 = vrot.slane %v5428_v23, 3 }
 0x2e7   : > { %6254 = vst [vmem:[#allocation27_spill] sm:$0xff] %v5411_v19  ;;  %2918 = vst.msk [vmem:[#allocation3 + $0x31] sm:$0xff] %vm2879_vm5, %v2855_v40  ;;  %v1576_v51 = vpop.f32.mrb[59].mxu1 }
 0x2e8   : > { %v2793_v50 = vmul.f32 %v5212_v34, %v2758_v11  ;;  %6260 = vst [vmem:[#allocation37_spill] sm:$0xff] %v5440_v39  ;;  %2568 = vrot.lane.b32.xlu1 %v6255_v8, %s3995_s18  ;;  %v2659_v11 = vrot.slane %v5428_v23, 6  ;;  %v2535_v32 = vrot.slane %v1576_v51, 3  ;;  %v2662_v36 = vrot.slane %v1576_v51, 6  ;;  %v6266_v23 = vld [vmem:[#allocation58_spill] sm:$0xff]  ;;  %v6269_v51 = vld [vmem:[#allocation23_spill] sm:$0xff] }
 0x2e9   : > { %v5432_v9 = vpop.permute.xlu1 %2189  ;;  %2566 = vrot.lane.b32.xlu0 %v5013_v4, %s3995_s18  ;;  %v5454_v61 = vsel %vm1665_vm3, %v2532_v41, %v2533_v59  ;;  %v6270_v41 = vld [vmem:[#allocation42_spill] sm:$0xff] }
 0x2ea   : > { %v5419_v22 = vpop.permute.xlu0 %1951  ;;  %v2828_v40 = vadd.f32 %v5220_v7, %v2793_v50  ;;  %v6261_v50 = vld [vmem:[#allocation45_spill] sm:$0xff]  ;;  %6262 = vst [vmem:[#allocation38_spill] sm:$0xff] %v5454_v61  ;;  %v5457_v4 = vsel %vm1848_vm4, %v2659_v11, %v2660_v27  ;;  %v6271_v11 = vld [vmem:[#allocation44_spill] sm:$0xff] }
 0x2eb   : > { %v2010_v28 = vadd.f32 %v6261_v50, %v1827_v38  ;;  %6263 = vst [vmem:[#allocation4_spill] sm:$0xff] %v5457_v4  ;;  %v5464_v38 = vsel %vm1665_vm3, %v2533_v59, %v2535_v32  ;;  %v2009_v50 = vadd.f32 %v6271_v11, %v1826_v10  ;;  %v2537_v32 = vrot.slane %v5440_v39, 3  ;;  %v3906_v59 = vpop.f32.mrb[60].mxu1  ;;  %v6294_v61 = vld [vmem:[#allocation53_spill] sm:$0xff] }
 0x2ec   : > { %6267 = vst [vmem:[#allocation39_spill] sm:$0xff] %v5464_v38  ;;  %2695 = vrot.lane.b32.xlu1 %v6270_v41, %s3996_s21 }
 0x2ed   : > { %v5451_v52 = vpop.permute.xlu1 %2063  ;;  %v2128_v19 = vadd.f32 %v6266_v23, %v2010_v28  ;;  %2440 = vrot.lane.b32.xlu0 %v6269_v51, %s3994_s17  ;;  %v6272_v28 = vld [vmem:[#allocation59_spill] sm:$0xff] }
 0x2ee   : > { %v5430_v58 = vpop.permute.xlu0 %2316  ;;  %v2948_v54 = vld [vmem:[#allocation3 + $0x30] sm:$0xff] }
 0x2ef   : > { %3918 = vmatprep.mubr.msk.f32.mxu0 %vm2879_vm5, %v2948_v54  ;;  %v2856_v54 = vmax.f32 %v2828_v40, 0.0  ;;  %v5467_v40 = vsel %vm1848_vm4, %v2660_v27, %v2662_v36  ;;  %v2258_v25 = vadd.f32 %v5274_v56, %v2128_v19  ;;  %v2664_v36 = vrot.slane %v5440_v39, 6  ;;  %v5484_v27 = vpop.f32.mrb[61].mxu1  ;;  %v6286_v39 = vld [vmem:[#allocation25_spill] sm:$0xff] }
 0x2f0   : > { %6268 = vst [vmem:[#allocation41_spill] sm:$0xff] %v5467_v40  ;;  %2205 = vrot.lane.b32.xlu1 %v6255_v8, %s3992_s15  ;;  %6273 = vst [vmem:[#allocation7_spill] sm:$0xff] %v5484_v27  ;;  %v2538_v19 = vrot.slane %v5484_v27, 3  ;;  %v2665_v11 = vrot.slane %v5484_v27, 6  ;;  %v2667_v27 = vrot.slane %v3906_v59, 6 }
 0x2f1   : > { %2919 = vst.msk [vmem:[#allocation3 + $0x39] sm:$0x3f] %vm2914_vm6, %v2856_v54  ;;  %v5475_v23 = vpop.permute.xlu1 %1774  ;;  %v2127_v54 = vadd.f32 %v6272_v28, %v2009_v50  ;;  %2077 = vrot.lane.b32.xlu0 %v6269_v51, %s3991_s12  ;;  %v2385_v10 = vadd.f32 %v5265_v18, %v2258_v25 }
 0x2f2   : > { %v5449_v60 = vpop.permute.xlu0 %1953  ;;  %v5494_v51 = vsel %vm1665_vm3, %v2537_v32, %v2538_v19  ;;  %v5497_v8 = vsel %vm1848_vm4, %v2664_v36, %v2665_v11  ;;  %v6277_v36 = vld [vmem:[#allocation46_spill] sm:$0xff] }
 0x2f3   : > { %v2257_v56 = vadd.f32 %v5234_v20, %v2127_v54  ;;  %6274 = vst [vmem:[#allocation43_spill] sm:$0xff] %v5494_v51  ;;  %6275 = vst [vmem:[#allocation45_spill] sm:$0xff] %v5497_v8  ;;  %v6276_v20 = vld [vmem:[#allocation24_spill] sm:$0xff]  ;;  %v2540_v54 = vrot.slane %v3906_v59, 3 }
 0x2f4   : > { %2079 = vrot.lane.b32.xlu1 %v6276_v20, %s3991_s12 }
 0x2f5   : > { %v2557_v50 = vpop.permute.xlu1 %2556  ;;  %1967 = vrot.lane.b32.xlu0 %v5010_v5, %s3990_s11  ;;  %v2384_v18 = vadd.f32 %v5201_v44, %v2257_v56  ;;  %v5511_v51 = vsel %vm1665_vm3, %v2538_v19, %v2540_v54  ;;  %v5514_v44 = vsel %vm1848_vm4, %v2665_v11, %v2667_v27  ;;  %v6280_v11 = vld [vmem:[#allocation48_spill] sm:$0xff] }
 0x2f6   : > { %v2427_v35 = vpop.permute.xlu0 %2426  ;;  %6278 = vst [vmem:[#allocation40_spill] sm:$0xff] %v5511_v51  ;;  %6279 = vst [vmem:[#allocation6_spill] sm:$0xff] %v5514_v44 }
 0x2f7   : > { %v2503_v38 = vadd.f32 %v2427_v35, %v2385_v10 }
 0x2f8   : > { %v2949_v40 = vld [vmem:[#allocation3 + $0x38] sm:$0xff]  ;;  %1790 = vrot.lane.b32.xlu1 %v6277_v36, %s3989_s30 }
 0x2f9   : > { %3919 = vmatmul.mubr.msk.f32.gmra.mrb[36].mxu0 %vm2879_vm5, %v2949_v40  ;;  %v2633_v25 = vadd.f32 %v2557_v50, %v2503_v38  ;;  %v2684_v35 = vpop.permute.xlu1 %2683  ;;  %v2502_v40 = vadd.f32 %v5383_v31, %v2384_v18  ;;  %2332 = vrot.lane.b32.xlu0 %v6270_v41, %s3993_s16 }
 0x2fa   : > { %v5490_v28 = vpop.permute.xlu0 %1772 }
 0x2fb   : > { %v2760_v32 = vadd.f32 %v2684_v35, %v2633_v25  ;;  %v6282_v35 = vld [vmem:[#allocation49_spill] sm:$0xff] }
 0x2fc   : > { %2572 = vrot.lane.b32.xlu1 %v6277_v36, %s3995_s18 }
 0x2fd   : > { %v2795_v5 = vmul.f32 %v5212_v34, %v2760_v32  ;;  %v5516_v38 = vpop.permute.xlu1 %2193  ;;  %1969 = vrot.lane.b32.xlu0 %v6270_v41, %s3990_s11 }
 0x2fe   : > { %v2555_v10 = vpop.permute.xlu0 %2554 }
 0x2ff   : > { %v2632_v8 = vadd.f32 %v2555_v10, %v2502_v40  ;;  %v2830_v31 = vadd.f32 %v5220_v7, %v2795_v5  ;;  %v6283_v10 = vld [vmem:[#allocation50_spill] sm:$0xff] }
 0x300   : > { %2697 = vrot.lane.b32.xlu1 %v6280_v11, %s3996_s21 }
 0x301   : > { %v2858_v50 = vmax.f32 %v2830_v31, 0.0  ;;  %v5524_v19 = vpop.permute.xlu1 %2318  ;;  %2442 = vrot.lane.b32.xlu0 %v6276_v20, %s3994_s17 }
 0x302   : > { %v2682_v59 = vpop.permute.xlu0 %2681 }
 0x303   : > { %v2759_v56 = vadd.f32 %v2682_v59, %v2632_v8  ;;  %2921 = vst.msk [vmem:[#allocation3 + $0x49] sm:$0x3f] %vm2914_vm6, %v2858_v50  ;;  %v5550_v59 = vld [vmem:[%s6118_s8] ss:$0 sm:$0xff] }
 0x304   : > { %2699 = vrot.lane.b32.xlu1 %v6282_v35, %s3996_s21  ;;  %6284 = vst [vmem:[#allocation42_spill] sm:$0xff] %v5550_v59 }
 0x305   : > { %v2794_v18 = vmul.f32 %v5212_v34, %v2759_v56  ;;  %v5532_v8 = vpop.permute.xlu1 %2067  ;;  %1788 = vrot.lane.b32.xlu0 %v6283_v10, %s3989_s30 }
 0x306   : > { %v2431_v25 = vpop.permute.xlu0 %2430  ;;  %6281 = vst [vmem:[#allocation58_spill] sm:$0xff] %v5532_v8 }
 0x307   : > { %v2829_v27 = vadd.f32 %v5220_v7, %v2794_v18 }
 0x308   : > { %2207 = vrot.lane.b32.xlu1 %v6283_v10, %s3992_s15 }
 0x309   : > { %v2857_v41 = vmax.f32 %v2829_v27, 0.0  ;;  %v2429_v32 = vpop.permute.xlu1 %2428  ;;  %2570 = vrot.lane.b32.xlu0 %v6283_v10, %s3995_s18  ;;  %v5560_v10 = vld [vmem:[%s6119_s9] ss:$0 sm:$0xff] }
 0x30a   : > { %v5534_v54 = vpop.permute.xlu0 %2191  ;;  %6285 = vst [vmem:[#allocation44_spill] sm:$0xff] %v5560_v10 }
 0x30b   : > { %2920 = vst.msk [vmem:[#allocation3 + $0x41] sm:$0xff] %vm2879_vm5, %v2857_v41 }
 0x30c   : > { %2209 = vrot.lane.b32.xlu1 %v6277_v36, %s3992_s15  ;;  %v6289_v36 = vld [vmem:[#allocation47_spill] sm:$0xff] }
 0x30d   : > { %v5555_v18 = vpop.permute.xlu1 %2432  ;;  %2446 = vrot.lane.b32.xlu0 %v6286_v39, %s3994_s17 }
 0x30e   : > { %v5541_v40 = vpop.permute.xlu0 %2320  ;;  %v3911_v5 = vpop.f32.mrb[30].mxu0 }
 0x30f   : > { %v3304_v31 = vmul.f32 %v3911_v5, %v5550_v59  ;;  %v3137_v56 = vpop.f32.mrb[31].mxu0 }
 0x310   : > { %v3303_v44 = vmul.f32 %v5550_v59, %v3137_v56  ;;  %2334 = vrot.lane.b32.xlu1 %v6280_v11, %s3993_s16 }
 0x311   : > { %v3343_v51 = vadd.f32 %v5560_v10, %v3304_v31  ;;  %v5580_v56 = vpop.permute.xlu1 %2195  ;;  %2336 = vrot.lane.b32.xlu0 %v6282_v35, %s3993_s16 }
 0x312   : > { %v5553_v50 = vpop.permute.xlu0 %1955  ;;  %v2950_v27 = vld [vmem:[#allocation3 + $0x40] sm:$0xff]  ;;  %v2951_v41 = vld [vmem:[#allocation3 + $0x48] sm:$0xff]  ;;  %v3342_v5 = vadd.f32 %v5560_v10, %v3303_v44  ;;  %6287 = vst [vmem:[#allocation59_spill] sm:$0xff] %v5580_v56 }
 0x313   : > { %3921 = vmatprep.mubr.msk.f32.mxu0 %vm2879_vm5, %v2950_v27  ;;  %v3375_v4 = vmax.f32 %v3343_v51, 0.0  ;;  %v6288_v51 = vld [vmem:[#allocation9_spill] sm:$0xff]  ;;  %v6291_v10 = vld [vmem:[#allocation8_spill] sm:$0xff] }
 0x314   : > { %3922 = vmatmul.mubr.msk.f32.gmra.mrb[38].mxu0 %vm2879_vm5, %v2951_v41  ;;  %v3374_v27 = vmax.f32 %v3342_v5, 0.0  ;;  %v1828_v44 = vadd.f32 %v6289_v36, %v6288_v51  ;;  %v6290_v41 = vld [vmem:[#allocation52_spill] sm:$0xff]  ;;  %v6293_v5 = vld [vmem:[#allocation51_spill] sm:$0xff]  ;;  %2083 = vrot.lane.b32.xlu1 %v6286_v39, %s3991_s12 }
 0x315   : > { %3407 = vst.msk [vmem:[%s5576_s23 + $0x8] sm:$0xff] %vm393_vm1, %v3375_v4  ;;  %v1829_v59 = vadd.f32 %v6291_v10, %v6290_v41  ;;  %v5596_v56 = vpop.permute.xlu1 %2322  ;;  %1971 = vrot.lane.b32.xlu0 %v6280_v11, %s3990_s11 }
 0x316   : > { %v5578_v31 = vpop.permute.xlu0 %1957  ;;  %3406 = vst.msk [vmem:[%s5576_s23] sm:$0xff] %vm393_vm1, %v3374_v27  ;;  %6292 = vst [vmem:[#allocation46_spill] sm:$0xff] %v5596_v56  ;;  %v2011_v4 = vadd.f32 %v6293_v5, %v1828_v44 }
 0x317   : > { %v2012_v20 = vadd.f32 %v6294_v61, %v1829_v59 }
 0x318   : > { %v2129_v27 = vadd.f32 %v5245_v46, %v2011_v4  ;;  %2701 = vrot.lane.b32.xlu1 %v5179_v57, %s3996_s21 }
 0x319   : > { %v2130_v51 = vadd.f32 %v5283_v14, %v2012_v20  ;;  %v1779_v36 = vpop.permute.xlu1 %1778  ;;  %1973 = vrot.lane.b32.xlu0 %v6282_v35, %s3990_s11 }
 0x31a   : > { %v5594_v8 = vpop.permute.xlu0 %2065  ;;  %v2259_v56 = vadd.f32 %v5344_v37, %v2129_v27  ;;  %v6295_v37 = vld [vmem:[#allocation26_spill] sm:$0xff] }
 0x31b   : > { %v2260_v41 = vadd.f32 %v5342_v6, %v2130_v51 }
 0x31c   : > { %v2386_v61 = vadd.f32 %v5352_v29, %v2259_v56  ;;  %2211 = vrot.lane.b32.xlu1 %v5182_v63, %s3992_s15 }
 0x31d   : > { %v2387_v39 = vadd.f32 %v5354_v33, %v2260_v41  ;;  %v2561_v14 = vpop.permute.xlu1 %2560  ;;  %2444 = vrot.lane.b32.xlu0 %v6295_v37, %s3994_s17 }
 0x31e   : > { %v5606_v10 = vpop.permute.xlu0 %1776  ;;  %v2504_v11 = vadd.f32 %v2429_v32, %v2386_v61 }
 0x31f   : > { %v2505_v20 = vadd.f32 %v2431_v25, %v2387_v39  ;;  %v6296_v39 = vld [vmem:[#allocation11_spill] sm:$0xff] }
 0x320   : > { %2338 = vrot.lane.b32.xlu1 %v5179_v57, %s3993_s16 }
 0x321   : > { %v2635_v59 = vadd.f32 %v2561_v14, %v2505_v20  ;;  %v2688_v5 = vpop.permute.xlu1 %2687  ;;  %2081 = vrot.lane.b32.xlu0 %v6295_v37, %s3991_s12  ;;  %v6298_v20 = vld [vmem:[#allocation55_spill] sm:$0xff]  ;;  %v6299_v37 = vld [vmem:[#allocation56_spill] sm:$0xff] }
 0x322   : > { %v2559_v46 = vpop.permute.xlu0 %2558 }
 0x323   : > { %v2634_v6 = vadd.f32 %v2559_v46, %v2504_v11  ;;  %v2762_v56 = vadd.f32 %v2688_v5, %v2635_v59  ;;  %v6297_v46 = vld [vmem:[#allocation54_spill] sm:$0xff] }
 0x324   : > { %2576 = vrot.lane.b32.xlu1 %v5185_v15, %s3995_s18  ;;  %v1831_v14 = vadd.f32 %v6297_v46, %v6296_v39  ;;  %v6302_v46 = vld [vmem:[#allocation17_spill] sm:$0xff] }
 0x325   : > { %v2797_v25 = vmul.f32 %v5212_v34, %v2762_v56  ;;  %v5626_v32 = vpop.permute.xlu1 %2197  ;;  %2574 = vrot.lane.b32.xlu0 %v5182_v63, %s3995_s18  ;;  %v1841_v56 = vadd.f32 %v4722_v21, %v1779_v36 }
 0x326   : > { %v2686_v44 = vpop.permute.xlu0 %2685  ;;  %v2014_v11 = vadd.f32 %v6298_v20, %v1831_v14  ;;  %v1836_v14 = vadd.f32 %v5374_v3, %v6302_v46 }
 0x327   : > { %v2761_v29 = vadd.f32 %v2686_v44, %v2634_v6  ;;  %v2832_v27 = vadd.f32 %v5220_v7, %v2797_v25  ;;  %v6300_v44 = vld [vmem:[#allocation10_spill] sm:$0xff] }
 0x328   : > { %2703 = vrot.lane.b32.xlu1 %v5189_v13, %s3996_s21  ;;  %v2132_v59 = vadd.f32 %v5363_v0, %v2014_v11  ;;  %v1830_v5 = vadd.f32 %v6300_v44, %v6299_v37  ;;  %v6303_v37 = vld [vmem:[#allocation16_spill] sm:$0xff] }
 0x329   : > { %v2796_v33 = vmul.f32 %v5212_v34, %v2761_v29  ;;  %v2860_v41 = vmax.f32 %v2832_v27, 0.0  ;;  %v2072_v61 = vpop.permute.xlu1 %2071  ;;  %2448 = vrot.lane.b32.xlu0 %v4786_v55, %s3994_s17  ;;  %v1837_v44 = vadd.f32 %v6303_v37, %v5402_v24  ;;  %v6309_v37 = vld [vmem:[#allocation12_spill] sm:$0xff] }
 0x32a   : > { %v2070_v35 = vpop.permute.xlu0 %2069  ;;  %v2262_v29 = vadd.f32 %v5432_v9, %v2132_v59 }
 0x32b   : > { %v2831_v4 = vadd.f32 %v5220_v7, %v2796_v33  ;;  %2923 = vst.msk [vmem:[#allocation3 + $0x59] sm:$0x3f] %vm2914_vm6, %v2860_v41 }
 0x32c   : > { %2213 = vrot.lane.b32.xlu1 %v5185_v15, %s3992_s15 }
 0x32d   : > { %v2859_v51 = vmax.f32 %v2831_v4, 0.0  ;;  %v5647_v63 = vpop.permute.xlu1 %1782  ;;  %2085 = vrot.lane.b32.xlu0 %v4786_v55, %s3991_s12  ;;  %v2389_v55 = vadd.f32 %v5430_v58, %v2262_v29 }
 0x32e   : > { %v5634_v57 = vpop.permute.xlu0 %1959 }
 0x32f   : > { %2922 = vst.msk [vmem:[#allocation3 + $0x51] sm:$0xff] %vm2879_vm5, %v2859_v51  ;;  %v6301_v51 = vld [vmem:[#allocation57_spill] sm:$0xff] }
 0x330   : > { %v2013_v41 = vadd.f32 %v6301_v51, %v1830_v5  ;;  %2087 = vrot.lane.b32.xlu1 %v4818_v2, %s3991_s12 }
 0x331   : > { %v2565_v25 = vpop.permute.xlu1 %2564  ;;  %2340 = vrot.lane.b32.xlu0 %v5189_v13, %s3993_s16  ;;  %v2019_v13 = vadd.f32 %v5419_v22, %v1836_v14  ;;  %v1843_v14 = vadd.f32 %v5647_v63, %v4732_v30  ;;  %v6307_v63 = vld [vmem:[#allocation18_spill] sm:$0xff] }
 0x332   : > { %v5645_v6 = vpop.permute.xlu0 %2324  ;;  %v2131_v21 = vadd.f32 %v5365_v53, %v2013_v41 }
 0x333   : > { %v2137_v5 = vadd.f32 %v2070_v35, %v2019_v13  ;;  %v6305_v13 = vld [vmem:[#allocation13_spill] sm:$0xff] }
 0x334   : > { %v2261_v36 = vadd.f32 %v5400_v45, %v2131_v21  ;;  %2580 = vrot.lane.b32.xlu1 %v5248_v17, %s3995_s18  ;;  %v6304_v21 = vld [vmem:[#allocation19_spill] sm:$0xff] }
 0x335   : > { %v2690_v9 = vpop.permute.xlu1 %2689  ;;  %2450 = vrot.lane.b32.xlu0 %v4818_v2, %s3994_s17 }
 0x336   : > { %v1962_v33 = vpop.permute.xlu0 %1961  ;;  %v2952_v4 = vld [vmem:[#allocation3 + $0x50] sm:$0xff]  ;;  %v2953_v27 = vld [vmem:[#allocation3 + $0x58] sm:$0xff]  ;;  %v2388_v58 = vadd.f32 %v5391_v62, %v2261_v36  ;;  %v2020_v62 = vadd.f32 %v5449_v60, %v1837_v44 }
 0x337   : > { %v5659_v0 = vadd.f32 %v1962_v33, %v1841_v56  ;;  %3924 = vmatprep.mubr.msk.f32.mxu0 %vm2879_vm5, %v2952_v4 }
 0x338   : > { %3925 = vmatmul.mubr.msk.f32.gmra.mrb[40].mxu0 %vm2879_vm5, %v2953_v27  ;;  %2705 = vrot.lane.b32.xlu1 %v5251_v12, %s3996_s21  ;;  %v2506_v3 = vadd.f32 %v5555_v18, %v2388_v58  ;;  %v2138_v24 = vadd.f32 %v2072_v61, %v2020_v62  ;;  %v6306_v58 = vld [vmem:[#allocation60_spill] sm:$0xff] }
 0x339   : > { %v2692_v20 = vpop.permute.xlu1 %2691  ;;  %2578 = vrot.lane.b32.xlu0 %v5254_v16, %s3995_s18 }
 0x33a   : > { %v2435_v15 = vpop.permute.xlu0 %2434 }
 0x33b   : > { %v2507_v39 = vadd.f32 %v2435_v15, %v2389_v55  ;;  %v1839_v55 = vadd.f32 %v5475_v23, %v6304_v21 }
 0x33c   : > { %2707 = vrot.lane.b32.xlu1 %v5257_v48, %s3996_s21 }
 0x33d   : > { %v2637_v53 = vadd.f32 %v2565_v25, %v2507_v39  ;;  %v2200_v22 = vpop.permute.xlu1 %2199  ;;  %2454 = vrot.lane.b32.xlu0 %v4820_v49, %s3994_s17 }
 0x33e   : > { %v1781_v11 = vpop.permute.xlu0 %1780  ;;  %v2267_v56 = vadd.f32 %v2200_v22, %v2137_v5  ;;  %v6311_v22 = vld [vmem:[#allocation29_spill] sm:$0xff] }
 0x33f   : > { %v2764_v59 = vadd.f32 %v2692_v20, %v2637_v53  ;;  %v1842_v45 = vadd.f32 %v4730_v26, %v1781_v11 }
 0x340   : > { %2215 = vrot.lane.b32.xlu1 %v5254_v16, %s3992_s15  ;;  %v2022_v16 = vadd.f32 %v5578_v31, %v1839_v55 }
 0x341   : > { %v2799_v2 = vmul.f32 %v5212_v34, %v2764_v59  ;;  %v2202_v35 = vpop.permute.xlu1 %2201  ;;  %2344 = vrot.lane.b32.xlu0 %v5257_v48, %s3993_s16  ;;  %v1832_v59 = vadd.f32 %v6306_v58, %v6305_v13  ;;  %v6319_v58 = vld [vmem:[#allocation32_spill] sm:$0xff] }
 0x342   : > { %v2563_v29 = vpop.permute.xlu0 %2562  ;;  %v2268_v27 = vadd.f32 %v2202_v35, %v2138_v24  ;;  %v6313_v24 = vld [vmem:[#allocation30_spill] sm:$0xff] }
 0x343   : > { %v2834_v26 = vadd.f32 %v5220_v7, %v2799_v2  ;;  %v2636_v33 = vadd.f32 %v2563_v29, %v2506_v3  ;;  %v6310_v3 = vld [vmem:[#allocation27_spill] sm:$0xff]  ;;  %v6312_v29 = vld [vmem:[#allocation62_spill] sm:$0xff] }
 0x344   : > { %2217 = vrot.lane.b32.xlu1 %v5248_v17, %s3992_s15 }
 0x345   : > { %v2862_v25 = vmax.f32 %v2834_v26, 0.0  ;;  %v2763_v18 = vadd.f32 %v2690_v9, %v2636_v33  ;;  %v2327_v61 = vpop.permute.xlu1 %2326  ;;  %2452 = vrot.lane.b32.xlu0 %v4826_v47, %s3994_s17 }
 0x346   : > { %v5693_v4 = vpop.permute.xlu0 %2438  ;;  %v5704_v9 = vadd.f32 %v2327_v61, %v2267_v56  ;;  %v6315_v61 = vld [vmem:[#allocation21_spill] sm:$0xff] }
 0x347   : > { %2925 = vst.msk [vmem:[#allocation3 + $0x69] sm:$0x3f] %vm2914_vm6, %v2862_v25  ;;  %v2798_v60 = vmul.f32 %v5212_v34, %v2763_v18 }
 0x348   : > { %2342 = vrot.lane.b32.xlu1 %v5251_v12, %s3993_s16  ;;  %v2015_v12 = vadd.f32 %v5191_v43, %v1832_v59 }
 0x349   : > { %v2833_v51 = vadd.f32 %v5220_v7, %v2798_v60  ;;  %v2076_v48 = vpop.permute.xlu1 %2075  ;;  %2089 = vrot.lane.b32.xlu0 %v4826_v47, %s3991_s12 }
 0x34a   : > { %v2329_v41 = vpop.permute.xlu0 %2328  ;;  %v5714_v46 = vadd.f32 %v2076_v48, %v2022_v16  ;;  %v2133_v5 = vadd.f32 %v6310_v3, %v2015_v12  ;;  %v6323_v3 = vld [vmem:[#allocation15_spill] sm:$0xff] }
 0x34b   : > { %v2861_v15 = vmax.f32 %v2833_v51, 0.0  ;;  %v5706_v36 = vadd.f32 %v2329_v41, %v2268_v27  ;;  %v6314_v51 = vld [vmem:[#allocation22_spill] sm:$0xff] }
 0x34c   : > { %2091 = vrot.lane.b32.xlu1 %v4820_v49, %s3991_s12  ;;  %v6308_v49 = vld [vmem:[#allocation61_spill] sm:$0xff]  ;;  %v2263_v56 = vadd.f32 %v5534_v54, %v2133_v5  ;;  %v6324_v5 = vld [vmem:[#allocation64_spill] sm:$0xff] }
 0x34d   : > { %2924 = vst.msk [vmem:[#allocation3 + $0x61] sm:$0xff] %vm2879_vm5, %v2861_v15  ;;  %v2694_v31 = vpop.permute.xlu1 %2693  ;;  %2582 = vrot.lane.b32.xlu0 %v5334_v1, %s3995_s18  ;;  %v1833_v44 = vadd.f32 %v6309_v37, %v6308_v49 }
 0x34e   : > { %v1964_v39 = vpop.permute.xlu0 %1963  ;;  %v2390_v60 = vadd.f32 %v5524_v19, %v2263_v56 }
 0x34f   : > { %v5716_v23 = vadd.f32 %v1964_v39, %v1842_v45  ;;  %v1838_v45 = vadd.f32 %v6307_v63, %v5490_v28  ;;  %v2016_v62 = vadd.f32 %v6312_v29, %v1833_v44 }
 0x350   : > { %2709 = vrot.lane.b32.xlu1 %v5339_v42, %s3996_s21 }
 0x351   : > { %v2204_v47 = vpop.permute.xlu1 %2203  ;;  %v2021_v2 = vadd.f32 %v5553_v50, %v1838_v45  ;;  %2456 = vrot.lane.b32.xlu0 %v6311_v22, %s3994_s17  ;;  %v2134_v33 = vadd.f32 %v5451_v52, %v2016_v62  ;;  %v6316_v52 = vld [vmem:[#allocation31_spill] sm:$0xff]  ;;  %v6320_v45 = vld [vmem:[#allocation34_spill] sm:$0xff]  ;;  %v6325_v22 = vld [vmem:[#allocation36_spill] sm:$0xff] }
 0x352   : > { %v1966_v17 = vpop.permute.xlu0 %1965 }
 0x353   : > { %v5724_v53 = vadd.f32 %v1966_v17, %v1843_v14  ;;  %v2264_v50 = vadd.f32 %v5516_v38, %v2134_v33 }
 0x354   : > { %v2954_v20 = vld [vmem:[#allocation3 + $0x60] sm:$0xff]  ;;  %v2955_v11 = vld [vmem:[#allocation3 + $0x68] sm:$0xff]  ;;  %2584 = vrot.lane.b32.xlu1 %v6313_v24, %s3995_s18 }
 0x355   : > { %3927 = vmatprep.mubr.msk.f32.mxu0 %vm2879_vm5, %v2954_v20  ;;  %v2331_v43 = vpop.permute.xlu1 %2330  ;;  %2219 = vrot.lane.b32.xlu0 %v5334_v1, %s3992_s15  ;;  %v2391_v21 = vadd.f32 %v5541_v40, %v2264_v50  ;;  %v6317_v40 = vld [vmem:[#allocation20_spill] sm:$0xff] }
 0x356   : > { %3928 = vmatmul.mubr.msk.f32.gmra.mrb[42].mxu0 %vm2879_vm5, %v2955_v11  ;;  %v2437_v30 = vpop.permute.xlu0 %2436  ;;  %v1840_v17 = vadd.f32 %v5606_v10, %v6317_v40  ;;  %v6318_v11 = vld [vmem:[#allocation33_spill] sm:$0xff]  ;;  %v6336_v40 = vld [vmem:[#allocation59_spill] sm:$0xff] }
 0x357   : > { %v2508_v55 = vadd.f32 %v2437_v30, %v2390_v60  ;;  %v2509_v15 = vadd.f32 %v5693_v4, %v2391_v21  ;;  %v6332_v60 = vld [vmem:[#allocation58_spill] sm:$0xff] }
 0x358   : > { %2711 = vrot.lane.b32.xlu1 %v6316_v52, %s3996_s21  ;;  %v2023_v4 = vadd.f32 %v5634_v57, %v1840_v17 }
 0x359   : > { %v1787_v35 = vpop.permute.xlu1 %1786  ;;  %2346 = vrot.lane.b32.xlu0 %v5339_v42, %s3993_s16 }
 0x35a   : > { %v2074_v26 = vpop.permute.xlu0 %2073  ;;  %v1845_v41 = vadd.f32 %v6315_v61, %v1787_v35 }
 0x35b   : > { %v2139_v28 = vadd.f32 %v2074_v26, %v2021_v2  ;;  %v1835_v2 = vadd.f32 %v6324_v5, %v6323_v3  ;;  %v6326_v26 = vld [vmem:[#allocation63_spill] sm:$0xff]  ;;  %v6343_v3 = vld [vmem:[#allocation40_spill] sm:$0xff] }
 0x35c   : > { %2221 = vrot.lane.b32.xlu1 %v6313_v24, %s3992_s15  ;;  %v6329_v24 = vld [vmem:[#allocation24_spill] sm:$0xff] }
 0x35d   : > { %v2269_v25 = vadd.f32 %v2204_v47, %v2139_v28  ;;  %v2569_v38 = vpop.permute.xlu1 %2568  ;;  %2348 = vrot.lane.b32.xlu0 %v6316_v52, %s3993_s16  ;;  %v6328_v28 = vld [vmem:[#allocation66_spill] sm:$0xff] }
 0x35e   : > { %v1785_v18 = vpop.permute.xlu0 %1784  ;;  %v2639_v48 = vadd.f32 %v2569_v38, %v2509_v15  ;;  %v2018_v33 = vadd.f32 %v6328_v28, %v1835_v2  ;;  %v6334_v15 = vld [vmem:[#allocation4_spill] sm:$0xff]  ;;  %v6345_v28 = vld [vmem:[#allocation6_spill] sm:$0xff] }
 0x35f   : > { %v5754_v27 = vadd.f32 %v2331_v43, %v2269_v25  ;;  %v1844_v54 = vadd.f32 %v1785_v18, %v6314_v51  ;;  %v6327_v43 = vld [vmem:[#allocation14_spill] sm:$0xff]  ;;  %v6331_v18 = vld [vmem:[#allocation65_spill] sm:$0xff] }
 0x360   : > { %2588 = vrot.lane.b32.xlu1 %v6318_v11, %s3995_s18  ;;  %v1834_v56 = vadd.f32 %v6327_v43, %v6326_v26  ;;  %v2136_v51 = vadd.f32 %v6332_v60, %v2018_v33 }
 0x361   : > { %v2696_v14 = vpop.permute.xlu1 %2695  ;;  %2458 = vrot.lane.b32.xlu0 %v6319_v58, %s3994_s17 }
 0x362   : > { %v2567_v1 = vpop.permute.xlu0 %2566  ;;  %v2766_v20 = vadd.f32 %v2696_v14, %v2639_v48  ;;  %v2017_v35 = vadd.f32 %v6331_v18, %v1834_v56 }
 0x363   : > { %v2638_v19 = vadd.f32 %v2567_v1, %v2508_v55  ;;  %v2266_v1 = vadd.f32 %v5626_v32, %v2136_v51  ;;  %v6338_v32 = vld [vmem:[#allocation7_spill] sm:$0xff] }
 0x364   : > { %2715 = vrot.lane.b32.xlu1 %v6320_v45, %s3996_s21  ;;  %v2135_v55 = vadd.f32 %v5594_v8, %v2017_v35  ;;  %v6337_v8 = vld [vmem:[#allocation39_spill] sm:$0xff] }
 0x365   : > { %v2765_v16 = vadd.f32 %v2694_v31, %v2638_v19  ;;  %v2801_v31 = vmul.f32 %v5212_v34, %v2766_v20  ;;  %v2206_v30 = vpop.permute.xlu1 %2205  ;;  %v2393_v19 = vadd.f32 %v5645_v6, %v2266_v1  ;;  %v6342_v45 = vld [vmem:[#allocation43_spill] sm:$0xff] }
 0x366   : > { %v2441_v39 = vpop.permute.xlu0 %2440  ;;  %v5780_v63 = vadd.f32 %v2206_v30, %v5714_v46  ;;  %v6322_v46 = vld [vmem:[#allocation5_spill] sm:$0xff]  ;;  %v2265_v17 = vadd.f32 %v6336_v40, %v2135_v55 }
 0x367   : > { %v2800_v42 = vmul.f32 %v5212_v34, %v2765_v16  ;;  %v2836_v10 = vadd.f32 %v5220_v7, %v2801_v31  ;;  %v6321_v34 = vld [vmem:[#allocation35_spill] sm:$0xff]  ;;  %v6335_v16 = vld [vmem:[#allocation37_spill] sm:$0xff] }
 0x368   : > { %2586 = vrot.lane.b32.xlu0 %v6321_v34, %s3995_s18  ;;  %2460 = vrot.lane.b32.xlu1 %v6322_v46, %s3994_s17  ;;  %v6340_v31 = vld [vmem:[#allocation23_spill] sm:$0xff] }
 0x369   : > { %v2835_v13 = vadd.f32 %v5220_v7, %v2800_v42  ;;  %v2864_v57 = vmax.f32 %v2836_v10, 0.0  ;;  %v2080_v37 = vpop.permute.xlu1 %2079 }
 0x36a   : > { %v2078_v59 = vpop.permute.xlu0 %2077  ;;  %v2142_v7 = vadd.f32 %v2080_v37, %v5659_v0  ;;  %v6330_v0 = vld [vmem:[#allocation38_spill] sm:$0xff] }
 0x36b   : > { %v2863_v47 = vmax.f32 %v2835_v13, 0.0  ;;  %v2141_v12 = vadd.f32 %v2078_v59, %v2023_v4  ;;  %2927 = vst.msk [vmem:[#allocation3 + $0x79] sm:$0x3f] %vm2914_vm6, %v2864_v57  ;;  %v6339_v4 = vld [vmem:[#allocation46_spill] sm:$0xff]  ;;  %v6341_v59 = vld [vmem:[#allocation41_spill] sm:$0xff] }
 0x36c   : > { %2713 = vrot.lane.b32.xlu0 %v6325_v22, %s3996_s21  ;;  %2590 = vrot.lane.b32.xlu1 %v6330_v0, %s3995_s18  ;;  %v2392_v13 = vadd.f32 %v6339_v4, %v2265_v17  ;;  %v6344_v22 = vld [vmem:[#allocation45_spill] sm:$0xff] }
 0x36d   : > { %2926 = vst.msk [vmem:[#allocation3 + $0x71] sm:$0xff] %vm2879_vm5, %v2863_v47  ;;  %v1791_v62 = vpop.permute.xlu1 %1790  ;;  %v5834_v47 = vld [vmem:[%s6115_s5] ss:$0 sm:$0xff] }
 0x36e   : > { %v1968_v49 = vpop.permute.xlu0 %1967  ;;  %v5803_v25 = vadd.f32 %v1791_v62, %v6329_v24  ;;  %v2510_v30 = vadd.f32 %v2441_v39, %v2392_v13 }
 0x36f   : > { %v5788_v44 = vadd.f32 %v1968_v49, %v1844_v54  ;;  %v6333_v54 = vld [vmem:[#allocation28_spill] sm:$0xff] }
 0x370   : > { %2462 = vrot.lane.b32.xlu0 %v6333_v54, %s3994_s17  ;;  %2717 = vrot.lane.b32.xlu1 %v6334_v15, %s3996_s21  ;;  %v5842_v49 = vld [vmem:[%s6116_s6] ss:$0 sm:$0xff] }
 0x371   : > { %v2573_v52 = vpop.permute.xlu1 %2572 }
 0x372   : > { %v5797_v29 = vpop.permute.xlu0 %2332 }
 0x374   : > { %v2956_v50 = vld [vmem:[#allocation3 + $0x70] sm:$0xff]  ;;  %v2957_v21 = vld [vmem:[#allocation3 + $0x78] sm:$0xff]  ;;  %2464 = vrot.lane.b32.xlu0 %v6335_v16, %s3994_s17  ;;  %2592 = vrot.lane.b32.xlu1 %v6337_v8, %s3995_s18 }
 0x375   : > { %3930 = vmatprep.mubr.msk.f32.mxu0 %vm2879_vm5, %v2956_v50  ;;  %v2698_v14 = vpop.permute.xlu1 %2697 }
 0x376   : > { %v1970_v61 = vpop.permute.xlu0 %1969  ;;  %3931 = vmatmul.mubr.msk.f32.gmra.mrb[44].mxu0 %vm2879_vm5, %v2957_v21 }
 0x377   : > { %v5814_v38 = vadd.f32 %v1970_v61, %v1845_v41 }
 0x378   : > { %2466 = vrot.lane.b32.xlu0 %v6338_v32, %s3994_s17  ;;  %2719 = vrot.lane.b32.xlu1 %v6341_v59, %s3996_s21 }
 0x379   : > { %v2700_v20 = vpop.permute.xlu1 %2699 }
 0x37a   : > { %v2443_v48 = vpop.permute.xlu0 %2442 }
 0x37b   : > { %v2511_v42 = vadd.f32 %v2443_v48, %v2393_v19 }
 0x37c   : > { %2594 = vrot.lane.b32.xlu0 %v6342_v45, %s3995_s18  ;;  %2596 = vrot.lane.b32.xlu1 %v6343_v3, %s3995_s18 }
 0x37d   : > { %v2641_v41 = vadd.f32 %v2573_v52, %v2511_v42  ;;  %v2208_v57 = vpop.permute.xlu1 %2207  ;;  %v6346_v52 = vld [vmem:[#allocation42_spill] sm:$0xff] }
 0x37e   : > { %v1789_v11 = vpop.permute.xlu0 %1788  ;;  %v5845_v39 = vadd.f32 %v2208_v57, %v2141_v12 }
 0x37f   : > { %v2768_v6 = vadd.f32 %v2700_v20, %v2641_v41  ;;  %v1846_v58 = vadd.f32 %v6340_v31, %v1789_v11 }
 0x380   : > { %2721 = vrot.lane.b32.xlu0 %v6344_v22, %s3996_s21  ;;  %2723 = vrot.lane.b32.xlu1 %v6345_v28, %s3996_s21 }
 0x381   : > { %v2803_v10 = vmul.f32 %v5834_v47, %v2768_v6  ;;  %v2210_v62 = vpop.permute.xlu1 %2209 }
 0x382   : > { %v2571_v34 = vpop.permute.xlu0 %2570  ;;  %v2272_v43 = vadd.f32 %v2210_v62, %v2142_v7 }
 0x383   : > { %v2838_v37 = vadd.f32 %v5842_v49, %v2803_v10  ;;  %v2640_v46 = vadd.f32 %v2571_v34, %v2510_v30 }
 0x385   : > { %v2866_v5 = vmax.f32 %v2838_v37, 0.0  ;;  %v2767_v2 = vadd.f32 %v2698_v14, %v2640_v46  ;;  %v5856_v33 = vpop.permute.xlu1 %2334 }
 0x386   : > { %v2447_v56 = vpop.permute.xlu0 %2446 }
 0x387   : > { %2929 = vst.msk [vmem:[#allocation3 + $0x89] sm:$0x3f] %vm2914_vm6, %v2866_v5  ;;  %v2802_v26 = vmul.f32 %v5834_v47, %v2767_v2  ;;  %v2513_v13 = vadd.f32 %v2447_v56, %v5706_v36 }
 0x389   : > { %v2837_v12 = vadd.f32 %v5842_v49, %v2802_v26  ;;  %v2084_v18 = vpop.permute.xlu1 %2083 }
 0x38a   : > { %v2337_v0 = vpop.permute.xlu0 %2336  ;;  %v5862_v35 = vadd.f32 %v2084_v18, %v5724_v53  ;;  %v6347_v53 = vld [vmem:[#allocation44_spill] sm:$0xff] }
 0x38b   : > { %v2865_v24 = vmax.f32 %v2837_v12, 0.0  ;;  %v5858_v50 = vadd.f32 %v2337_v0, %v2272_v43  ;;  %v2397_v0 = vadd.f32 %v5797_v29, %v5780_v63 }
 0x38d   : > { %2928 = vst.msk [vmem:[#allocation3 + $0x81] sm:$0xff] %vm2879_vm5, %v2865_v24  ;;  %v2702_v51 = vpop.permute.xlu1 %2701 }
 0x38e   : > { %v1972_v60 = vpop.permute.xlu0 %1971  ;;  %v3914_v54 = vpop.f32.mrb[32].mxu0 }
 0x38f   : > { %v5864_v7 = vadd.f32 %v1972_v60, %v1846_v58  ;;  %v3306_v21 = vmul.f32 %v3914_v54, %v6346_v52  ;;  %v3147_v55 = vpop.f32.mrb[33].mxu0 }
 0x390   : > { %v3305_v15 = vmul.f32 %v6346_v52, %v3147_v55 }
 0x391   : > { %v3345_v48 = vadd.f32 %v6347_v53, %v3306_v21  ;;  %v2212_v40 = vpop.permute.xlu1 %2211 }
 0x392   : > { %v1974_v61 = vpop.permute.xlu0 %1973  ;;  %v3344_v14 = vadd.f32 %v6347_v53, %v3305_v15 }
 0x393   : > { %v5868_v1 = vadd.f32 %v1974_v61, %v5803_v25  ;;  %v3377_v17 = vmax.f32 %v3345_v48, 0.0 }
 0x394   : > { %v2958_v19 = vld [vmem:[#allocation3 + $0x80] sm:$0xff]  ;;  %v2959_v16 = vld [vmem:[#allocation3 + $0x88] sm:$0xff]  ;;  %v3376_v8 = vmax.f32 %v3344_v14, 0.0 }
 0x395   : > { %3933 = vmatprep.mubr.msk.f32.mxu0 %vm2879_vm5, %v2958_v19  ;;  %3409 = vst.msk [vmem:[%s5576_s23 + $0x18] sm:$0xff] %vm393_vm1, %v3377_v17  ;;  %v2339_v25 = vpop.permute.xlu1 %2338 }
 0x396   : > { %3934 = vmatmul.mubr.msk.f32.gmra.mrb[46].mxu0 %vm2879_vm5, %v2959_v16  ;;  %v2445_v42 = vpop.permute.xlu0 %2444  ;;  %3408 = vst.msk [vmem:[%s5576_s23 + $0x10] sm:$0xff] %vm393_vm1, %v3376_v8 }
 0x397   : > { %v2512_v20 = vadd.f32 %v2445_v42, %v5704_v9 }
 0x399   : > { %v2577_v4 = vpop.permute.xlu1 %2576 }
 0x39a   : > { %v2082_v32 = vpop.permute.xlu0 %2081  ;;  %v2643_v59 = vadd.f32 %v2577_v4, %v2513_v13 }
 0x39b   : > { %v2143_v41 = vadd.f32 %v2082_v32, %v5716_v23 }
 0x39d   : > { %v2273_v11 = vadd.f32 %v2212_v40, %v2143_v41  ;;  %v2704_v10 = vpop.permute.xlu1 %2703 }
 0x39e   : > { %v2575_v6 = vpop.permute.xlu0 %2574  ;;  %v2770_v57 = vadd.f32 %v2704_v10, %v2643_v59 }
 0x39f   : > { %v5882_v31 = vadd.f32 %v2339_v25, %v2273_v11  ;;  %v2642_v58 = vadd.f32 %v2575_v6, %v2512_v20 }
 0x3a0   : > { %v2805_v37 = vmul.f32 %v5834_v47, %v2770_v57 }
 0x3a1   : > { %v2769_v30 = vadd.f32 %v2702_v51, %v2642_v58  ;;  %v5887_v9 = vpop.permute.xlu1 %2213  ;;  %v2398_v58 = vadd.f32 %v5856_v33, %v5845_v39 }
 0x3a2   : > { %v2449_v45 = vpop.permute.xlu0 %2448  ;;  %v2840_v46 = vadd.f32 %v5842_v49, %v2805_v37 }
 0x3a3   : > { %v2804_v34 = vmul.f32 %v5834_v47, %v2769_v30  ;;  %v2514_v21 = vadd.f32 %v2449_v45, %v5754_v27 }
 0x3a4   : > { %v2868_v5 = vmax.f32 %v2840_v46, 0.0 }
 0x3a5   : > { %v2839_v23 = vadd.f32 %v5842_v49, %v2804_v34  ;;  %v5893_v2 = vpop.permute.xlu1 %2087 }
 0x3a6   : > { %v5890_v36 = vpop.permute.xlu0 %2085  ;;  %2931 = vst.msk [vmem:[#allocation3 + $0x99] sm:$0x3f] %vm2914_vm6, %v2868_v5 }
 0x3a7   : > { %v2867_v3 = vmax.f32 %v2839_v23, 0.0  ;;  %v3917_v22 = vpop.f32.mrb[34].mxu0 }
 0x3a8   : > { %v3308_v26 = vmul.f32 %v3917_v22, %v6346_v52  ;;  %v3157_v43 = vpop.f32.mrb[35].mxu0 }
 0x3a9   : > { %2930 = vst.msk [vmem:[#allocation3 + $0x91] sm:$0xff] %vm2879_vm5, %v2867_v3  ;;  %v3307_v56 = vmul.f32 %v6346_v52, %v3157_v43  ;;  %v2581_v24 = vpop.permute.xlu1 %2580 }
 0x3aa   : > { %v5896_v62 = vpop.permute.xlu0 %2340  ;;  %v3347_v28 = vadd.f32 %v6347_v53, %v3308_v26 }
 0x3ab   : > { %v3346_v12 = vadd.f32 %v6347_v53, %v3307_v56 }
 0x3ac   : > { %v3379_v18 = vmax.f32 %v3347_v28, 0.0 }
 0x3ad   : > { %v3378_v51 = vmax.f32 %v3346_v12, 0.0  ;;  %v2706_v55 = vpop.permute.xlu1 %2705 }
 0x3ae   : > { %v2451_v60 = vpop.permute.xlu0 %2450  ;;  %3411 = vst.msk [vmem:[%s5576_s23 + $0x28] sm:$0xff] %vm393_vm1, %v3379_v18 }
 0x3af   : > { %v2515_v54 = vadd.f32 %v2451_v60, %v2397_v0  ;;  %3410 = vst.msk [vmem:[%s5576_s23 + $0x20] sm:$0xff] %vm393_vm1, %v3378_v51 }
 0x3b0   : > { %v2960_v61 = vld [vmem:[#allocation3 + $0x90] sm:$0xff]  ;;  %v2961_v15 = vld [vmem:[#allocation3 + $0x98] sm:$0xff] }
 0x3b1   : > { %3936 = vmatprep.mubr.msk.f32.mxu0 %vm2879_vm5, %v2960_v61  ;;  %v2645_v63 = vadd.f32 %v2581_v24, %v2515_v54  ;;  %v2708_v48 = vpop.permute.xlu1 %2707 }
 0x3b2   : > { %v2579_v19 = vpop.permute.xlu0 %2578  ;;  %3937 = vmatmul.mubr.msk.f32.gmra.mrb[48].mxu0 %vm2879_vm5, %v2961_v15 }
 0x3b3   : > { %v2644_v16 = vadd.f32 %v2579_v19, %v2514_v21  ;;  %v2772_v14 = vadd.f32 %v2708_v48, %v2645_v63 }
 0x3b5   : > { %v2771_v29 = vadd.f32 %v2706_v55, %v2644_v16  ;;  %v2807_v42 = vmul.f32 %v5834_v47, %v2772_v14  ;;  %v5914_v8 = vpop.permute.xlu1 %2215  ;;  %v2274_v16 = vadd.f32 %v5887_v9, %v5862_v35  ;;  %v2145_v35 = vadd.f32 %v5890_v36, %v5788_v44 }
 0x3b6   : > { %v2455_v40 = vpop.permute.xlu0 %2454  ;;  %v2146_v44 = vadd.f32 %v5893_v2, %v5814_v38 }
 0x3b7   : > { %v2806_v17 = vmul.f32 %v5834_v47, %v2771_v29  ;;  %v2842_v25 = vadd.f32 %v5842_v49, %v2807_v42  ;;  %v2517_v39 = vadd.f32 %v2455_v40, %v5858_v50  ;;  %v2401_v29 = vadd.f32 %v5896_v62, %v2274_v16 }
 0x3b9   : > { %v2841_v27 = vadd.f32 %v5842_v49, %v2806_v17  ;;  %v2870_v20 = vmax.f32 %v2842_v25, 0.0  ;;  %v5920_v11 = vpop.permute.xlu1 %2217 }
 0x3ba   : > { %v5917_v32 = vpop.permute.xlu0 %2344 }
 0x3bb   : > { %v2869_v41 = vmax.f32 %v2841_v27, 0.0  ;;  %2933 = vst.msk [vmem:[#allocation3 + $0xa9] sm:$0x3f] %vm2914_vm6, %v2870_v20 }
 0x3bd   : > { %2932 = vst.msk [vmem:[#allocation3 + $0xa1] sm:$0xff] %vm2879_vm5, %v2869_v41  ;;  %v5923_v13 = vpop.permute.xlu1 %2342 }
 0x3be   : > { %v2453_v4 = vpop.permute.xlu0 %2452 }
 0x3bf   : > { %v2516_v45 = vadd.f32 %v2453_v4, %v2398_v58 }
 0x3c1   : > { %v5930_v30 = vpop.permute.xlu1 %2091 }
 0x3c2   : > { %v5925_v6 = vpop.permute.xlu0 %2089 }
 0x3c4   : > { %v2962_v59 = vld [vmem:[#allocation3 + $0xa0] sm:$0xff]  ;;  %v2963_v10 = vld [vmem:[#allocation3 + $0xa8] sm:$0xff] }
 0x3c5   : > { %3939 = vmatprep.mubr.msk.f32.mxu0 %vm2879_vm5, %v2962_v59  ;;  %v2710_v37 = vpop.permute.xlu1 %2709  ;;  %v2275_v59 = vadd.f32 %v5914_v8, %v2145_v35 }
 0x3c6   : > { %v2583_v57 = vpop.permute.xlu0 %2582  ;;  %3940 = vmatmul.mubr.msk.f32.gmra.mrb[50].mxu0 %vm2879_vm5, %v2963_v10 }
 0x3c7   : > { %v2646_v34 = vadd.f32 %v2583_v57, %v2516_v45 }
 0x3c9   : > { %v2773_v23 = vadd.f32 %v2710_v37, %v2646_v34  ;;  %v2585_v22 = vpop.permute.xlu1 %2584  ;;  %v2402_v34 = vadd.f32 %v5923_v13, %v2275_v59  ;;  %v2276_v13 = vadd.f32 %v5920_v11, %v2146_v44  ;;  %v2973_v44 = vld [vmem:[#allocation3 + $0xf8] sm:$0xff] }
 0x3ca   : > { %v2457_v46 = vpop.permute.xlu0 %2456  ;;  %v2647_v0 = vadd.f32 %v2585_v22, %v2517_v39 }
 0x3cb   : > { %v2808_v3 = vmul.f32 %v5834_v47, %v2773_v23  ;;  %v2518_v41 = vadd.f32 %v2457_v46, %v5882_v31 }
 0x3cc   : > { %v3920_v5 = vpop.f32.mrb[36].mxu0 }
 0x3cd   : > { %v2843_v33 = vadd.f32 %v5842_v49, %v2808_v3  ;;  %v3310_v26 = vmul.f32 %v3920_v5, %v6346_v52  ;;  %v3167_v56 = vpop.f32.mrb[37].mxu0  ;;  %v2712_v60 = vpop.permute.xlu1 %2711 }
 0x3ce   : > { %v5937_v43 = vpop.permute.xlu0 %2219  ;;  %v3309_v28 = vmul.f32 %v6346_v52, %v3167_v56  ;;  %v2774_v54 = vadd.f32 %v2712_v60, %v2647_v0  ;;  %v2403_v0 = vadd.f32 %v5917_v32, %v2276_v13 }
 0x3cf   : > { %v2871_v12 = vmax.f32 %v2843_v33, 0.0  ;;  %v3349_v24 = vadd.f32 %v6347_v53, %v3310_v26 }
 0x3d0   : > { %v3348_v18 = vadd.f32 %v6347_v53, %v3309_v28  ;;  %v2809_v21 = vmul.f32 %v5834_v47, %v2774_v54 }
 0x3d1   : > { %2934 = vst.msk [vmem:[#allocation3 + $0xb1] sm:$0xff] %vm2879_vm5, %v2871_v12  ;;  %v3381_v50 = vmax.f32 %v3349_v24, 0.0  ;;  %v2222_v55 = vpop.permute.xlu1 %2221 }
 0x3d2   : > { %v5943_v51 = vpop.permute.xlu0 %2346  ;;  %v3380_v61 = vmax.f32 %v3348_v18, 0.0  ;;  %v2844_v15 = vadd.f32 %v5842_v49, %v2809_v21 }
 0x3d3   : > { %3413 = vst.msk [vmem:[%s5576_s23 + $0x38] sm:$0xff] %vm393_vm1, %v3381_v50  ;;  %v2148_v50 = vadd.f32 %v5930_v30, %v5868_v1 }
 0x3d4   : > { %3412 = vst.msk [vmem:[%s5576_s23 + $0x30] sm:$0xff] %vm393_vm1, %v3380_v61  ;;  %v2872_v63 = vmax.f32 %v2844_v15, 0.0 }
 0x3d5   : > { %v2589_v48 = vpop.permute.xlu1 %2588  ;;  %v2278_v21 = vadd.f32 %v2222_v55, %v2148_v50 }
 0x3d6   : > { %v5951_v19 = vpop.permute.xlu0 %2348  ;;  %2935 = vst.msk [vmem:[#allocation3 + $0xb9] sm:$0x3f] %vm2914_vm6, %v2872_v63 }
 0x3d8   : > { %v2964_v14 = vld [vmem:[#allocation3 + $0xb0] sm:$0xff] }
 0x3d9   : > { %3942 = vmatprep.mubr.msk.f32.mxu0 %vm2879_vm5, %v2964_v14  ;;  %v2716_v27 = vpop.permute.xlu1 %2715  ;;  %v2405_v14 = vadd.f32 %v5951_v19, %v2278_v21 }
 0x3da   : > { %v2459_v40 = vpop.permute.xlu0 %2458 }
 0x3db   : > { %v2519_v17 = vadd.f32 %v2459_v40, %v2401_v29 }
 0x3dd   : > { %v2649_v42 = vadd.f32 %v2589_v48, %v2519_v17  ;;  %v2461_v4 = vpop.permute.xlu1 %2460  ;;  %v2965_v58 = vld [vmem:[#allocation3 + $0xb8] sm:$0xff] }
 0x3de   : > { %v2587_v25 = vpop.permute.xlu0 %2586  ;;  %3943 = vmatmul.mubr.msk.f32.gmra.mrb[52].mxu0 %vm2879_vm5, %v2965_v58  ;;  %v2520_v36 = vadd.f32 %v2461_v4, %v2402_v34  ;;  %v2972_v34 = vld [vmem:[#allocation3 + $0xf0] sm:$0xff] }
 0x3df   : > { %v2776_v20 = vadd.f32 %v2716_v27, %v2649_v42  ;;  %v2648_v62 = vadd.f32 %v2587_v25, %v2518_v41 }
 0x3e1   : > { %v2811_v9 = vmul.f32 %v5834_v47, %v2776_v20  ;;  %v2591_v23 = vpop.permute.xlu1 %2590 }
 0x3e2   : > { %v2714_v10 = vpop.permute.xlu0 %2713  ;;  %v2650_v39 = vadd.f32 %v2591_v23, %v2520_v36 }
 0x3e3   : > { %v2846_v45 = vadd.f32 %v5842_v49, %v2811_v9  ;;  %v2775_v57 = vadd.f32 %v2714_v10, %v2648_v62 }
 0x3e5   : > { %v2874_v31 = vmax.f32 %v2846_v45, 0.0  ;;  %v2810_v37 = vmul.f32 %v5834_v47, %v2775_v57  ;;  %v2718_v2 = vpop.permute.xlu1 %2717 }
 0x3e6   : > { %v2463_v46 = vpop.permute.xlu0 %2462  ;;  %v2777_v28 = vadd.f32 %v2718_v2, %v2650_v39 }
 0x3e7   : > { %v3923_v3 = vpop.f32.mrb[38].mxu0  ;;  %2937 = vst.msk [vmem:[#allocation3 + $0xc9] sm:$0x3f] %vm2914_vm6, %v2874_v31  ;;  %v2845_v8 = vadd.f32 %v5842_v49, %v2810_v37 }
 0x3e8   : > { %v3312_v5 = vmul.f32 %v3923_v3, %v6346_v52  ;;  %v3177_v22 = vpop.f32.mrb[39].mxu0  ;;  %v2812_v11 = vmul.f32 %v5834_v47, %v2777_v28 }
 0x3e9   : > { %v3311_v33 = vmul.f32 %v6346_v52, %v3177_v22  ;;  %v2873_v26 = vmax.f32 %v2845_v8, 0.0  ;;  %v2147_v52 = vadd.f32 %v5925_v6, %v5864_v7  ;;  %v2593_v60 = vpop.permute.xlu1 %2592 }
 0x3ea   : > { %v3351_v38 = vadd.f32 %v6347_v53, %v3312_v5  ;;  %v2465_v12 = vpop.permute.xlu0 %2464  ;;  %v2847_v54 = vadd.f32 %v5842_v49, %v2812_v11 }
 0x3eb   : > { %v3350_v56 = vadd.f32 %v6347_v53, %v3311_v33  ;;  %2936 = vst.msk [vmem:[#allocation3 + $0xc1] sm:$0xff] %vm2879_vm5, %v2873_v26  ;;  %v2521_v53 = vadd.f32 %v2463_v46, %v2403_v0  ;;  %v2277_v32 = vadd.f32 %v5937_v43, %v2147_v52  ;;  %v6018_v46 = vld [vmem:[%s6119_s9] ss:$0 sm:$0xff] }
 0x3ec   : > { %v3383_v24 = vmax.f32 %v3351_v38, 0.0  ;;  %v2875_v15 = vmax.f32 %v2847_v54, 0.0 }
 0x3ed   : > { %v3382_v18 = vmax.f32 %v3350_v56, 0.0  ;;  %v2651_v16 = vadd.f32 %v2593_v60, %v2521_v53  ;;  %v2404_v63 = vadd.f32 %v5943_v51, %v2277_v32  ;;  %v2720_v7 = vpop.permute.xlu1 %2719 }
 0x3ee   : > { %3415 = vst.msk [vmem:[%s5576_s23 + $0x48] sm:$0xff] %vm393_vm1, %v3383_v24  ;;  %v2467_v61 = vpop.permute.xlu0 %2466 }
 0x3ef   : > { %3414 = vst.msk [vmem:[%s5576_s23 + $0x40] sm:$0xff] %vm393_vm1, %v3382_v18  ;;  %v2778_v6 = vadd.f32 %v2720_v7, %v2651_v16  ;;  %v2522_v30 = vadd.f32 %v2465_v12, %v2404_v63  ;;  %v2523_v17 = vadd.f32 %v2467_v61, %v2405_v14 }
 0x3f0   : > { %2938 = vst.msk [vmem:[#allocation3 + $0xd1] sm:$0xff] %vm2879_vm5, %v2875_v15 }
 0x3f1   : > { %v2813_v40 = vmul.f32 %v5834_v47, %v2778_v6  ;;  %v2597_v55 = vpop.permute.xlu1 %2596 }
 0x3f2   : > { %v2595_v29 = vpop.permute.xlu0 %2594  ;;  %v2966_v48 = vld [vmem:[#allocation3 + $0xc0] sm:$0xff]  ;;  %v2967_v1 = vld [vmem:[#allocation3 + $0xc8] sm:$0xff]  ;;  %v2653_v41 = vadd.f32 %v2597_v55, %v2523_v17 }
 0x3f3   : > { %3945 = vmatprep.mubr.msk.f32.mxu0 %vm2879_vm5, %v2966_v48  ;;  %v2652_v43 = vadd.f32 %v2595_v29, %v2522_v30  ;;  %v2848_v51 = vadd.f32 %v5842_v49, %v2813_v40 }
 0x3f4   : > { %3946 = vmatmul.mubr.msk.f32.gmra.mrb[54].mxu0 %vm2879_vm5, %v2967_v1 }
 0x3f5   : > { %v2876_v25 = vmax.f32 %v2848_v51, 0.0  ;;  %v2724_v35 = vpop.permute.xlu1 %2723 }
 0x3f6   : > { %v2722_v42 = vpop.permute.xlu0 %2721  ;;  %v2780_v19 = vadd.f32 %v2724_v35, %v2653_v41 }
 0x3f7   : > { %v2779_v27 = vadd.f32 %v2722_v42, %v2652_v43  ;;  %v2968_v9 = vld [vmem:[#allocation3 + $0xd0] sm:$0xff]  ;;  %2939 = vst.msk [vmem:[#allocation3 + $0xd9] sm:$0x3f] %vm2914_vm6, %v2876_v25 }
 0x3f8   : > { %3948 = vmatprep.mubr.msk.f32.mxu0 %vm2879_vm5, %v2968_v9  ;;  %v2815_v4 = vmul.f32 %v5834_v47, %v2780_v19 }
 0x3f9   : > { %v2814_v20 = vmul.f32 %v5834_v47, %v2779_v27  ;;  %v6010_v47 = vld [vmem:[%s6118_s8] ss:$0 sm:$0xff] }
 0x3fa   : > { %v2850_v59 = vadd.f32 %v5842_v49, %v2815_v4 }
 0x3fb   : > { %v2849_v62 = vadd.f32 %v5842_v49, %v2814_v20 }
 0x3fc   : > { %v2878_v10 = vmax.f32 %v2850_v59, 0.0 }
 0x3fd   : > { %v2877_v58 = vmax.f32 %v2849_v62, 0.0 }
 0x3fe   : > { %v2969_v45 = vld [vmem:[#allocation3 + $0xd8] sm:$0xff]  ;;  %2941 = vst.msk [vmem:[#allocation3 + $0xe9] sm:$0x3f] %vm2914_vm6, %v2878_v10 }
 0x3ff   : > { %2940 = vst.msk [vmem:[#allocation3 + $0xe1] sm:$0xff] %vm2879_vm5, %v2877_v58  ;;  %3949 = vmatmul.mubr.msk.f32.gmra.mrb[56].mxu0 %vm2879_vm5, %v2969_v45 }
 0x406   : > { %v2970_v57 = vld [vmem:[#allocation3 + $0xe0] sm:$0xff]  ;;  %v2971_v31 = vld [vmem:[#allocation3 + $0xe8] sm:$0xff] }
 0x407   : > { %3951 = vmatprep.mubr.msk.f32.mxu0 %vm2879_vm5, %v2970_v57 }
 0x408   : > { %3952 = vmatmul.mubr.msk.f32.gmra.mrb[58].mxu0 %vm2879_vm5, %v2971_v31 }
 0x409   : > { %3954 = vmatprep.mubr.msk.f32.mxu0 %vm2879_vm5, %v2972_v34 }
 0x40b   : > { %v3926_v37 = vpop.f32.mrb[40].mxu0 }
 0x40c   : > { %v3314_v49 = vmul.f32 %v6010_v47, %v3926_v37  ;;  %v3187_v23 = vpop.f32.mrb[41].mxu0  ;;  %3955 = vmatmul.mubr.msk.f32.gmra.mrb[60].mxu0 %vm2879_vm5, %v2973_v44 }
 0x40d   : > { %v3313_v36 = vmul.f32 %v6010_v47, %v3187_v23 }
 0x40e   : > { %v3353_v3 = vadd.f32 %v6018_v46, %v3314_v49 }
 0x40f   : > { %v3352_v8 = vadd.f32 %v6018_v46, %v3313_v36 }
 0x410   : > { %v3385_v5 = vmax.f32 %v3353_v3, 0.0 }
 0x411   : > { %v3384_v22 = vmax.f32 %v3352_v8, 0.0 }
 0x412   : > { %3417 = vst.msk [vmem:[%s5576_s23 + $0x58] sm:$0xff] %vm393_vm1, %v3385_v5 }
 0x413   : > { %3416 = vst.msk [vmem:[%s5576_s23 + $0x50] sm:$0xff] %vm393_vm1, %v3384_v22 }
 0x429   : > { %v3929_v13 = vpop.f32.mrb[42].mxu0 }
 0x42a   : > { %v3316_v39 = vmul.f32 %v6010_v47, %v3929_v13  ;;  %v3197_v33 = vpop.f32.mrb[43].mxu0 }
 0x42b   : > { %v3315_v26 = vmul.f32 %v6010_v47, %v3197_v33 }
 0x42c   : > { %v3355_v38 = vadd.f32 %v6018_v46, %v3316_v39 }
 0x42d   : > { %v3354_v2 = vadd.f32 %v6018_v46, %v3315_v26 }
 0x42e   : > { %v3387_v56 = vmax.f32 %v3355_v38, 0.0 }
 0x42f   : > { %v3386_v28 = vmax.f32 %v3354_v2, 0.0 }
 0x430   : > { %3419 = vst.msk [vmem:[%s5576_s23 + $0x68] sm:$0xff] %vm393_vm1, %v3387_v56 }
 0x431   : > { %3418 = vst.msk [vmem:[%s5576_s23 + $0x60] sm:$0xff] %vm393_vm1, %v3386_v28 }
 0x449   : > { %v3932_v12 = vpop.f32.mrb[44].mxu0 }
 0x44a   : > { %v3318_v24 = vmul.f32 %v6010_v47, %v3932_v12  ;;  %v3207_v0 = vpop.f32.mrb[45].mxu0 }
 0x44b   : > { %v3317_v18 = vmul.f32 %v6010_v47, %v3207_v0 }
 0x44c   : > { %v3357_v11 = vadd.f32 %v6018_v46, %v3318_v24 }
 0x44d   : > { %v3356_v52 = vadd.f32 %v6018_v46, %v3317_v18 }
 0x44e   : > { %v3389_v60 = vmax.f32 %v3357_v11, 0.0 }
 0x44f   : > { %v3388_v50 = vmax.f32 %v3356_v52, 0.0 }
 0x450   : > { %3421 = vst.msk [vmem:[%s5576_s23 + $0x78] sm:$0xff] %vm393_vm1, %v3389_v60 }
 0x451   : > { %3420 = vst.msk [vmem:[%s5576_s23 + $0x70] sm:$0xff] %vm393_vm1, %v3388_v50 }
 0x469   : > { %v3935_v53 = vpop.f32.mrb[46].mxu0 }
 0x46a   : > { %v3320_v54 = vmul.f32 %v6010_v47, %v3935_v53  ;;  %v3217_v61 = vpop.f32.mrb[47].mxu0 }
 0x46b   : > { %v3319_v32 = vmul.f32 %v6010_v47, %v3217_v61 }
 0x46c   : > { %v3359_v21 = vadd.f32 %v6018_v46, %v3320_v54 }
 0x46d   : > { %v3358_v15 = vadd.f32 %v6018_v46, %v3319_v32 }
 0x46e   : > { %v3391_v16 = vmax.f32 %v3359_v21, 0.0 }
 0x46f   : > { %v3390_v63 = vmax.f32 %v3358_v15, 0.0 }
 0x470   : > { %3423 = vst.msk [vmem:[%s5576_s23 + $0x88] sm:$0xff] %vm393_vm1, %v3391_v16 }
 0x471   : > { %3422 = vst.msk [vmem:[%s5576_s23 + $0x80] sm:$0xff] %vm393_vm1, %v3390_v63 }
 0x485   : > { %v3938_v7 = vpop.f32.mrb[48].mxu0 }
 0x486   : > { %v3322_v6 = vmul.f32 %v6010_v47, %v3938_v7  ;;  %v3227_v29 = vpop.f32.mrb[49].mxu0 }
 0x487   : > { %v3321_v48 = vmul.f32 %v6010_v47, %v3227_v29 }
 0x488   : > { %v3361_v1 = vadd.f32 %v6018_v46, %v3322_v6 }
 0x489   : > { %v3360_v30 = vadd.f32 %v6018_v46, %v3321_v48 }
 0x48a   : > { %v3393_v14 = vmax.f32 %v3361_v1, 0.0 }
 0x48b   : > { %v3392_v40 = vmax.f32 %v3360_v30, 0.0 }
 0x48c   : > { %3425 = vst.msk [vmem:[%s5576_s23 + $0x98] sm:$0xff] %vm393_vm1, %v3393_v14 }
 0x48d   : > { %3424 = vst.msk [vmem:[%s5576_s23 + $0x90] sm:$0xff] %vm393_vm1, %v3392_v40 }
 0x499   : > { %v3941_v43 = vpop.f32.mrb[50].mxu0 }
 0x49a   : > { %v3324_v55 = vmul.f32 %v6010_v47, %v3941_v43  ;;  %v3237_v17 = vpop.f32.mrb[51].mxu0 }
 0x49b   : > { %v3323_v51 = vmul.f32 %v6010_v47, %v3237_v17 }
 0x49c   : > { %v3363_v42 = vadd.f32 %v6018_v46, %v3324_v55 }
 0x49d   : > { %v3362_v27 = vadd.f32 %v6018_v46, %v3323_v51 }
 0x49e   : > { %v3395_v25 = vmax.f32 %v3363_v42, 0.0 }
 0x49f   : > { %v3394_v41 = vmax.f32 %v3362_v27, 0.0 }
 0x4a0   : > { %3427 = vst.msk [vmem:[%s5576_s23 + $0xa8] sm:$0xff] %vm393_vm1, %v3395_v25 }
 0x4a1   : > { %3426 = vst.msk [vmem:[%s5576_s23 + $0xa0] sm:$0xff] %vm393_vm1, %v3394_v41 }
 0x4b1   : > { %v3944_v20 = vpop.f32.mrb[52].mxu0 }
 0x4b2   : > { %v3326_v35 = vmul.f32 %v6010_v47, %v3944_v20  ;;  %v3247_v9 = vpop.f32.mrb[53].mxu0 }
 0x4b3   : > { %v3325_v19 = vmul.f32 %v6010_v47, %v3247_v9 }
 0x4b4   : > { %v3365_v62 = vadd.f32 %v6018_v46, %v3326_v35 }
 0x4b5   : > { %v3364_v4 = vadd.f32 %v6018_v46, %v3325_v19 }
 0x4b6   : > { %v3397_v58 = vmax.f32 %v3365_v62, 0.0 }
 0x4b7   : > { %v3396_v59 = vmax.f32 %v3364_v4, 0.0 }
 0x4b8   : > { %3429 = vst.msk [vmem:[%s5576_s23 + $0xb8] sm:$0xff] %vm393_vm1, %v3397_v58 }
 0x4b9   : > { %3428 = vst.msk [vmem:[%s5576_s23 + $0xb0] sm:$0xff] %vm393_vm1, %v3396_v59 }
 0x4c7   : > { %v3947_v10 = vpop.f32.mrb[54].mxu0 }
 0x4c8   : > { %v3328_v45 = vmul.f32 %v6010_v47, %v3947_v10  ;;  %v3257_v57 = vpop.f32.mrb[55].mxu0 }
 0x4c9   : > { %v3327_v34 = vmul.f32 %v6010_v47, %v3257_v57 }
 0x4ca   : > { %v3367_v31 = vadd.f32 %v6018_v46, %v3328_v45 }
 0x4cb   : > { %v3366_v37 = vadd.f32 %v6018_v46, %v3327_v34 }
 0x4cc   : > { %v3399_v49 = vmax.f32 %v3367_v31, 0.0 }
 0x4cd   : > { %v3398_v23 = vmax.f32 %v3366_v37, 0.0 }
 0x4ce   : > { %3431 = vst.msk [vmem:[%s5576_s23 + $0xc8] sm:$0xff] %vm393_vm1, %v3399_v49 }
 0x4cf   : > { %3430 = vst.msk [vmem:[%s5576_s23 + $0xc0] sm:$0xff] %vm393_vm1, %v3398_v23 }
 0x4d2   : > { %v3950_v44 = vpop.f32.mrb[56].mxu0 }
 0x4d3   : > { %v3330_v36 = vmul.f32 %v6010_v47, %v3950_v44  ;;  %v3267_v3 = vpop.f32.mrb[57].mxu0 }
 0x4d4   : > { %v3329_v8 = vmul.f32 %v6010_v47, %v3267_v3 }
 0x4d5   : > { %v3369_v5 = vadd.f32 %v6018_v46, %v3330_v36 }
 0x4d6   : > { %v3368_v22 = vadd.f32 %v6018_v46, %v3329_v8 }
 0x4d7   : > { %v3401_v13 = vmax.f32 %v3369_v5, 0.0 }
 0x4d8   : > { %v3400_v39 = vmax.f32 %v3368_v22, 0.0 }
 0x4d9   : > { %3433 = vst.msk [vmem:[%s5576_s23 + $0xd8] sm:$0xff] %vm393_vm1, %v3401_v13 }
 0x4da   : > { %3432 = vst.msk [vmem:[%s5576_s23 + $0xd0] sm:$0xff] %vm393_vm1, %v3400_v39 }
 0x4db   : > { %v3953_v33 = vpop.f32.mrb[58].mxu0 }
 0x4dc   : > { %v3332_v26 = vmul.f32 %v6010_v47, %v3953_v33  ;;  %v3277_v38 = vpop.f32.mrb[59].mxu0 }
 0x4dd   : > { %v3331_v2 = vmul.f32 %v6010_v47, %v3277_v38 }
 0x4de   : > { %v3371_v56 = vadd.f32 %v6018_v46, %v3332_v26 }
 0x4df   : > { %v3370_v28 = vadd.f32 %v6018_v46, %v3331_v2  ;;  %v3956_v12 = vpop.f32.mrb[60].mxu0 }
 0x4e0   : > { %v3403_v24 = vmax.f32 %v3371_v56, 0.0  ;;  %v3334_v0 = vmul.f32 %v6010_v47, %v3956_v12  ;;  %v3287_v18 = vpop.f32.mrb[61].mxu0 }
 0x4e1   : > { %v3402_v11 = vmax.f32 %v3370_v28, 0.0  ;;  %v3333_v52 = vmul.f32 %v6010_v47, %v3287_v18 }
 0x4e2   : > { %3435 = vst.msk [vmem:[%s5576_s23 + $0xe8] sm:$0xff] %vm393_vm1, %v3403_v24  ;;  %v3373_v60 = vadd.f32 %v6018_v46, %v3334_v0 }
 0x4e3   : > { %3434 = vst.msk [vmem:[%s5576_s23 + $0xe0] sm:$0xff] %vm393_vm1, %v3402_v11  ;;  %v3372_v50 = vadd.f32 %v6018_v46, %v3333_v52 }
 0x4e4   : > { %v3405_v53 = vmax.f32 %v3373_v60, 0.0 }
 0x4e5   : > { %v3404_v54 = vmax.f32 %v3372_v50, 0.0 }
 0x4e6   : > { %3437 = vst.msk [vmem:[%s5576_s23 + $0xf8] sm:$0xff] %vm393_vm1, %v3405_v53 }
 0x4e7   : > { %3436 = vst.msk [vmem:[%s5576_s23 + $0xf0] sm:$0xff] %vm393_vm1, %v3404_v54 }
 0x4e8 PF: > { %s20_s13 = sadd.s32 1, %s3986_s13  }
 0x4e9   : > { %p17_p4 = scmp.ge.s32.totalorder %s20_s13, 4  }
 0x4eb   :  { %19 = sbr.rel (!%p17_p4) target bundleno = 1 (0x1), region = 93 }

</bundles_post_ra>
